<compile_context>
chip_gen: v5e
topology: v5e:2x2
jax: 0.10.0
libtpu: 0.0.40
codegen_flags: <defaults>
</compile_context>

<pallas_src>
import math
import functools

import jax
import jax.numpy as jnp
from jax import lax
from jax.experimental import pallas as pl
from jax.experimental.pallas import tpu as pltpu


def _embed_kernel(ids_ref, lut_ref, out_ref, *, scale):
    # ids_ref : (T, 1) int32 token ids for this tile (VMEM)
    # lut_ref : (K_pad, d_model) zero-padded embedding table, VMEM-resident
    # out_ref : (T, d_model) output tile
    k_pad = lut_ref.shape[0]
    tile_tokens = out_ref.shape[0]

    ids = ids_ref[...]                                                 # (T, 1)
    col = lax.broadcasted_iota(jnp.int32, (tile_tokens, k_pad), 1)
    # Scale folded into the one-hot: row value is sqrt(d_model) instead of
    # 1.0, so no post-matmul multiply is needed.  Out-of-range ids -> zero
    # row -> zero embedding.
    onehot = jnp.where(col == ids, jnp.float32(scale),
                       jnp.float32(0.0)).astype(lut_ref.dtype)         # (T, K_pad)

    gathered = jnp.dot(onehot, lut_ref[...],
                       preferred_element_type=jnp.float32,
                       precision=lax.Precision.HIGHEST)                # (T, d_model)
    out_ref[...] = gathered.astype(out_ref.dtype)


def _choose_tile_tokens(n_tok, block_tokens):
    """Largest tile dividing n_tok, multiple of 8, <= block_tokens.

    Prefers (a) a grid length >= 2 (so v7x's two TensorCores both get work)
    and (b) multiples of 256 (MXU height on v6e/v7x).
    Returns None if n_tok is not a multiple of 8 (caller falls back to pad).
    """
    if n_tok % 8 != 0:
        return None
    cap = min(block_tokens, n_tok)
    cands = [t for t in range(8, cap + 1, 8) if n_tok % t == 0]
    if not cands:
        return None
    return max(cands, key=lambda t: (n_tok // t >= 2, t % 256 == 0, t))


def embeddings_forward(x, lut, *, block_tokens=2048):
    """Pallas equivalent of `self.lut(x) * math.sqrt(self.d_model)`."""
    n_token, d_model = lut.shape
    B, S = x.shape
    n_tok = B * S
    scale = math.sqrt(d_model)
    itemsize = lut.dtype.itemsize

    # Pad the vocab / contraction dim to a multiple of 256 so the in-kernel
    # iota/compare and the MXU columns are unmasked.
    k_pad = pl.cdiv(n_token, 256) * 256
    lut_p = lut if k_pad == n_token else jnp.pad(
        lut, ((0, k_pad - n_token), (0, 0)))

    # Token tile that divides B*S exactly (no padded-tail slice needed).
    t = _choose_tile_tokens(n_tok, block_tokens)
    if t is None:
        # TODO(synk): handle ragged tails with an in-kernel masked store
        # instead of pad+slice when B*S is not a multiple of 8.
        t = min(block_tokens, max(8, ((n_tok + 7) // 8) * 8))
        t = max(8, (t // 8) * 8)
    n_pad = pl.cdiv(n_tok, t) * t

    ids = x.reshape(n_tok).astype(jnp.int32)
    if n_pad != n_tok:
        ids = jnp.pad(ids, (0, n_pad - n_tok))   # pad id 0 -> row 0, sliced off
    ids2d = ids.reshape(n_pad, 1)

    grid = (n_pad // t,)

    # Explicit scoped-VMEM budget (defaults: 16 MiB v5e, 32 MiB v6e/v7x).
    vmem_bytes = (
        2 * t * d_model * itemsize        # double-buffered output tile
        + k_pad * d_model * itemsize      # single-buffered LUT
        + 2 * t * 128 * 4                 # ids tile (lane-padded), double-buffered
        + t * k_pad * 4                   # one-hot intermediate (f32)
        + t * d_model * 4                 # f32 matmul accumulator
    )
    vmem_limit = int(min(max(3 * vmem_bytes, 8 << 20), 64 << 20))

    cost = pl.CostEstimate(
        flops=2 * n_pad * k_pad * d_model,
        transcendentals=0,
        bytes_accessed=(n_pad * d_model * itemsize     # output
                        + k_pad * d_model * itemsize   # table (fetched once)
                        + n_pad * 4),                  # ids
    )

    out_flat = pl.pallas_call(
        functools.partial(_embed_kernel, scale=scale),
        out_shape=jax.ShapeDtypeStruct((n_pad, d_model), lut.dtype),
        grid=grid,
        in_specs=[
            # Per-tile token ids (lane-sparse but tiny; acceptable).
            pl.BlockSpec((t, 1), lambda i: (i, 0)),
            # Full padded table, constant block index -> fetched once; a
            # constant operand doesn't need double-buffering.
            pl.BlockSpec((k_pad, d_model), lambda i: (0, 0),
                         pipeline_mode=pl.Buffered(1)),
        ],
        out_specs=pl.BlockSpec((t, d_model), lambda i: (i, 0)),
        compiler_params=pltpu.CompilerParams(
            dimension_semantics=("parallel",),
            vmem_limit_bytes=vmem_limit),
        cost_estimate=cost,
    )(ids2d, lut_p)

    if n_pad != n_tok:
        out_flat = out_flat[:n_tok]
    return out_flat.reshape(B, S, d_model)


if __name__ == "__main__":
    # Small shapes consistent with the module's forward (remi-style vocab,
    # lane-dense d_model).
    n_token = 200
    d_model = 128
    batch, seq = 2, 256

    key = jax.random.PRNGKey(0)
    k_lut, k_ids = jax.random.split(key)

    # nn.Embedding default init is N(0, 1).
    lut = jax.random.normal(k_lut, (n_token, d_model), dtype=jnp.float32)
    x = jax.random.randint(k_ids, (batch, seq), 0, n_token, dtype=jnp.int32)

    out = embeddings_forward(x, lut)
    out = jax.block_until_ready(out)

    # Reference semantics check (plain JAX).
    ref = jnp.take(lut, x, axis=0) * math.sqrt(d_model)
    assert out.shape == (batch, seq, d_model)
    assert out.dtype == jnp.float32
    assert jnp.allclose(out, ref, atol=1e-5, rtol=1e-5)

    print("KERNEL_OK")
</pallas_src>

<mosaic_0001>
module attributes {stable_mosaic.version = 11 : i64} {
  func.func @_embed_kernel(%arg0: i32, %arg1: memref<256x1xi32, #tpu.memory_space<vmem>>, %arg2: memref<256x128xf32, #tpu.memory_space<vmem>>, %arg3: memref<256x128xf32, #tpu.memory_space<vmem>>) attributes {dimension_semantics = [#tpu.dimension_semantics<parallel>], iteration_bounds = array<i64: 2>, scalar_prefetch = 0 : i64, scratch_operands = 0 : i64, tpu.core_type = #tpu.core_type<tc>, window_params = [{transform_indices = @transform_0, window_bounds = array<i64: 256, 1>}, {pipeline_mode = #tpu.pipeline_mode<synchronous>, transform_indices = @transform_1, window_bounds = array<i64: 256, 128>}, {transform_indices = @transform_2, window_bounds = array<i64: 256, 128>}]} {
    %c0 = arith.constant 0 : index
    %c0_0 = arith.constant 0 : index
    %0 = vector.load %arg1[%c0, %c0_0] : memref<256x1xi32, #tpu.memory_space<vmem>>, vector<256x1xi32>
    %1 = tpu.iota {dimensions = array<i32: 1>} : vector<256x256xi32>
    %2 = vector.broadcast %0 : vector<256x1xi32> to vector<256x256xi32>
    %3 = arith.cmpi eq, %1, %2 : vector<256x256xi32>
    %cst = arith.constant 11.3137083 : f32
    %cst_1 = arith.constant 0.000000e+00 : f32
    %4 = vector.broadcast %cst : f32 to vector<256x256xf32>
    %5 = vector.broadcast %cst_1 : f32 to vector<256x256xf32>
    %6 = arith.select %3, %4, %5 : vector<256x256xi1>, vector<256x256xf32>
    %c0_2 = arith.constant 0 : index
    %c0_3 = arith.constant 0 : index
    %7 = vector.load %arg2[%c0_2, %c0_3] : memref<256x128xf32, #tpu.memory_space<vmem>>, vector<256x128xf32>
    %cst_4 = arith.constant dense<0.000000e+00> : vector<256x128xf32>
    %8 = tpu.matmul %6, %7, %cst_4 {dimension_numbers = #tpu.dot_dimension_numbers<[1], [0], [0], [1], [0, 0, 1, 1], [], []>, precision = #tpu.contract_precision<fp32>} : vector<256x256xf32>, vector<256x128xf32>, vector<256x128xf32> -> vector<256x128xf32>
    %c0_5 = arith.constant 0 : index
    %c0_6 = arith.constant 0 : index
    %9 = vector.load %arg3[%c0_5, %c0_6] : memref<256x128xf32, #tpu.memory_space<vmem>>, vector<256x128xf32>
    tpu.vector_store %arg3[%c0_5, %c0_6], %8 {strides = array<i32>} : memref<256x128xf32, #tpu.memory_space<vmem>>, vector<256x128xf32>,
    return
  }
  func.func @transform_0(%arg0: i32) -> (i32, i32) {
    %c0_i32 = arith.constant 0 : i32
    %c0_i32_0 = arith.constant 0 : i32
    return %arg0, %c0_i32 : i32, i32
  }
  func.func @transform_1(%arg0: i32) -> (i32, i32) {
    %c0_i32 = arith.constant 0 : i32
    %c0_i32_0 = arith.constant 0 : i32
    %c0_i32_1 = arith.constant 0 : i32
    return %c0_i32, %c0_i32_0 : i32, i32
  }
  func.func @transform_2(%arg0: i32) -> (i32, i32) {
    %c0_i32 = arith.constant 0 : i32
    %c0_i32_0 = arith.constant 0 : i32
    return %arg0, %c0_i32 : i32, i32
  }
}

</mosaic_0001>

<bundles_post_ra>
// kernel: tpu_custom_call.1
= control target key start
LH: loop header
LB: loop body
LE: loop exit
PB: predicated region body
PF: predicated region fallthrough
CT: control target
= control target key end

     0   :  { %7 = vsyncpa [#allocation3], 0  ;;  %s5153_s0 = inlined_call_operand.vmem [shape: s32[512,1], index: 0, kind: input, shape index: {}]   ;;  %s5154_s1 = inlined_call_operand.vmem [shape: f32[256,128], index: 1, kind: input, shape index: {}]   ;;  %s5155_s2 = inlined_call_operand.hbm [shape: f32[512,128], index: 2, kind: output, shape index: {}]  }
   0x1   :  { %9 = vsyncpa [#allocation3 + $0x1], 0  ;;  %s3292_s9 = smov 0   ;;  %s3294_s10 = smov 0  }
   0x2   :  { %s3296_s11 = smov 0   ;;  %s3298_s12 = smov 0  }
   0x3 LB: > { %s3313_s13 = sadd.s32 4294967295, %s3271_s12   ;;  %s3150_s14 = sadd.s32 4294967294, %s3271_s12   ;;  %s3271_s12 = sphi %s3298_s12, %s5627_s12   ;;  %s3267_s11 = sphi %s3296_s11, %s5626_s11   ;;  %s3263_s10 = sphi %s3294_s10, %s5625_s10   ;;  %s3259_s9 = sphi %s3292_s9, %s5624_s9  }
   0x4   : > { %s3317_s15 = sadd.s32 1, %s3271_s12   ;;  %s69_s16 = sadd.s32 1, %s3267_s11 }
   0x5   : > { %s66_s17 = ssub.s32 %s3271_s12, %s3317_s15  ;;  %p79_p0 = scmp.ne.s32.totalorder %s3267_s11, %s3263_s10 }
   0x6   : > { %p67_p1 = scmp.eq.s32.totalorder %s66_s17, 0  ;;  %p80_p2 = scmp.eq.s32.totalorder %s3313_s13, 1 }
   0x7   : > { %p85_p3 = scmp.ne.s32.totalorder %s3263_s10, %s3259_s9  ;;  %p86_p4 = scmp.eq.s32.totalorder %s3150_s14, 1 }
   0x8   : > { %s3328_s18 = scalar_select %p67_p1, %s3267_s11, %s69_s16  }
   0x9   : > { %p3330_p5 = por %p80_p2, %p79_p0  ;;  %p3334_p6 = por %p86_p4, %p85_p3 }
   0xa   : > { %p3153_p7 = scmp.ge.s32.totalorder %s3271_s12, 1  ;;  %p116_p8 = scmp.lt.s32.totalorder %s3271_s12, 3 }
   0xc   : > { %p117_p9 = pnand %p3153_p7, %p116_p8 }
   0xe   : > { %120 = sbr.rel (%p117_p9) target bundleno = 1053 (0x41d), region = 28 }
  0x13   : > { %s3155_s21 = sshll.u32 %s3313_s13, 5  ;;  %v3273_v0 = vmov 0   ;;  %v419_v22 = vld [vmem:[%s5154_s1 + $0x78] sm:$0xff]  ;;  %v418_v24 = vld [vmem:[%s5154_s1 + $0x70] sm:$0xff]  ;;  %v417_v27 = vld [vmem:[%s5154_s1 + $0x68] sm:$0xff]  ;;  %s135_s6 = sand.u32 1, %s3263_s10  }
  0x14   : > { %3208 = vset.pattern.permute.xlu2 %v3273_v0  ;;  %3207 = vset.pattern.permute.xlu1 %v3273_v0  ;;  %p139_p10 = scmp.lt.s32.totalorder %s3155_s21, 63  ;;  %v3370_v23 = vand.u32 4294901760, %v419_v22  ;;  %v3378_v26 = vand.u32 4294901760, %v418_v24  ;;  %v3390_v30 = vand.u32 4294901760, %v417_v27  ;;  %v416_v31 = vld [vmem:[%s5154_s1 + $0x60] sm:$0xff]  ;;  %v415_v39 = vld [vmem:[%s5154_s1 + $0x58] sm:$0xff] }
  0x15   : > { %3206 = vset.pattern.permute.xlu0 %v3273_v0  ;;  %v3409_v38 = vand.u32 4294901760, %v416_v31  ;;  %v3420_v43 = vand.u32 4294901760, %v415_v39  ;;  %v414_v45 = vld [vmem:[%s5154_s1 + $0x50] sm:$0xff]  ;;  %v413_v51 = vld [vmem:[%s5154_s1 + $0x48] sm:$0xff]  ;;  %v412_v57 = vld [vmem:[%s5154_s1 + $0x40] sm:$0xff]  ;;  %s3154_s7 = sshll.u32 %s135_s6, 8 }
  0x16   : > { %s5629_s21 = smov (!%p139_p10, %s3155_s21), 63  ;;  %v3376_v25 = vsub.f32 %v419_v22, %v3370_v23  ;;  %1160 = vmatpush.msra.mxu3 %v3370_v23  ;;  %437 = vmatpush.msra.mxu0 %v3370_v23  ;;  %v3387_v29 = vsub.f32 %v418_v24, %v3378_v26  ;;  %v3404_v36 = vsub.f32 %v417_v27, %v3390_v30  ;;  %v3434_v49 = vand.u32 4294901760, %v414_v45  ;;  %s4985_s8 = scalar_lea.vmem [#allocation2], %s3154_s7 }
  0x17   : > { %s3156_s22 = sshll.u32 %s5629_s21, 3  ;;  %v3423_v44 = vsub.f32 %v416_v31, %v3409_v38  ;;  %v3432_v48 = vsub.f32 %v415_v39, %v3420_v43  ;;  %v3446_v55 = vand.u32 4294901760, %v413_v51  ;;  %v3466_v63 = vand.u32 4294901760, %v412_v57  ;;  %s3162_s14 = sshll.u32 %s3313_s13, 8 }
  0x18   : > { %s3344_s25 = scalar_lea.vmem %s5153_s0, %s3156_s22  ;;  %v727_v28 = vand.u32 4294901760, %v3376_v25  ;;  %952 = vmatpush.msra.mxu2 %v3376_v25  ;;  %1162 = vmatpush.msra.mxu3 %v3378_v26  ;;  %v733_v35 = vand.u32 4294901760, %v3387_v29  ;;  %v739_v42 = vand.u32 4294901760, %v3404_v36  ;;  %v3444_v54 = vsub.f32 %v414_v45, %v3434_v49  ;;  %s3085_s21 = sshll.u32 %s4985_s8, 4  ;;  %s3086_s21 = int_to_ptr.vmem [resolvable:$true] %s3085_s21 }
  0x19   : > { %v149_v1 = vld [vmem:[%s3344_s25 + $0x20] sm:$0xff]  ;;  %v147_v2 = vld [vmem:[%s3344_s25 + $0x10] sm:$0xff]  ;;  %v150_v4 = vld [vmem:[%s3344_s25 + $0x28] sm:$0xff]  ;;  %439 = vmatpush.msra.mxu0 %v3378_v26  ;;  %v745_v50 = vand.u32 4294901760, %v3423_v44  ;;  %v751_v53 = vand.u32 4294901760, %v3432_v48  ;;  %v3464_v62 = vsub.f32 %v413_v51, %v3446_v55  ;;  %s3073_s13 = scalar_lea.sflag [#allocation3], %s135_s6 }
  0x1a   : > { %v145_v3 = vld [vmem:[%s3344_s25] sm:$0xff]  ;;  %193 = vperm.xlu2 %3208, %v149_v1   ;;  %187 = vperm.xlu1 %3207, %v147_v2   ;;  %v148_v5 = vld [vmem:[%s3344_s25 + $0x18] sm:$0xff]  ;;  %v146_v6 = vld [vmem:[%s3344_s25 + $0x8] sm:$0xff]  ;;  %v728_v34 = vsub.f32 %v3376_v25, %v727_v28  ;;  %v734_v41 = vsub.f32 %v3387_v29, %v733_v35  ;;  %v740_v47 = vsub.f32 %v3404_v36, %v739_v42  ;;  %v757_v61 = vand.u32 4294901760, %v3444_v54  ;;  %s3229_s28 = scalar_lea.hbm %s5155_s2, 512 }
  0x1b   : > { %181 = vperm.xlu0 %3206, %v145_v3   ;;  %v153_v7 = vld [vmem:[%s3344_s25 + $0x40] sm:$0xff]  ;;  %v152_v8 = vld [vmem:[%s3344_s25 + $0x38] sm:$0xff]  ;;  %v151_v9 = vld [vmem:[%s3344_s25 + $0x30] sm:$0xff]  ;;  %955 = vmatpush.msra.mxu2 %v3387_v29  ;;  %v746_v56 = vsub.f32 %v3423_v44, %v745_v50  ;;  %v752_v60 = vsub.f32 %v3432_v48, %v751_v53 }
  0x1c   : > { %v156_v10 = vld [vmem:[%s3344_s25 + $0x58] sm:$0xff]  ;;  %v155_v11 = vld [vmem:[%s3344_s25 + $0x50] sm:$0xff]  ;;  %v154_v12 = vld [vmem:[%s3344_s25 + $0x48] sm:$0xff]  ;;  %1164 = vmatpush.msra.mxu3 %v3390_v30  ;;  %441 = vmatpush.msra.mxu0 %v3390_v30  ;;  %v729_v40 = vand.u32 4294901760, %v728_v34  ;;  %v735_v46 = vand.u32 4294901760, %v734_v41  ;;  %v741_v52 = vand.u32 4294901760, %v740_v47 }
  0x1d   : > { %v159_v13 = vld [vmem:[%s3344_s25 + $0x70] sm:$0xff]  ;;  %v158_v14 = vld [vmem:[%s3344_s25 + $0x68] sm:$0xff]  ;;  %v157_v15 = vld [vmem:[%s3344_s25 + $0x60] sm:$0xff]  ;;  %958 = vmatpush.msra.mxu2 %v3404_v36  ;;  %v747_v1 = vand.u32 4294901760, %v746_v56  ;;  %v753_v3 = vand.u32 4294901760, %v752_v60 }
  0x1e   : > { %v162_v16 = vld [vmem:[%s3344_s25 + $0x88] sm:$0xff]  ;;  %v161_v17 = vld [vmem:[%s3344_s25 + $0x80] sm:$0xff]  ;;  %v160_v18 = vld [vmem:[%s3344_s25 + $0x78] sm:$0xff]  ;;  %730 = vmatpush.msra.mxu1 %v729_v40  ;;  %1166 = vmatpush.msra.mxu3 %v3409_v38 }
  0x1f   : > { %v165_v19 = vld [vmem:[%s3344_s25 + $0xa0] sm:$0xff]  ;;  %v164_v20 = vld [vmem:[%s3344_s25 + $0x98] sm:$0xff]  ;;  %v163_v21 = vld [vmem:[%s3344_s25 + $0x90] sm:$0xff]  ;;  %961 = vmatpush.msra.mxu2 %v3423_v44  ;;  %443 = vmatpush.msra.mxu0 %v3409_v38 }
  0x20   : > { %v168_v32 = vld [vmem:[%s3344_s25 + $0xb8] sm:$0xff]  ;;  %v167_v33 = vld [vmem:[%s3344_s25 + $0xb0] sm:$0xff]  ;;  %v166_v37 = vld [vmem:[%s3344_s25 + $0xa8] sm:$0xff]  ;;  %736 = vmatpush.msra.mxu1 %v735_v46  ;;  %1168 = vmatpush.msra.mxu3 %v3420_v43 }
  0x21   : > { %964 = vmatpush.msra.mxu2 %v3432_v48  ;;  %v171_v58 = vld [vmem:[%s3344_s25 + $0xd0] sm:$0xff]  ;;  %v170_v59 = vld [vmem:[%s3344_s25 + $0xc8] sm:$0xff]  ;;  %445 = vmatpush.msra.mxu0 %v3420_v43  ;;  %v169_v0 = vld [vmem:[%s3344_s25 + $0xc0] sm:$0xff] }
  0x22   : > { %196 = vperm.xlu2 %3208, %v150_v4   ;;  %190 = vperm.xlu1 %3207, %v148_v5   ;;  %v411_v2 = vld [vmem:[%s5154_s1 + $0x38] sm:$0xff]  ;;  %v758_v4 = vsub.f32 %v3444_v54, %v757_v61  ;;  %v763_v5 = vand.u32 4294901760, %v3464_v62  ;;  %v173_v22 = vld [vmem:[%s3344_s25 + $0xe0] sm:$0xff]  ;;  %v406_v47 = vld [vmem:[%s5154_s1 + $0x10] sm:$0xff] }
  0x23   : > { %184 = vperm.xlu0 %3206, %v146_v6   ;;  %742 = vmatpush.msra.mxu1 %v741_v52  ;;  %v3480_v6 = vsub.f32 %v412_v57, %v3466_v63  ;;  %v435_v25 = vld [vmem:[%s5154_s1 + $0xf8] sm:$0xff] }
  0x24   : > { %967 = vmatpush.msra.mxu2 %v3444_v54  ;;  %1170 = vmatpush.msra.mxu3 %v3434_v49 }
  0x25   : > { %447 = vmatpush.msra.mxu0 %v3434_v49  ;;  %748 = vmatpush.msra.mxu1 %v747_v1 }
  0x26   : > { %970 = vmatpush.msra.mxu2 %v3464_v62  ;;  %1172 = vmatpush.msra.mxu3 %v3446_v55 }
  0x27   : > { %754 = vmatpush.msra.mxu1 %v753_v3  ;;  %449 = vmatpush.msra.mxu0 %v3446_v55  ;;  %v176_v3 = vld [vmem:[%s3344_s25 + $0xf8] sm:$0xff] }
  0x28   : > { %973 = vmatpush.msra.mxu2 %v3480_v6  ;;  %1174 = vmatpush.msra.mxu3 %v3466_v63 }
  0x29   : > { %451 = vmatpush.msra.mxu0 %v3466_v63 }
  0x2a   : > { %205 = vperm.xlu2 %3208, %v153_v7   ;;  %202 = vperm.xlu1 %3207, %v152_v8   ;;  %v3483_v7 = vand.u32 4294901760, %v411_v2  ;;  %v410_v8 = vld [vmem:[%s5154_s1 + $0x30] sm:$0xff] }
  0x2b   : > { %199 = vperm.xlu0 %3206, %v151_v9   ;;  %v759_v9 = vand.u32 4294901760, %v758_v4 }
  0x2c   : > { %1176 = vmatpush.msra.mxu3 %v3483_v7  ;;  %453 = vmatpush.msra.mxu0 %v3483_v7 }
  0x2d   : > { %760 = vmatpush.msra.mxu1 %v759_v9 }
  0x32   : > { %214 = vperm.xlu2 %3208, %v156_v10   ;;  %211 = vperm.xlu1 %3207, %v155_v11   ;;  %v764_v10 = vsub.f32 %v3464_v62, %v763_v5  ;;  %v769_v11 = vand.u32 4294901760, %v3480_v6 }
  0x33   : > { %208 = vperm.xlu0 %3206, %v154_v12   ;;  %v3492_v12 = vand.u32 4294901760, %v410_v8 }
  0x35   : > { %1178 = vmatpush.msra.mxu3 %v3492_v12  ;;  %455 = vmatpush.msra.mxu0 %v3492_v12 }
  0x3a   : > { %223 = vperm.xlu2 %3208, %v159_v13   ;;  %220 = vperm.xlu1 %3207, %v158_v14   ;;  %v3496_v13 = vsub.f32 %v411_v2, %v3483_v7  ;;  %v409_v14 = vld [vmem:[%s5154_s1 + $0x28] sm:$0xff] }
  0x3b   : > { %217 = vperm.xlu0 %3206, %v157_v15   ;;  %v765_v15 = vand.u32 4294901760, %v764_v10  ;;  %v405_v2 = vld [vmem:[%s5154_s1 + $0x8] sm:$0xff]  ;;  %v175_v10 = vld [vmem:[%s3344_s25 + $0xf0] sm:$0xff] }
  0x3c   : > { %976 = vmatpush.msra.mxu2 %v3496_v13  ;;  %v3577_v9 = vand.u32 4294901760, %v405_v2 }
  0x3d   : > { %766 = vmatpush.msra.mxu1 %v765_v15  ;;  %v404_v15 = vld [vmem:[%s5154_s1] sm:$0xff] }
  0x42   : > { %232 = vperm.xlu2 %3208, %v162_v16   ;;  %229 = vperm.xlu1 %3207, %v161_v17   ;;  %v770_v16 = vsub.f32 %v3480_v6, %v769_v11  ;;  %v3506_v17 = vsub.f32 %v410_v8, %v3492_v12 }
  0x43   : > { %226 = vperm.xlu0 %3206, %v160_v18   ;;  %v3509_v18 = vand.u32 4294901760, %v409_v14 }
  0x44   : > { %v771_v24 = vand.u32 4294901760, %v770_v16  ;;  %v781_v27 = vand.u32 4294901760, %v3506_v17  ;;  %979 = vmatpush.msra.mxu2 %v3506_v17 }
  0x45   : > { %v3521_v31 = vsub.f32 %v409_v14, %v3509_v18  ;;  %1180 = vmatpush.msra.mxu3 %v3509_v18  ;;  %457 = vmatpush.msra.mxu0 %v3509_v18 }
  0x46   : > { %v782_v39 = vsub.f32 %v3506_v17, %v781_v27  ;;  %772 = vmatpush.msra.mxu1 %v771_v24 }
  0x47   : > { %v787_v40 = vand.u32 4294901760, %v3521_v31  ;;  %982 = vmatpush.msra.mxu2 %v3521_v31 }
  0x48   : > { %v783_v51 = vand.u32 4294901760, %v782_v39 }
  0x49   : > { %v788_v52 = vsub.f32 %v3521_v31, %v787_v40 }
  0x4a   : > { %241 = vperm.xlu2 %3208, %v165_v19   ;;  %238 = vperm.xlu1 %3207, %v164_v20   ;;  %v775_v19 = vand.u32 4294901760, %v3496_v13  ;;  %v408_v20 = vld [vmem:[%s5154_s1 + $0x20] sm:$0xff] }
  0x4b   : > { %235 = vperm.xlu0 %3206, %v163_v21   ;;  %v174_v21 = vld [vmem:[%s3344_s25 + $0xe8] sm:$0xff] }
  0x4c   : > { %v776_v34 = vsub.f32 %v3496_v13, %v775_v19 }
  0x4e   : > { %v777_v46 = vand.u32 4294901760, %v776_v34 }
  0x50   : > { %778 = vmatpush.msra.mxu1 %v777_v46 }
  0x52   : > { %250 = vperm.xlu2 %3208, %v168_v32   ;;  %247 = vperm.xlu1 %3207, %v167_v33   ;;  %v3524_v32 = vand.u32 4294901760, %v408_v20  ;;  %v172_v33 = vld [vmem:[%s3344_s25 + $0xd8] sm:$0xff]  ;;  %s3084_s25 = scalar_lea.hbm %s5155_s2, %s3162_s14 }
  0x53   : > { %244 = vperm.xlu0 %3206, %v166_v37   ;;  %v407_v37 = vld [vmem:[%s5154_s1 + $0x18] sm:$0xff]  ;;  %784 = vmatpush.msra.mxu1 %v783_v51  ;;  %s3087_s22 = sshll.u32 %s3084_s25, 4  ;;  %s3088_s22 = int_to_ptr.hbm [resolvable:$true] %s3087_s22 }
  0x54   : > { %v3540_v41 = vsub.f32 %v408_v20, %v3524_v32  ;;  %v3543_v45 = vand.u32 4294901760, %v407_v37  ;;  %1182 = vmatpush.msra.mxu3 %v3524_v32  ;;  %v3587_v20 = vsub.f32 %v405_v2, %v3577_v9  ;;  %459 = vmatpush.msra.mxu0 %v3524_v32  ;;  %s3223_s23 = sshra.s32 %s3088_s22, 4  ;;  %s3224_s23 = int_to_ptr.hbm [resolvable:$true] %s3223_s23 }
  0x55   : > { %s3225_s24 = scalar_lea.hbm %s3224_s23, 256  ;;  %p3230_p0 = scmp.lt.s32.totalorder %s3224_s23, %s5155_s2 }
  0x56   : > { %v793_v56 = vand.u32 4294901760, %v3540_v41  ;;  %v3553_v57 = vsub.f32 %v407_v37, %v3543_v45  ;;  %985 = vmatpush.msra.mxu2 %v3540_v41  ;;  %v811_v24 = vand.u32 4294901760, %v3587_v20  ;;  %1184 = vmatpush.msra.mxu3 %v3543_v45  ;;  %p3226_p11 = scmp.ne.s32.totalorder %s3224_s23, %s3225_s24  ;;  %p3231_p1 = scmp.lt.s32.totalorder %s3229_s28, %s3225_s24 }
  0x57   : > { %461 = vmatpush.msra.mxu0 %v3543_v45 }
  0x58   : > { %v794_v60 = vsub.f32 %v3540_v41, %v793_v56  ;;  %988 = vmatpush.msra.mxu2 %v3553_v57  ;;  %v812_v37 = vsub.f32 %v3587_v20, %v811_v24  ;;  %p3227_p12 = pnand %p3226_p11, %p3330_p5  ;;  %p3232_p2 = por %p3231_p1, %p3230_p0 }
  0x5a   : > { %259 = vperm.xlu2 %3208, %v171_v58   ;;  %256 = vperm.xlu1 %3207, %v170_v59   ;;  %v3557_v58 = vand.u32 4294901760, %v406_v47  ;;  %v789_v59 = vand.u32 4294901760, %v788_v52  ;;  %v795_v4 = vand.u32 4294901760, %v794_v60  ;;  %v813_v46 = vand.u32 4294901760, %v812_v37  ;;  %p3228_p13 = pneg %p3227_p12 }
  0x5b   : > { %253 = vperm.xlu0 %3206, %v169_v0   ;;  %v799_v0 = vand.u32 4294901760, %v3553_v57 }
  0x5c   : > { %v3567_v1 = vsub.f32 %v406_v47, %v3557_v58  ;;  %790 = vmatpush.msra.mxu1 %v789_v59  ;;  %1186 = vmatpush.msra.mxu3 %v3557_v58  ;;  %p3233_p3 = pnand %p3232_p2, %p3228_p13 }
  0x5d   : > { %v800_v8 = vsub.f32 %v3553_v57, %v799_v0  ;;  %463 = vmatpush.msra.mxu0 %v3557_v58 }
  0x5e   : > { %v805_v14 = vand.u32 4294901760, %v3567_v1  ;;  %796 = vmatpush.msra.mxu1 %v795_v4  ;;  %991 = vmatpush.msra.mxu2 %v3567_v1 }
  0x5f   : > { %v801_v16 = vand.u32 4294901760, %v800_v8  ;;  %1188 = vmatpush.msra.mxu3 %v3577_v9  ;;  %465 = vmatpush.msra.mxu0 %v3577_v9 }
  0x60   : > { %994 = vmatpush.msra.mxu2 %v3587_v20 }
  0x61   : > { %802 = vmatpush.msra.mxu1 %v801_v16 }
  0x62   : > { %268 = vperm.xlu2 %3208, %v174_v21   ;;  %265 = vperm.xlu1 %3207, %v173_v22   ;;  %v3590_v21 = vand.u32 4294901760, %v404_v15  ;;  %v806_v22 = vsub.f32 %v3567_v1, %v805_v14 }
  0x63   : > { %262 = vperm.xlu0 %3206, %v172_v33  }
  0x64   : > { %v3598_v33 = vsub.f32 %v404_v15, %v3590_v21  ;;  %v807_v34 = vand.u32 4294901760, %v806_v22  ;;  %1190 = vmatpush.msra.mxu3 %v3590_v21  ;;  %467 = vmatpush.msra.mxu0 %v3590_v21 }
  0x66   : > { %v817_v39 = vand.u32 4294901760, %v3598_v33  ;;  %808 = vmatpush.msra.mxu1 %v807_v34  ;;  %997 = vmatpush.msra.mxu2 %v3598_v33 }
  0x67   : > { %1387 = vmatpush.msrb.mxu0 %v727_v28 }
  0x68   : > { %v818_v47 = vsub.f32 %v3598_v33, %v817_v39  ;;  %814 = vmatpush.msra.mxu1 %v813_v46 }
  0x69   : > { %1391 = vmatpush.msrb.mxu0 %v733_v35  ;;  %v177_v35 = vlaneseq }
  0x6a   : > { %274 = vperm.xlu1 %3207, %v176_v3   ;;  %v819_v51 = vand.u32 4294901760, %v818_v47 }
  0x6b   : > { %271 = vperm.xlu0 %3206, %v175_v10   ;;  %1395 = vmatpush.msrb.mxu0 %v739_v42  ;;  %v3667_v36 = vand.u32 127, %v177_v35  ;;  %v434_v42 = vld [vmem:[%s5154_s1 + $0xf0] sm:$0xff]  ;;  %v432_v10 = vld [vmem:[%s5154_s1 + $0xe0] sm:$0xff] }
  0x6c   : > { %820 = vmatpush.msra.mxu1 %v819_v51  ;;  %v3683_v48 = vand.u32 4294901760, %v434_v42 }
  0x6d   : > { %1399 = vmatpush.msrb.mxu0 %v745_v50 }
  0x6e   : > { %1578 = vmatpush.msrb.mxu1 %v3370_v23  ;;  %v3636_v23 = vand.u32 4294901760, %v435_v25 }
  0x6f   : > { %1403 = vmatpush.msrb.mxu0 %v751_v53 }
  0x70   : > { %1580 = vmatpush.msrb.mxu1 %v3378_v26  ;;  %1739 = vmatpush.msrb.mxu2 %v3636_v23  ;;  %v3643_v26 = vsub.f32 %v435_v25, %v3636_v23 }
  0x71   : > { %1407 = vmatpush.msrb.mxu0 %v757_v61 }
  0x72   : > { %1582 = vmatpush.msrb.mxu1 %v3390_v30  ;;  %v5163_v28 = vand.u32 4294901760, %v3643_v26  ;;  %1741 = vmatpush.msrb.mxu2 %v3683_v48 }
  0x73   : > { %1411 = vmatpush.msrb.mxu0 %v763_v5 }
  0x74   : > { %1584 = vmatpush.msrb.mxu1 %v3409_v38  ;;  %v2030_v29 = vsub.f32 %v3643_v26, %v5163_v28  ;;  %v3735_v52 = vpop.permute.xlu2 %193 }
  0x75   : > { %1415 = vmatpush.msrb.mxu0 %v769_v11  ;;  %vm284_vm4 = vcmp.eq.s32.totalorder %v3667_v36, %v3735_v52 }
  0x76   : > { %1586 = vmatpush.msrb.mxu1 %v3420_v43  ;;  %v2031_v30 = vand.u32 4294901760, %v2030_v29  ;;  %v5171_v43 = vmov 0.0  }
  0x77   : > { %1419 = vmatpush.msrb.mxu0 %v775_v19  ;;  %v433_v19 = vld [vmem:[%s5154_s1 + $0xe8] sm:$0xff] }
  0x78   : > { %1588 = vmatpush.msrb.mxu1 %v3434_v49  ;;  %2032 = vmatpush.msrb.mxu3 %v2031_v30 }
  0x79   : > { %1423 = vmatpush.msrb.mxu0 %v781_v27 }
  0x7a   : > { %1590 = vmatpush.msrb.mxu1 %v3446_v55  ;;  %v3704_v55 = vsub.f32 %v434_v42, %v3683_v48 }
  0x7b   : > { %1427 = vmatpush.msrb.mxu0 %v787_v40 }
  0x7c   : > { %1592 = vmatpush.msrb.mxu1 %v3466_v63  ;;  %v3752_v8 = vpop.permute.xlu2 %196 }
  0x7d   : > { %1431 = vmatpush.msrb.mxu0 %v793_v56  ;;  %vm286_vm5 = vcmp.eq.s32.totalorder %v3667_v36, %v3752_v8 }
  0x7e   : > { %1594 = vmatpush.msrb.mxu1 %v3483_v7  ;;  %v5162_v7 = vand.u32 4294901760, %v3704_v55  ;;  %v350_v20 = vsel %vm286_vm5, 11.313708, %v5171_v43 }
  0x7f   : > { %1435 = vmatpush.msrb.mxu0 %v799_v0  ;;  %v348_v0 = vsel %vm284_vm4, 11.313708, %v5171_v43  ;;  %v3771_v33 = vand.u32 4294901760, %v350_v20 }
  0x80   : > { %1596 = vmatpush.msrb.mxu1 %v3492_v12  ;;  %v3750_v2 = vand.u32 4294901760, %v348_v0 }
  0x81   : > { %1439 = vmatpush.msrb.mxu0 %v805_v14  ;;  %5354 = vst [vmem:[#allocation6_spill] sm:$0xff] %v3771_v33 }
  0x82   : > { %1598 = vmatpush.msrb.mxu1 %v3509_v18  ;;  %v2036_v18 = vsub.f32 %v3704_v55, %v5162_v7  ;;  %5353 = vst [vmem:[#allocation5_spill] sm:$0xff] %v3750_v2  ;;  %v501_v14 = vsub.f32 %v348_v0, %v3750_v2 }
  0x83   : > { %1443 = vmatpush.msrb.mxu0 %v811_v24 }
  0x84   : > { %1600 = vmatpush.msrb.mxu1 %v3524_v32  ;;  %v2037_v40 = vand.u32 4294901760, %v2036_v18  ;;  %v502_v37 = vand.u32 4294901760, %v501_v14 }
  0x85   : > { %1447 = vmatpush.msrb.mxu0 %v817_v39  ;;  %v509_v39 = vsub.f32 %v350_v20, %v3771_v33 }
  0x86   : > { %1602 = vmatpush.msrb.mxu1 %v3543_v45  ;;  %v3733_v45 = vand.u32 4294901760, %v433_v19  ;;  %2038 = vmatpush.msrb.mxu3 %v2037_v40  ;;  %v503_v46 = vsub.f32 %v501_v14, %v502_v37 }
  0x87   : > { %v510_v42 = vand.u32 4294901760, %v509_v39 }
  0x88   : > { %1604 = vmatpush.msrb.mxu1 %v3557_v58  ;;  %1743 = vmatpush.msrb.mxu2 %v3733_v45  ;;  %v3746_v1 = vsub.f32 %v433_v19, %v3733_v45  ;;  %v504_v35 = vand.u32 4294901760, %v503_v46 }
  0x8a   : > { %1606 = vmatpush.msrb.mxu1 %v3577_v9  ;;  %v5161_v9 = vand.u32 4294901760, %v3746_v1 }
  0x8c   : > { %1608 = vmatpush.msrb.mxu1 %v3590_v21  ;;  %v3696_v53 = vpop.permute.xlu1 %187  ;;  %v2042_v16 = vsub.f32 %v3746_v1, %v5161_v9  ;;  %v3765_v21 = vand.u32 4294901760, %v432_v10 }
  0x8d   : > { %v3671_v38 = vpop.permute.xlu0 %181  ;;  %vm280_vm2 = vcmp.eq.s32.totalorder %v3667_v36, %v3696_v53 }
  0x8e   : > { %vm276_vm0 = vcmp.eq.s32.totalorder %v3667_v36, %v3671_v38  ;;  %v344_v5 = vsel %vm280_vm2, 11.313708, %v5171_v43  ;;  %v2043_v22 = vand.u32 4294901760, %v2042_v16  ;;  %1745 = vmatpush.msrb.mxu2 %v3765_v21  ;;  %v3778_v47 = vsub.f32 %v432_v10, %v3765_v21 }
  0x8f   : > { %v340_v44 = vsel %vm276_vm0, 11.313708, %v5171_v43  ;;  %v3716_v12 = vand.u32 4294901760, %v344_v5 }
  0x90   : > { %v3688_v49 = vand.u32 4294901760, %v340_v44  ;;  %2044 = vmatpush.msrb.mxu3 %v2043_v22  ;;  %v5160_v25 = vand.u32 4294901760, %v3778_v47 }
  0x91   : > { %v485_v27 = vsub.f32 %v344_v5, %v3716_v12 }
  0x92   : > { %v469_v50 = vsub.f32 %v340_v44, %v3688_v49  ;;  %822 = vmatmul.f32.vlgmr.msra.gmra.mxu1 %v3688_v49  ;;  %v2048_v44 = vsub.f32 %v3778_v47, %v5160_v25 }
  0x93   : > { %2462 = vmatpush.msra.mxu1 %v3636_v23  ;;  %v486_v58 = vand.u32 4294901760, %v485_v27 }
  0x94   : > { %1000 = vmatmul.f32.vlgmr.msra.gmra.mxu2 %v469_v50  ;;  %v470_v63 = vand.u32 4294901760, %v469_v50  ;;  %v3718_v17 = vpop.permute.xlu1 %190  ;;  %v2049_v5 = vand.u32 4294901760, %v2048_v44 }
  0x95   : > { %v3698_v54 = vpop.permute.xlu0 %184  ;;  %2464 = vmatpush.msra.mxu1 %v3683_v48  ;;  %vm282_vm3 = vcmp.eq.s32.totalorder %v3667_v36, %v3718_v17  ;;  %v487_v60 = vsub.f32 %v485_v27, %v486_v58 }
  0x96   : > { %vm278_vm1 = vcmp.eq.s32.totalorder %v3667_v36, %v3698_v54  ;;  %1194 = vmatmul.f32.vlgmr.msra.gmra.mxu3 %v470_v63  ;;  %v471_v11 = vsub.f32 %v469_v50, %v470_v63  ;;  %v346_v32 = vsel %vm282_vm3, 11.313708, %v5171_v43  ;;  %v431_v50 = vld [vmem:[%s5154_s1 + $0xd8] sm:$0xff]  ;;  %v511_v63 = vsub.f32 %v509_v39, %v510_v42 }
  0x97   : > { %v342_v61 = vsel %vm278_vm1, 11.313708, %v5171_v43  ;;  %v3737_v56 = vand.u32 4294901760, %v346_v32  ;;  %2466 = vmatpush.msra.mxu1 %v3733_v45  ;;  %v488_v3 = vand.u32 4294901760, %v487_v60  ;;  %2050 = vmatpush.msrb.mxu3 %v2049_v5  ;;  %v430_v60 = vld [vmem:[%s5154_s1 + $0xd0] sm:$0xff] }
  0x98   : > { %v3710_v62 = vand.u32 4294901760, %v342_v61  ;;  %v472_v13 = vand.u32 4294901760, %v471_v11  ;;  %v3798_v11 = vand.u32 4294901760, %v431_v50  ;;  %v512_v19 = vand.u32 4294901760, %v511_v63  ;;  %v429_v63 = vld [vmem:[%s5154_s1 + $0xc8] sm:$0xff] }
  0x99   : > { %v493_v59 = vsub.f32 %v346_v32, %v3737_v56  ;;  %2468 = vmatpush.msra.mxu1 %v3765_v21  ;;  %v3856_v5 = vand.u32 4294901760, %v429_v63 }
  0x9a   : > { %v477_v6 = vsub.f32 %v342_v61, %v3710_v62  ;;  %826 = vmatmul.f32.gmra.mxu1 %v3710_v62  ;;  %473 = vmatmul.f32.vlgmr.msra.gmra.mxu0 %v472_v13  ;;  %v3803_v13 = vsub.f32 %v431_v50, %v3798_v11 }
  0x9b   : > { %2254 = vmatpush.msra.mxu0 %v3643_v26  ;;  %v494_v4 = vand.u32 4294901760, %v493_v59  ;;  %1747 = vmatpush.msrb.mxu2 %v3798_v11 }
  0x9c   : > { %1005 = vmatmul.f32.gmra.mxu2 %v477_v6  ;;  %v478_v31 = vand.u32 4294901760, %v477_v6  ;;  %v3783_v29 = vpop.permute.xlu1 %202  ;;  %2470 = vmatpush.msra.mxu1 %v3798_v11  ;;  %v5159_v32 = vand.u32 4294901760, %v3803_v13 }
  0x9d   : > { %2257 = vmatpush.msra.mxu0 %v3704_v55  ;;  %v495_v15 = vsub.f32 %v493_v59, %v494_v4  ;;  %v3768_v24 = vpop.permute.xlu0 %199  ;;  %5355 = vst [vmem:[#allocation7_spill] sm:$0xff] %v3783_v29  ;;  %vm290_vm7 = vcmp.eq.s32.totalorder %v3667_v36, %v3783_v29 }
  0x9e   : > { %1200 = vmatmul.f32.gmra.mxu3 %v478_v31  ;;  %v479_v41 = vsub.f32 %v477_v6, %v478_v31  ;;  %vm288_vm6 = vcmp.eq.s32.totalorder %v3667_v36, %v3768_v24  ;;  %v354_v6 = vsel %vm290_vm7, 11.313708, %v5171_v43  ;;  %v3808_v31 = vpop.permute.xlu2 %205 }
  0x9f   : > { %2260 = vmatpush.msra.mxu0 %v3746_v1  ;;  %v496_v34 = vand.u32 4294901760, %v495_v15  ;;  %v352_v51 = vsel %vm288_vm6, 11.313708, %v5171_v43  ;;  %v3805_v18 = vand.u32 4294901760, %v354_v6  ;;  %5358 = vst [vmem:[#allocation10_spill] sm:$0xff] %v3808_v31  ;;  %vm292_vm8 = vcmp.eq.s32.totalorder %v3667_v36, %v3808_v31 }
  0xa0   : > { %v480_v57 = vand.u32 4294901760, %v479_v41  ;;  %v3786_v30 = vand.u32 4294901760, %v352_v51 }
  0xa1   : > { %2263 = vmatpush.msra.mxu0 %v3778_v47  ;;  %5357 = vst [vmem:[#allocation9_spill] sm:$0xff] %v3805_v18  ;;  %v525_v40 = vsub.f32 %v354_v6, %v3805_v18 }
  0xa2   : > { %830 = vmatmul.f32.gmra.mxu1 %v3716_v12  ;;  %481 = vmatmul.f32.gmra.mxu0 %v480_v57  ;;  %5356 = vst [vmem:[#allocation8_spill] sm:$0xff] %v3786_v30  ;;  %v517_v61 = vsub.f32 %v352_v51, %v3786_v30  ;;  %v2054_v57 = vsub.f32 %v3803_v13, %v5159_v32 }
  0xa3   : > { %2266 = vmatpush.msra.mxu0 %v3803_v13 }
  0xa4   : > { %1010 = vmatmul.f32.gmra.mxu2 %v485_v27  ;;  %v518_v27 = vand.u32 4294901760, %v517_v61 }
  0xa5   : > { %v3823_v0 = vpop.permute.xlu0 %208 }
  0xa6   : > { %1206 = vmatmul.f32.gmra.mxu3 %v486_v58  ;;  %v519_v41 = vsub.f32 %v517_v61, %v518_v27  ;;  %v356_v58 = vsel %vm292_vm8, 11.313708, %v5171_v43  ;;  %5359 = vst [vmem:[#allocation11_spill] sm:$0xff] %v3823_v0  ;;  %vm294_vm9 = vcmp.eq.s32.totalorder %v3667_v36, %v3823_v0 }
  0xa8   : > { %v520_v10 = vand.u32 4294901760, %v519_v41  ;;  %v3867_v41 = vsub.f32 %v429_v63, %v3856_v5 }
  0xaa   : > { %834 = vmatmul.f32.gmra.mxu1 %v3737_v56  ;;  %489 = vmatmul.f32.gmra.mxu0 %v488_v3  ;;  %v3825_v3 = vand.u32 4294901760, %v430_v60 }
  0xac   : > { %1015 = vmatmul.f32.gmra.mxu2 %v493_v59  ;;  %v2055_v59 = vand.u32 4294901760, %v2054_v57  ;;  %2472 = vmatpush.msra.mxu1 %v3825_v3  ;;  %v3834_v15 = vsub.f32 %v430_v60, %v3825_v3 }
  0xad   : > { %1749 = vmatpush.msrb.mxu2 %v3825_v3 }
  0xae   : > { %1212 = vmatmul.f32.gmra.mxu3 %v494_v4  ;;  %v3827_v4 = vand.u32 4294901760, %v356_v58  ;;  %v5158_v22 = vand.u32 4294901760, %v3834_v15  ;;  %2269 = vmatpush.msra.mxu0 %v3834_v15 }
  0xaf   : > { %2056 = vmatpush.msrb.mxu3 %v2055_v59  ;;  %1751 = vmatpush.msrb.mxu2 %v3856_v5  ;;  %v5156_v59 = vand.u32 4294901760, %v3867_v41 }
  0xb0   : > { %5360 = vst [vmem:[#allocation12_spill] sm:$0xff] %v3827_v4  ;;  %v533_v16 = vsub.f32 %v356_v58, %v3827_v4  ;;  %2474 = vmatpush.msra.mxu1 %v3856_v5  ;;  %2272 = vmatpush.msra.mxu0 %v3867_v41 }
  0xb2   : > { %838 = vmatmul.f32.gmra.mxu1 %v3750_v2  ;;  %497 = vmatmul.f32.gmra.mxu0 %v496_v34  ;;  %v358_v34 = vsel %vm294_vm9, 11.313708, %v5171_v43 }
  0xb3   : > { %v3846_v46 = vand.u32 4294901760, %v358_v34 }
  0xb4   : > { %1020 = vmatmul.f32.gmra.mxu2 %v501_v14  ;;  %v526_v14 = vand.u32 4294901760, %v525_v40 }
  0xb5   : > { %5362 = vst [vmem:[#allocation14_spill] sm:$0xff] %v3846_v46  ;;  %v541_v44 = vsub.f32 %v358_v34, %v3846_v46 }
  0xb6   : > { %1218 = vmatmul.f32.gmra.mxu3 %v502_v37  ;;  %v527_v20 = vsub.f32 %v525_v40, %v526_v14  ;;  %v2060_v37 = vsub.f32 %v3834_v15, %v5158_v22 }
  0xb8   : > { %v528_v51 = vand.u32 4294901760, %v527_v20 }
  0xba   : > { %842 = vmatmul.f32.gmra.mxu1 %v3771_v33  ;;  %505 = vmatmul.f32.gmra.mxu0 %v504_v35  ;;  %v534_v35 = vand.u32 4294901760, %v533_v16 }
  0xbc   : > { %1025 = vmatmul.f32.gmra.mxu2 %v509_v39  ;;  %v3844_v39 = vpop.permute.xlu1 %211  ;;  %v535_v50 = vsub.f32 %v533_v16, %v534_v35 }
  0xbd   : > { %5361 = vst [vmem:[#allocation13_spill] sm:$0xff] %v3844_v39  ;;  %vm296_vm10 = vcmp.eq.s32.totalorder %v3667_v36, %v3844_v39 }
  0xbe   : > { %1224 = vmatmul.f32.gmra.mxu3 %v510_v42  ;;  %v2061_v42 = vand.u32 4294901760, %v2060_v37 }
  0xc0   : > { %2062 = vmatpush.msrb.mxu3 %v2061_v42 }
  0xc2   : > { %846 = vmatmul.f32.gmra.mxu1 %v3786_v30  ;;  %513 = vmatmul.f32.gmra.mxu0 %v512_v19  ;;  %v536_v19 = vand.u32 4294901760, %v535_v50 }
  0xc4   : > { %1030 = vmatmul.f32.gmra.mxu2 %v517_v61  ;;  %v360_v61 = vsel %vm296_vm10, 11.313708, %v5171_v43  ;;  %v3889_v50 = vpop.permute.xlu1 %220 }
  0xc5   : > { %v3858_v6 = vand.u32 4294901760, %v360_v61  ;;  %5367 = vst [vmem:[#allocation19_spill] sm:$0xff] %v3889_v50  ;;  %vm302_vm13 = vcmp.eq.s32.totalorder %v3667_v36, %v3889_v50 }
  0xc6   : > { %1230 = vmatmul.f32.gmra.mxu3 %v518_v27  ;;  %v542_v27 = vand.u32 4294901760, %v541_v44 }
  0xc7   : > { %5363 = vst [vmem:[#allocation15_spill] sm:$0xff] %v3858_v6  ;;  %v549_v57 = vsub.f32 %v360_v61, %v3858_v6 }
  0xc8   : > { %v543_v58 = vsub.f32 %v541_v44, %v542_v27 }
  0xc9   : > { %v550_v34 = vand.u32 4294901760, %v549_v57 }
  0xca   : > { %850 = vmatmul.f32.gmra.mxu1 %v3805_v18  ;;  %521 = vmatmul.f32.gmra.mxu0 %v520_v10  ;;  %v2066_v10 = vsub.f32 %v3867_v41, %v5156_v59  ;;  %v544_v20 = vand.u32 4294901760, %v543_v58 }
  0xcc   : > { %1035 = vmatmul.f32.gmra.mxu2 %v525_v40  ;;  %v3860_v40 = vpop.permute.xlu2 %214  ;;  %v2067_v37 = vand.u32 4294901760, %v2066_v10 }
  0xcd   : > { %5364 = vst [vmem:[#allocation16_spill] sm:$0xff] %v3860_v40  ;;  %vm298_vm11 = vcmp.eq.s32.totalorder %v3667_v36, %v3860_v40 }
  0xce   : > { %1236 = vmatmul.f32.gmra.mxu3 %v526_v14  ;;  %v362_v60 = vsel %vm298_vm11, 11.313708, %v5171_v43  ;;  %v3877_v14 = vpop.permute.xlu0 %217 }
  0xcf   : > { %5365 = vst [vmem:[#allocation17_spill] sm:$0xff] %v3877_v14  ;;  %vm300_vm12 = vcmp.eq.s32.totalorder %v3667_v36, %v3877_v14  ;;  %2068 = vmatpush.msrb.mxu3 %v2067_v37 }
  0xd0   : > { %v364_v42 = vsel %vm300_vm12, 11.313708, %v5171_v43 }
  0xd1   : > { %v3893_v63 = vand.u32 4294901760, %v364_v42 }
  0xd2   : > { %854 = vmatmul.f32.gmra.mxu1 %v3827_v4  ;;  %529 = vmatmul.f32.gmra.mxu0 %v528_v51 }
  0xd3   : > { %5368 = vst [vmem:[#allocation20_spill] sm:$0xff] %v3893_v63  ;;  %v565_v58 = vsub.f32 %v364_v42, %v3893_v63 }
  0xd4   : > { %1040 = vmatmul.f32.gmra.mxu2 %v533_v16  ;;  %v3879_v16 = vand.u32 4294901760, %v362_v60 }
  0xd6   : > { %1242 = vmatmul.f32.gmra.mxu3 %v534_v35  ;;  %5366 = vst [vmem:[#allocation18_spill] sm:$0xff] %v3879_v16  ;;  %v557_v51 = vsub.f32 %v362_v60, %v3879_v16  ;;  %v551_v35 = vsub.f32 %v549_v57, %v550_v34 }
  0xda   : > { %858 = vmatmul.f32.gmra.mxu1 %v3846_v46  ;;  %537 = vmatmul.f32.gmra.mxu0 %v536_v19  ;;  %v552_v19 = vand.u32 4294901760, %v551_v35 }
  0xdc   : > { %1045 = vmatmul.f32.gmra.mxu2 %v541_v44  ;;  %v428_v44 = vld [vmem:[%s5154_s1 + $0xc0] sm:$0xff] }
  0xdd   : > { %v3891_v61 = vand.u32 4294901760, %v428_v44 }
  0xde   : > { %1248 = vmatmul.f32.gmra.mxu3 %v542_v27  ;;  %v558_v27 = vand.u32 4294901760, %v557_v51 }
  0xdf   : > { %1753 = vmatpush.msrb.mxu2 %v3891_v61  ;;  %2476 = vmatpush.msra.mxu1 %v3891_v61 }
  0xe0   : > { %v559_v60 = vsub.f32 %v557_v51, %v558_v27 }
  0xe2   : > { %862 = vmatmul.f32.gmra.mxu1 %v3858_v6  ;;  %545 = vmatmul.f32.gmra.mxu0 %v544_v20  ;;  %v366_v20 = vsel %vm302_vm13, 11.313708, %v5171_v43  ;;  %v560_v35 = vand.u32 4294901760, %v559_v60 }
  0xe3   : > { %v3910_v37 = vand.u32 4294901760, %v366_v20 }
  0xe4   : > { %1050 = vmatmul.f32.gmra.mxu2 %v549_v57  ;;  %v3900_v57 = vsub.f32 %v428_v44, %v3891_v61  ;;  %v566_v44 = vand.u32 4294901760, %v565_v58 }
  0xe5   : > { %5369 = vst [vmem:[#allocation21_spill] sm:$0xff] %v3910_v37 }
  0xe6   : > { %1254 = vmatmul.f32.gmra.mxu3 %v550_v34  ;;  %v5157_v10 = vand.u32 4294901760, %v3900_v57  ;;  %2275 = vmatpush.msra.mxu0 %v3900_v57 }
  0xe8   : > { %v2072_v34 = vsub.f32 %v3900_v57, %v5157_v10  ;;  %v3919_v10 = vpop.permute.xlu0 %226 }
  0xe9   : > { %5371 = vst [vmem:[#allocation23_spill] sm:$0xff] %v3919_v10  ;;  %vm306_vm15 = vcmp.eq.s32.totalorder %v3667_v36, %v3919_v10 }
  0xea   : > { %866 = vmatmul.f32.gmra.mxu1 %v3879_v16  ;;  %553 = vmatmul.f32.gmra.mxu0 %v552_v19  ;;  %v2073_v42 = vand.u32 4294901760, %v2072_v34  ;;  %v573_v19 = vsub.f32 %v366_v20, %v3910_v37 }
  0xec   : > { %1055 = vmatmul.f32.gmra.mxu2 %v557_v51  ;;  %v3912_v51 = vpop.permute.xlu2 %223  ;;  %2074 = vmatpush.msrb.mxu3 %v2073_v42  ;;  %v574_v22 = vand.u32 4294901760, %v573_v19  ;;  %v370_v42 = vsel %vm306_vm15, 11.313708, %v5171_v43 }
  0xed   : > { %5370 = vst [vmem:[#allocation22_spill] sm:$0xff] %v3912_v51  ;;  %vm304_vm14 = vcmp.eq.s32.totalorder %v3667_v36, %v3912_v51 }
  0xee   : > { %1260 = vmatmul.f32.gmra.mxu3 %v558_v27  ;;  %v567_v27 = vsub.f32 %v565_v58, %v566_v44  ;;  %v368_v59 = vsel %vm304_vm14, 11.313708, %v5171_v43 }
  0xef   : > { %v3921_v60 = vand.u32 4294901760, %v368_v59 }
  0xf0   : > { %v568_v34 = vand.u32 4294901760, %v567_v27 }
  0xf1   : > { %5372 = vst [vmem:[#allocation24_spill] sm:$0xff] %v3921_v60 }
  0xf2   : > { %870 = vmatmul.f32.gmra.mxu1 %v3893_v63  ;;  %561 = vmatmul.f32.gmra.mxu0 %v560_v35  ;;  %v581_v35 = vsub.f32 %v368_v59, %v3921_v60  ;;  %v3942_v59 = vand.u32 4294901760, %v370_v42  ;;  %v5379_v63 = vmov 0.0  }
  0xf4   : > { %1060 = vmatmul.f32.gmra.mxu2 %v565_v58  ;;  %v427_v58 = vld [vmem:[%s5154_s1 + $0xb8] sm:$0xff]  ;;  %5374 = vst [vmem:[#allocation26_spill] sm:$0xff] %v3942_v59  ;;  %v582_v25 = vand.u32 4294901760, %v581_v35  ;;  %v589_v9 = vsub.f32 %v370_v42, %v3942_v59 }
  0xf5   : > { %v3928_v20 = vand.u32 4294901760, %v427_v58 }
  0xf6   : > { %1266 = vmatmul.f32.gmra.mxu3 %v566_v44  ;;  %v575_v44 = vsub.f32 %v573_v19, %v574_v22  ;;  %v583_v7 = vsub.f32 %v581_v35, %v582_v25 }
  0xf7   : > { %1755 = vmatpush.msrb.mxu2 %v3928_v20  ;;  %v3934_v27 = vsub.f32 %v427_v58, %v3928_v20  ;;  %2478 = vmatpush.msra.mxu1 %v3928_v20 }
  0xf9   : > { %v5168_v32 = vand.u32 4294901760, %v3934_v27  ;;  %2278 = vmatpush.msra.mxu0 %v3934_v27 }
  0xfa   : > { %874 = vmatmul.f32.gmra.mxu1 %v3910_v37  ;;  %569 = vmatmul.f32.gmra.mxu0 %v568_v34  ;;  %v3938_v34 = vpop.permute.xlu1 %229  ;;  %v590_v37 = vand.u32 4294901760, %v589_v9 }
  0xfb   : > { %5373 = vst [vmem:[#allocation25_spill] sm:$0xff] %v3938_v34  ;;  %v2078_v58 = vsub.f32 %v3934_v27, %v5168_v32  ;;  %vm308_vm0 = vcmp.eq.s32.totalorder %v3667_v36, %v3938_v34  ;;  %v3954_v32 = vpop.permute.xlu2 %232 }
  0xfc   : > { %1065 = vmatmul.f32.gmra.mxu2 %v573_v19  ;;  %v576_v19 = vand.u32 4294901760, %v575_v44  ;;  %v372_v28 = vsel %vm308_vm0, 11.313708, %v5171_v43  ;;  %5376 = vst [vmem:[#allocation28_spill] sm:$0xff] %v3954_v32  ;;  %vm310_vm1 = vcmp.eq.s32.totalorder %v3667_v36, %v3954_v32 }
  0xfd   : > { %v3952_v44 = vand.u32 4294901760, %v372_v28 }
  0xfe   : > { %1272 = vmatmul.f32.gmra.mxu3 %v574_v22  ;;  %v2079_v22 = vand.u32 4294901760, %v2078_v58  ;;  %v591_v58 = vsub.f32 %v589_v9, %v590_v37 }
  0xff   : > { %5375 = vst [vmem:[#allocation27_spill] sm:$0xff] %v3952_v44 }
 0x100   : > { %2080 = vmatpush.msrb.mxu3 %v2079_v22 }
 0x102   : > { %878 = vmatmul.f32.gmra.mxu1 %v3921_v60  ;;  %577 = vmatmul.f32.gmra.mxu0 %v576_v19  ;;  %v584_v60 = vand.u32 4294901760, %v583_v7  ;;  %v374_v7 = vsel %vm310_vm1, 11.313708, %v5171_v43 }
 0x104   : > { %1070 = vmatmul.f32.gmra.mxu2 %v581_v35  ;;  %v426_v35 = vld [vmem:[%s5154_s1 + $0xb0] sm:$0xff] }
 0x105   : > { %v3961_v19 = vand.u32 4294901760, %v426_v35 }
 0x106   : > { %1278 = vmatmul.f32.gmra.mxu3 %v582_v25  ;;  %v597_v25 = vsub.f32 %v372_v28, %v3952_v44  ;;  %v3975_v28 = vand.u32 4294901760, %v374_v7 }
 0x107   : > { %1757 = vmatpush.msrb.mxu2 %v3961_v19  ;;  %v3967_v22 = vsub.f32 %v426_v35, %v3961_v19  ;;  %2480 = vmatpush.msra.mxu1 %v3961_v19 }
 0x108   : > { %5378 = vst [vmem:[#allocation30_spill] sm:$0xff] %v3975_v28  ;;  %v598_v43 = vand.u32 4294901760, %v597_v25  ;;  %v605_v34 = vsub.f32 %v374_v7, %v3975_v28 }
 0x109   : > { %2281 = vmatpush.msra.mxu0 %v3967_v22 }
 0x10a   : > { %882 = vmatmul.f32.gmra.mxu1 %v3942_v59  ;;  %585 = vmatmul.f32.gmra.mxu0 %v584_v60  ;;  %v3971_v60 = vpop.permute.xlu0 %235  ;;  %v5183_v59 = vand.u32 4294901760, %v3967_v22  ;;  %v599_v10 = vsub.f32 %v597_v25, %v598_v43 }
 0x10b   : > { %5377 = vst [vmem:[#allocation29_spill] sm:$0xff] %v3971_v60  ;;  %vm312_vm2 = vcmp.eq.s32.totalorder %v3667_v36, %v3971_v60 }
 0x10c   : > { %1075 = vmatmul.f32.gmra.mxu2 %v589_v9  ;;  %v592_v9 = vand.u32 4294901760, %v591_v58  ;;  %v2084_v35 = vsub.f32 %v3967_v22, %v5183_v59  ;;  %v376_v51 = vsel %vm312_vm2, 11.313708, %v5379_v63  ;;  %v3985_v58 = vpop.permute.xlu1 %238  ;;  %v600_v60 = vand.u32 4294901760, %v599_v10 }
 0x10d   : > { %5380 = vst [vmem:[#allocation31_spill] sm:$0xff] %v3985_v58  ;;  %v3987_v59 = vand.u32 4294901760, %v376_v51  ;;  %vm314_vm3 = vcmp.eq.s32.totalorder %v3667_v36, %v3985_v58 }
 0x10e   : > { %1284 = vmatmul.f32.gmra.mxu3 %v590_v37  ;;  %v2085_v32 = vand.u32 4294901760, %v2084_v35 }
 0x10f   : > { %v823_v42 = vpop.f32.mrf.mxu1  ;;  %5381 = vst [vmem:[#allocation32_spill] sm:$0xff] %v3987_v59 }
 0x110   : > { %2086 = vmatpush.msrb.mxu3 %v2085_v32 }
 0x112   : > { %886 = vmatmul.f32.gmra.mxu1 %v3952_v44  ;;  %593 = vmatmul.f32.gmra.mxu0 %v592_v9  ;;  %v606_v9 = vand.u32 4294901760, %v605_v34 }
 0x114   : > { %1080 = vmatmul.f32.gmra.mxu2 %v597_v25  ;;  %v607_v10 = vsub.f32 %v605_v34, %v606_v9 }
 0x116   : > { %1290 = vmatmul.f32.gmra.mxu3 %v598_v43  ;;  %v425_v43 = vld [vmem:[%s5154_s1 + $0xa8] sm:$0xff] }
 0x117   : > { %v827_v37 = vpop.f32.mrf.mxu1  ;;  %v1001_v44 = vpop.f32.mrf.mxu2  ;;  %v3994_v35 = vand.u32 4294901760, %v425_v43 }
 0x118   : > { %v474_v16 = vpop.f32.mrf.mxu0 }
 0x119   : > { %v824_v50 = vadd.f32 %v823_v42, %v474_v16  ;;  %v1195_v6 = vpop.f32.mrf.mxu3  ;;  %v378_v42 = vsel %vm314_vm3, 11.313708, %v5379_v63  ;;  %1759 = vmatpush.msrb.mxu2 %v3994_v35  ;;  %2482 = vmatpush.msra.mxu1 %v3994_v35 }
 0x11a   : > { %890 = vmatmul.f32.gmra.mxu1 %v3975_v28  ;;  %601 = vmatmul.f32.gmra.mxu0 %v600_v60  ;;  %v613_v28 = vsub.f32 %v376_v51, %v3987_v59 }
 0x11b   : > { %v1002_v25 = vadd.f32 %v1001_v44, %v824_v50  ;;  %v4002_v50 = vsub.f32 %v425_v43, %v3994_v35 }
 0x11c   : > { %1085 = vmatmul.f32.gmra.mxu2 %v605_v34  ;;  %v608_v34 = vand.u32 4294901760, %v607_v10 }
 0x11d   : > { %v3997_v16 = vadd.f32 %v1195_v6, %v1002_v25  ;;  %v5197_v60 = vand.u32 4294901760, %v4002_v50  ;;  %2284 = vmatpush.msra.mxu0 %v4002_v50  ;;  %v4008_v6 = vand.u32 4294901760, %v378_v42  ;;  %v614_v25 = vand.u32 4294901760, %v613_v28 }
 0x11e   : > { %1296 = vmatmul.f32.gmra.mxu3 %v606_v9 }
 0x11f   : > { %v831_v32 = vpop.f32.mrf.mxu1  ;;  %v1006_v7 = vpop.f32.mrf.mxu2  ;;  %5382 = vst [vmem:[#allocation33_spill] sm:$0xff] %v3997_v16  ;;  %v2090_v9 = vsub.f32 %v4002_v50, %v5197_v60 }
 0x120   : > { %v482_v44 = vpop.f32.mrf.mxu0  ;;  %5383 = vst [vmem:[#allocation34_spill] sm:$0xff] %v4008_v6  ;;  %v4010_v16 = vpop.permute.xlu2 %241 }
 0x121   : > { %v828_v51 = vadd.f32 %v827_v37, %v482_v44  ;;  %5384 = vst [vmem:[#allocation35_spill] sm:$0xff] %v4010_v16  ;;  %v1201_v43 = vpop.f32.mrf.mxu3  ;;  %vm316_vm4 = vcmp.eq.s32.totalorder %v3667_v36, %v4010_v16  ;;  %v2091_v46 = vand.u32 4294901760, %v2090_v9  ;;  %v621_v37 = vsub.f32 %v378_v42, %v4008_v6  ;;  %v4022_v60 = vpop.permute.xlu0 %244 }
 0x122   : > { %894 = vmatmul.f32.gmra.mxu1 %v3987_v59  ;;  %609 = vmatmul.f32.gmra.mxu0 %v608_v34  ;;  %v615_v44 = vsub.f32 %v613_v28, %v614_v25  ;;  %v380_v40 = vsel %vm316_vm4, 11.313708, %v5379_v63  ;;  %5386 = vst [vmem:[#allocation37_spill] sm:$0xff] %v4022_v60  ;;  %vm318_vm5 = vcmp.eq.s32.totalorder %v3667_v36, %v4022_v60 }
 0x123   : > { %v1007_v59 = vadd.f32 %v1006_v7, %v828_v51  ;;  %2092 = vmatpush.msrb.mxu3 %v2091_v46  ;;  %v4024_v16 = vand.u32 4294901760, %v380_v40  ;;  %v622_v34 = vand.u32 4294901760, %v621_v37  ;;  %v424_v46 = vld [vmem:[%s5154_s1 + $0xa0] sm:$0xff] }
 0x124   : > { %1090 = vmatmul.f32.gmra.mxu2 %v613_v28  ;;  %v616_v51 = vand.u32 4294901760, %v615_v44  ;;  %v382_v44 = vsel %vm318_vm5, 11.313708, %v5379_v63 }
 0x125   : > { %v4018_v10 = vadd.f32 %v1201_v43, %v1007_v59  ;;  %5387 = vst [vmem:[#allocation38_spill] sm:$0xff] %v4024_v16  ;;  %v629_v43 = vsub.f32 %v380_v40, %v4024_v16 }
 0x126   : > { %1302 = vmatmul.f32.gmra.mxu3 %v614_v25  ;;  %v4031_v25 = vand.u32 4294901760, %v424_v46 }
 0x127   : > { %v835_v58 = vpop.f32.mrf.mxu1  ;;  %v1011_v14 = vpop.f32.mrf.mxu2  ;;  %5385 = vst [vmem:[#allocation36_spill] sm:$0xff] %v4018_v10 }
 0x128   : > { %v490_v4 = vpop.f32.mrf.mxu0  ;;  %1761 = vmatpush.msrb.mxu2 %v4031_v25  ;;  %2484 = vmatpush.msra.mxu1 %v4031_v25 }
 0x129   : > { %v832_v7 = vadd.f32 %v831_v32, %v490_v4  ;;  %v1207_v9 = vpop.f32.mrf.mxu3  ;;  %v623_v32 = vsub.f32 %v621_v37, %v622_v34 }
 0x12a   : > { %898 = vmatmul.f32.gmra.mxu1 %v4008_v6  ;;  %617 = vmatmul.f32.gmra.mxu0 %v616_v51 }
 0x12b   : > { %v1012_v59 = vadd.f32 %v1011_v14, %v832_v7  ;;  %v4039_v14 = vsub.f32 %v424_v46, %v4031_v25  ;;  %v4043_v7 = vpop.permute.xlu1 %247 }
 0x12c   : > { %1095 = vmatmul.f32.gmra.mxu2 %v621_v37  ;;  %5389 = vst [vmem:[#allocation40_spill] sm:$0xff] %v4043_v7  ;;  %v4047_v37 = vand.u32 4294901760, %v382_v44  ;;  %vm320_vm6 = vcmp.eq.s32.totalorder %v3667_v36, %v4043_v7 }
 0x12d   : > { %v4034_v4 = vadd.f32 %v1207_v9, %v1012_v59  ;;  %v5209_v40 = vand.u32 4294901760, %v4039_v14  ;;  %2287 = vmatpush.msra.mxu0 %v4039_v14  ;;  %v624_v59 = vand.u32 4294901760, %v623_v32  ;;  %v384_v32 = vsel %vm320_vm6, 11.313708, %v5379_v63 }
 0x12e   : > { %1308 = vmatmul.f32.gmra.mxu3 %v622_v34  ;;  %5390 = vst [vmem:[#allocation41_spill] sm:$0xff] %v4047_v37  ;;  %v637_v39 = vsub.f32 %v382_v44, %v4047_v37  ;;  %v4061_v7 = vand.u32 4294901760, %v384_v32 }
 0x12f   : > { %v839_v28 = vpop.f32.mrf.mxu1  ;;  %v1016_v42 = vpop.f32.mrf.mxu2  ;;  %5388 = vst [vmem:[#allocation39_spill] sm:$0xff] %v4034_v4  ;;  %v630_v4 = vand.u32 4294901760, %v629_v43  ;;  %v2096_v34 = vsub.f32 %v4039_v14, %v5209_v40 }
 0x130   : > { %v498_v51 = vpop.f32.mrf.mxu0  ;;  %5393 = vst [vmem:[#allocation44_spill] sm:$0xff] %v4061_v7 }
 0x131   : > { %v836_v9 = vadd.f32 %v835_v58, %v498_v51  ;;  %v1213_v46 = vpop.f32.mrf.mxu3  ;;  %v2097_v60 = vand.u32 4294901760, %v2096_v34  ;;  %v631_v58 = vsub.f32 %v629_v43, %v630_v4  ;;  %v4059_v51 = vpop.permute.xlu2 %250 }
 0x132   : > { %902 = vmatmul.f32.gmra.mxu1 %v4024_v16  ;;  %625 = vmatmul.f32.gmra.mxu0 %v624_v59  ;;  %5392 = vst [vmem:[#allocation43_spill] sm:$0xff] %v4059_v51  ;;  %v638_v59 = vand.u32 4294901760, %v637_v39  ;;  %vm322_vm7 = vcmp.eq.s32.totalorder %v3667_v36, %v4059_v51 }
 0x133   : > { %v1017_v16 = vadd.f32 %v1016_v42, %v836_v9  ;;  %2098 = vmatpush.msrb.mxu3 %v2097_v60  ;;  %v632_v9 = vand.u32 4294901760, %v631_v58  ;;  %v423_v60 = vld [vmem:[%s5154_s1 + $0x98] sm:$0xff]  ;;  %v386_v58 = vsel %vm322_vm7, 11.313708, %v5379_v63 }
 0x134   : > { %1100 = vmatmul.f32.gmra.mxu2 %v629_v43  ;;  %v4068_v44 = vand.u32 4294901760, %v423_v60 }
 0x135   : > { %v4055_v18 = vadd.f32 %v1213_v46, %v1017_v16  ;;  %v645_v46 = vsub.f32 %v384_v32, %v4061_v7 }
 0x136   : > { %1314 = vmatmul.f32.gmra.mxu3 %v630_v4  ;;  %1763 = vmatpush.msrb.mxu2 %v4068_v44 }
 0x137   : > { %v843_v6 = vpop.f32.mrf.mxu1  ;;  %v1021_v10 = vpop.f32.mrf.mxu2  ;;  %5391 = vst [vmem:[#allocation42_spill] sm:$0xff] %v4055_v18  ;;  %2486 = vmatpush.msra.mxu1 %v4068_v44 }
 0x138   : > { %v506_v40 = vpop.f32.mrf.mxu0 }
 0x139   : > { %v840_v42 = vadd.f32 %v839_v28, %v506_v40  ;;  %v1219_v34 = vpop.f32.mrf.mxu3  ;;  %v639_v40 = vsub.f32 %v637_v39, %v638_v59 }
 0x13a   : > { %906 = vmatmul.f32.gmra.mxu1 %v4047_v37  ;;  %633 = vmatmul.f32.gmra.mxu0 %v632_v9 }
 0x13b   : > { %v1022_v16 = vadd.f32 %v1021_v10, %v840_v42  ;;  %v4076_v10 = vsub.f32 %v423_v60, %v4068_v44  ;;  %v4080_v42 = vpop.permute.xlu0 %253 }
 0x13c   : > { %1105 = vmatmul.f32.gmra.mxu2 %v637_v39  ;;  %5395 = vst [vmem:[#allocation46_spill] sm:$0xff] %v4080_v42  ;;  %v4084_v39 = vand.u32 4294901760, %v386_v58  ;;  %vm324_vm8 = vcmp.eq.s32.totalorder %v3667_v36, %v4080_v42 }
 0x13d   : > { %v4071_v28 = vadd.f32 %v1219_v34, %v1022_v16  ;;  %v5219_v32 = vand.u32 4294901760, %v4076_v10  ;;  %2290 = vmatpush.msra.mxu0 %v4076_v10  ;;  %v640_v16 = vand.u32 4294901760, %v639_v40  ;;  %v388_v40 = vsel %vm324_vm8, 11.313708, %v5379_v63 }
 0x13e   : > { %1320 = vmatmul.f32.gmra.mxu3 %v638_v59  ;;  %5396 = vst [vmem:[#allocation47_spill] sm:$0xff] %v4084_v39  ;;  %v653_v0 = vsub.f32 %v386_v58, %v4084_v39  ;;  %v4098_v42 = vand.u32 4294901760, %v388_v40 }
 0x13f   : > { %v847_v43 = vpop.f32.mrf.mxu1  ;;  %v1026_v4 = vpop.f32.mrf.mxu2  ;;  %5394 = vst [vmem:[#allocation45_spill] sm:$0xff] %v4071_v28  ;;  %v646_v28 = vand.u32 4294901760, %v645_v46  ;;  %v2102_v59 = vsub.f32 %v4076_v10, %v5219_v32 }
 0x140   : > { %v514_v9 = vpop.f32.mrf.mxu0  ;;  %5399 = vst [vmem:[#allocation50_spill] sm:$0xff] %v4098_v42 }
 0x141   : > { %v844_v34 = vadd.f32 %v843_v6, %v514_v9  ;;  %v1225_v60 = vpop.f32.mrf.mxu3  ;;  %v2103_v51 = vand.u32 4294901760, %v2102_v59  ;;  %v647_v6 = vsub.f32 %v645_v46, %v646_v28  ;;  %v4096_v9 = vpop.permute.xlu1 %256 }
 0x142   : > { %910 = vmatmul.f32.gmra.mxu1 %v4061_v7  ;;  %641 = vmatmul.f32.gmra.mxu0 %v640_v16  ;;  %5398 = vst [vmem:[#allocation49_spill] sm:$0xff] %v4096_v9  ;;  %v654_v16 = vand.u32 4294901760, %v653_v0  ;;  %vm326_vm9 = vcmp.eq.s32.totalorder %v3667_v36, %v4096_v9 }
 0x143   : > { %v1027_v7 = vadd.f32 %v1026_v4, %v844_v34  ;;  %2104 = vmatpush.msrb.mxu3 %v2103_v51  ;;  %v648_v34 = vand.u32 4294901760, %v647_v6  ;;  %v422_v51 = vld [vmem:[%s5154_s1 + $0x90] sm:$0xff]  ;;  %v390_v6 = vsel %vm326_vm9, 11.313708, %v5379_v63 }
 0x144   : > { %1110 = vmatmul.f32.gmra.mxu2 %v645_v46  ;;  %v4105_v58 = vand.u32 4294901760, %v422_v51 }
 0x145   : > { %v4092_v30 = vadd.f32 %v1225_v60, %v1027_v7  ;;  %v661_v60 = vsub.f32 %v388_v40, %v4098_v42 }
 0x146   : > { %1326 = vmatmul.f32.gmra.mxu3 %v646_v28  ;;  %1765 = vmatpush.msrb.mxu2 %v4105_v58 }
 0x147   : > { %v851_v37 = vpop.f32.mrf.mxu1  ;;  %v1031_v18 = vpop.f32.mrf.mxu2  ;;  %5397 = vst [vmem:[#allocation48_spill] sm:$0xff] %v4092_v30  ;;  %2488 = vmatpush.msra.mxu1 %v4105_v58 }
 0x148   : > { %v522_v32 = vpop.f32.mrf.mxu0 }
 0x149   : > { %v848_v4 = vadd.f32 %v847_v43, %v522_v32  ;;  %v1231_v59 = vpop.f32.mrf.mxu3  ;;  %v655_v32 = vsub.f32 %v653_v0, %v654_v16 }
 0x14a   : > { %914 = vmatmul.f32.gmra.mxu1 %v4084_v39  ;;  %649 = vmatmul.f32.gmra.mxu0 %v648_v34 }
 0x14b   : > { %v1032_v7 = vadd.f32 %v1031_v18, %v848_v4  ;;  %v4113_v18 = vsub.f32 %v422_v51, %v4105_v58  ;;  %v4117_v4 = vpop.permute.xlu2 %259 }
 0x14c   : > { %1115 = vmatmul.f32.gmra.mxu2 %v653_v0  ;;  %5401 = vst [vmem:[#allocation52_spill] sm:$0xff] %v4117_v4  ;;  %v4121_v0 = vand.u32 4294901760, %v390_v6  ;;  %vm328_vm10 = vcmp.eq.s32.totalorder %v3667_v36, %v4117_v4 }
 0x14d   : > { %v4108_v43 = vadd.f32 %v1231_v59, %v1032_v7  ;;  %v5229_v40 = vand.u32 4294901760, %v4113_v18  ;;  %2293 = vmatpush.msra.mxu0 %v4113_v18  ;;  %v656_v7 = vand.u32 4294901760, %v655_v32  ;;  %v392_v32 = vsel %vm328_vm10, 11.313708, %v5379_v63 }
 0x14e   : > { %1332 = vmatmul.f32.gmra.mxu3 %v654_v16  ;;  %5402 = vst [vmem:[#allocation53_spill] sm:$0xff] %v4121_v0  ;;  %v669_v31 = vsub.f32 %v390_v6, %v4121_v0  ;;  %v4135_v4 = vand.u32 4294901760, %v392_v32 }
 0x14f   : > { %v855_v46 = vpop.f32.mrf.mxu1  ;;  %v1036_v28 = vpop.f32.mrf.mxu2  ;;  %5400 = vst [vmem:[#allocation51_spill] sm:$0xff] %v4108_v43  ;;  %v662_v43 = vand.u32 4294901760, %v661_v60  ;;  %v2108_v16 = vsub.f32 %v4113_v18, %v5229_v40 }
 0x150   : > { %v530_v34 = vpop.f32.mrf.mxu0  ;;  %5405 = vst [vmem:[#allocation56_spill] sm:$0xff] %v4135_v4 }
 0x151   : > { %v852_v59 = vadd.f32 %v851_v37, %v530_v34  ;;  %v1237_v51 = vpop.f32.mrf.mxu3  ;;  %v2109_v9 = vand.u32 4294901760, %v2108_v16  ;;  %v663_v37 = vsub.f32 %v661_v60, %v662_v43  ;;  %v4133_v34 = vpop.permute.xlu0 %262 }
 0x152   : > { %918 = vmatmul.f32.gmra.mxu1 %v4098_v42  ;;  %657 = vmatmul.f32.gmra.mxu0 %v656_v7  ;;  %5404 = vst [vmem:[#allocation55_spill] sm:$0xff] %v4133_v34  ;;  %v670_v7 = vand.u32 4294901760, %v669_v31  ;;  %vm330_vm11 = vcmp.eq.s32.totalorder %v3667_v36, %v4133_v34 }
 0x153   : > { %v1037_v42 = vadd.f32 %v1036_v28, %v852_v59  ;;  %2110 = vmatpush.msrb.mxu3 %v2109_v9  ;;  %v664_v59 = vand.u32 4294901760, %v663_v37  ;;  %v421_v9 = vld [vmem:[%s5154_s1 + $0x88] sm:$0xff]  ;;  %v394_v37 = vsel %vm330_vm11, 11.313708, %v5379_v63 }
 0x154   : > { %1120 = vmatmul.f32.gmra.mxu2 %v661_v60  ;;  %v4142_v6 = vand.u32 4294901760, %v421_v9 }
 0x155   : > { %v4129_v33 = vadd.f32 %v1237_v51, %v1037_v42  ;;  %v677_v51 = vsub.f32 %v392_v32, %v4135_v4 }
 0x156   : > { %1338 = vmatmul.f32.gmra.mxu3 %v662_v43  ;;  %1767 = vmatpush.msrb.mxu2 %v4142_v6 }
 0x157   : > { %v859_v39 = vpop.f32.mrf.mxu1  ;;  %v1041_v30 = vpop.f32.mrf.mxu2  ;;  %5403 = vst [vmem:[#allocation54_spill] sm:$0xff] %v4129_v33  ;;  %2490 = vmatpush.msra.mxu1 %v4142_v6 }
 0x158   : > { %v538_v40 = vpop.f32.mrf.mxu0 }
 0x159   : > { %v856_v28 = vadd.f32 %v855_v46, %v538_v40  ;;  %v1243_v16 = vpop.f32.mrf.mxu3  ;;  %v671_v40 = vsub.f32 %v669_v31, %v670_v7 }
 0x15a   : > { %922 = vmatmul.f32.gmra.mxu1 %v4121_v0  ;;  %665 = vmatmul.f32.gmra.mxu0 %v664_v59 }
 0x15b   : > { %v1042_v42 = vadd.f32 %v1041_v30, %v856_v28  ;;  %v4150_v30 = vsub.f32 %v421_v9, %v4142_v6  ;;  %v4154_v28 = vpop.permute.xlu1 %265 }
 0x15c   : > { %1125 = vmatmul.f32.gmra.mxu2 %v669_v31  ;;  %5407 = vst [vmem:[#allocation58_spill] sm:$0xff] %v4154_v28  ;;  %v4158_v31 = vand.u32 4294901760, %v394_v37  ;;  %vm332_vm12 = vcmp.eq.s32.totalorder %v3667_v36, %v4154_v28 }
 0x15d   : > { %v4145_v46 = vadd.f32 %v1243_v16, %v1042_v42  ;;  %v5239_v32 = vand.u32 4294901760, %v4150_v30  ;;  %2296 = vmatpush.msra.mxu0 %v4150_v30  ;;  %v672_v42 = vand.u32 4294901760, %v671_v40  ;;  %v396_v40 = vsel %vm332_vm12, 11.313708, %v5379_v63 }
 0x15e   : > { %1344 = vmatmul.f32.gmra.mxu3 %v670_v7  ;;  %5408 = vst [vmem:[#allocation59_spill] sm:$0xff] %v4158_v31  ;;  %v685_v29 = vsub.f32 %v394_v37, %v4158_v31  ;;  %v4172_v28 = vand.u32 4294901760, %v396_v40 }
 0x15f   : > { %v863_v60 = vpop.f32.mrf.mxu1  ;;  %v1046_v43 = vpop.f32.mrf.mxu2  ;;  %5406 = vst [vmem:[#allocation57_spill] sm:$0xff] %v4145_v46  ;;  %v678_v46 = vand.u32 4294901760, %v677_v51  ;;  %v2114_v7 = vsub.f32 %v4150_v30, %v5239_v32 }
 0x160   : > { %v546_v59 = vpop.f32.mrf.mxu0  ;;  %5411 = vst [vmem:[#allocation62_spill] sm:$0xff] %v4172_v28 }
 0x161   : > { %v860_v16 = vadd.f32 %v859_v39, %v546_v59  ;;  %v1249_v9 = vpop.f32.mrf.mxu3  ;;  %v2115_v34 = vand.u32 4294901760, %v2114_v7  ;;  %v679_v39 = vsub.f32 %v677_v51, %v678_v46  ;;  %v4170_v59 = vpop.permute.xlu2 %268 }
 0x162   : > { %926 = vmatmul.f32.gmra.mxu1 %v4135_v4  ;;  %673 = vmatmul.f32.gmra.mxu0 %v672_v42  ;;  %5410 = vst [vmem:[#allocation61_spill] sm:$0xff] %v4170_v59  ;;  %v686_v42 = vand.u32 4294901760, %v685_v29  ;;  %vm334_vm13 = vcmp.eq.s32.totalorder %v3667_v36, %v4170_v59 }
 0x163   : > { %v1047_v4 = vadd.f32 %v1046_v43, %v860_v16  ;;  %2116 = vmatpush.msrb.mxu3 %v2115_v34  ;;  %v680_v16 = vand.u32 4294901760, %v679_v39  ;;  %v420_v34 = vld [vmem:[%s5154_s1 + $0x80] sm:$0xff]  ;;  %v398_v39 = vsel %vm334_vm13, 11.313708, %v5379_v63 }
 0x164   : > { %1130 = vmatmul.f32.gmra.mxu2 %v677_v51  ;;  %v4179_v37 = vand.u32 4294901760, %v420_v34 }
 0x165   : > { %v4166_v2 = vadd.f32 %v1249_v9, %v1047_v4  ;;  %v693_v9 = vsub.f32 %v396_v40, %v4172_v28 }
 0x166   : > { %1350 = vmatmul.f32.gmra.mxu3 %v678_v46  ;;  %1769 = vmatpush.msrb.mxu2 %v4179_v37 }
 0x167   : > { %v867_v0 = vpop.f32.mrf.mxu1  ;;  %v1051_v33 = vpop.f32.mrf.mxu2  ;;  %5409 = vst [vmem:[#allocation60_spill] sm:$0xff] %v4166_v2  ;;  %2492 = vmatpush.msra.mxu1 %v4179_v37  ;;  %v5415_v2 = vand.u32 4294901760, %v3746_v1 }
 0x168   : > { %v554_v32 = vpop.f32.mrf.mxu0 }
 0x169   : > { %v864_v43 = vadd.f32 %v863_v60, %v554_v32  ;;  %v1255_v7 = vpop.f32.mrf.mxu3  ;;  %v687_v32 = vsub.f32 %v685_v29, %v686_v42 }
 0x16a   : > { %930 = vmatmul.f32.gmra.mxu1 %v4158_v31  ;;  %681 = vmatmul.f32.gmra.mxu0 %v680_v16 }
 0x16b   : > { %v1052_v4 = vadd.f32 %v1051_v33, %v864_v43  ;;  %v4187_v33 = vsub.f32 %v420_v34, %v4179_v37  ;;  %v4191_v43 = vpop.permute.xlu0 %271  ;;  %v688_v34 = vand.u32 4294901760, %v687_v32 }
 0x16c   : > { %1135 = vmatmul.f32.gmra.mxu2 %v685_v29  ;;  %v4197_v29 = vand.u32 4294901760, %v398_v39  ;;  %vm336_vm14 = vcmp.eq.s32.totalorder %v3667_v36, %v4191_v43 }
 0x16d   : > { %v4182_v60 = vadd.f32 %v1255_v7, %v1052_v4  ;;  %v5246_v40 = vand.u32 4294901760, %v4187_v33  ;;  %v5413_v7 = vand.u32 4294901760, %v3643_v26  ;;  %2299 = vmatpush.msra.mxu0 %v4187_v33 }
 0x16e   : > { %1356 = vmatmul.f32.gmra.mxu3 %v686_v42  ;;  %v701_v59 = vsub.f32 %v398_v39, %v4197_v29 }
 0x16f   : > { %v871_v51 = vpop.f32.mrf.mxu1  ;;  %v1056_v46 = vpop.f32.mrf.mxu2  ;;  %5412 = vst [vmem:[#allocation63_spill] sm:$0xff] %v4182_v60  ;;  %2689 = vmatpush.msra.mxu2 %v5413_v7  ;;  %v694_v60 = vand.u32 4294901760, %v693_v9  ;;  %v2120_v42 = vsub.f32 %v4187_v33, %v5246_v40  ;;  %v4207_v7 = vadd.s32 128, %v3667_v36 }
 0x170   : > { %v562_v16 = vpop.f32.mrf.mxu0 }
 0x171   : > { %v868_v4 = vadd.f32 %v867_v0, %v562_v16  ;;  %v1261_v31 = vpop.f32.mrf.mxu3  ;;  %v2121_v16 = vand.u32 4294901760, %v2120_v42  ;;  %vm277_vm15 = vcmp.eq.s32.totalorder %v4207_v7, %v3671_v38  ;;  %vm279_vm1 = vcmp.eq.s32.totalorder %v4207_v7, %v3698_v54 }
 0x172   : > { %934 = vmatmul.f32.gmra.mxu1 %v4172_v28  ;;  %v5414_v28 = vand.u32 4294901760, %v3704_v55  ;;  %689 = vmatmul.f32.gmra.mxu0 %v688_v34  ;;  %v695_v55 = vsub.f32 %v693_v9, %v694_v60  ;;  %v5418_v34 = vand.u32 4294901760, %v3834_v15  ;;  %vm281_vm2 = vcmp.eq.s32.totalorder %v4207_v7, %v3696_v53 }
 0x173   : > { %v1057_v26 = vadd.f32 %v1056_v46, %v868_v4  ;;  %2122 = vmatpush.msrb.mxu3 %v2121_v16  ;;  %v5416_v46 = vand.u32 4294901760, %v3778_v47  ;;  %v4220_v4 = vpop.permute.xlu1 %274  ;;  %v702_v47 = vand.u32 4294901760, %v701_v59  ;;  %v345_v53 = vsel %vm281_vm2, 11.313708, %v5379_v63 }
 0x174   : > { %1140 = vmatmul.f32.gmra.mxu2 %v693_v9  ;;  %v696_v39 = vand.u32 4294901760, %v695_v55  ;;  %vm338_vm0 = vcmp.eq.s32.totalorder %v3667_v36, %v4220_v4  ;;  %vm283_vm3 = vcmp.eq.s32.totalorder %v4207_v7, %v3718_v17  ;;  %vm285_vm4 = vcmp.eq.s32.totalorder %v4207_v7, %v3735_v52 }
 0x175   : > { %2693 = vmatpush.msra.mxu2 %v5414_v28  ;;  %v4212_v40 = vadd.f32 %v1261_v31, %v1057_v26  ;;  %v400_v28 = vsel %vm336_vm14, 11.313708, %v5379_v63  ;;  %2880 = vmatpush.msra.mxu3 %v3636_v23  ;;  %v341_v23 = vsel %vm277_vm15, 11.313708, %v5379_v63  ;;  %v5419_v26 = vand.u32 4294901760, %v3867_v41 }
 0x176   : > { %1362 = vmatmul.f32.gmra.mxu3 %v694_v60  ;;  %v4225_v31 = vand.u32 4294901760, %v400_v28  ;;  %v703_v16 = vsub.f32 %v701_v59, %v702_v47  ;;  %v402_v36 = vsel %vm338_vm0, 11.313708, %v5379_v63  ;;  %v4246_v38 = vand.u32 4294901760, %v341_v23 }
 0x177   : > { %v875_v0 = vpop.f32.mrf.mxu1  ;;  %v1061_v32 = vpop.f32.mrf.mxu2  ;;  %2697 = vmatpush.msra.mxu2 %v5415_v2  ;;  %v5417_v2 = vand.u32 4294901760, %v3803_v13  ;;  %2882 = vmatpush.msra.mxu3 %v3683_v48  ;;  %v5421_v41 = vand.u32 4294901760, %v3934_v27  ;;  %vm287_vm5 = vcmp.eq.s32.totalorder %v4207_v7, %v3752_v8  ;;  %vm289_vm6 = vcmp.eq.s32.totalorder %v4207_v7, %v3768_v24 }
 0x178   : > { %v570_v1 = vpop.f32.mrf.mxu0  ;;  %v709_v48 = vsub.f32 %v400_v28, %v4225_v31  ;;  %v704_v55 = vand.u32 4294901760, %v703_v16  ;;  %v4260_v54 = vsub.f32 %v341_v23, %v4246_v38  ;;  %v5426_v23 = vand.u32 4294901760, %v4113_v18 }
 0x179   : > { %2701 = vmatpush.msra.mxu2 %v5416_v46  ;;  %v872_v9 = vadd.f32 %v871_v51, %v570_v1  ;;  %v1267_v60 = vpop.f32.mrf.mxu3  ;;  %2884 = vmatpush.msra.mxu3 %v3733_v45  ;;  %v5422_v46 = vand.u32 4294901760, %v3967_v22  ;;  %v5428_v16 = vand.u32 4294901760, %v4187_v33 }
 0x17a   : > { %938 = vmatmul.f32.gmra.mxu1 %v4197_v29  ;;  %697 = vmatmul.f32.gmra.mxu0 %v696_v39  ;;  %v5424_v39 = vand.u32 4294901760, %v4039_v14 }
 0x17b   : > { %2705 = vmatpush.msra.mxu2 %v5417_v2  ;;  %v1062_v42 = vadd.f32 %v1061_v32, %v872_v9  ;;  %2886 = vmatpush.msra.mxu3 %v3765_v21  ;;  %v5420_v32 = vand.u32 4294901760, %v3900_v57  ;;  %v710_v57 = vand.u32 4294901760, %v709_v48 }
 0x17c   : > { %1145 = vmatmul.f32.gmra.mxu2 %v701_v59  ;;  %v4254_v59 = vand.u32 4294901760, %v402_v36 }
 0x17d   : > { %2709 = vmatpush.msra.mxu2 %v5418_v34  ;;  %v4240_v15 = vadd.f32 %v1267_v60, %v1062_v42  ;;  %2888 = vmatpush.msra.mxu3 %v3798_v11  ;;  %v343_v11 = vsel %vm279_vm1, 11.313708, %v5379_v63  ;;  %v711_v22 = vsub.f32 %v709_v48, %v710_v57 }
 0x17e   : > { %1368 = vmatmul.f32.gmra.mxu3 %v702_v47  ;;  %v717_v9 = vsub.f32 %v402_v36, %v4254_v59  ;;  %v5257_v47 = vand.u32 4294901760, %v4260_v54  ;;  %v4273_v60 = vand.u32 4294901760, %v343_v11  ;;  %v4299_v36 = vand.u32 4294901760, %v345_v53 }
 0x17f   : > { %v879_v13 = vpop.f32.mrf.mxu1  ;;  %v1066_v51 = vpop.f32.mrf.mxu2  ;;  %2713 = vmatpush.msra.mxu2 %v5419_v26  ;;  %2890 = vmatpush.msra.mxu3 %v3825_v3  ;;  %v712_v34 = vand.u32 4294901760, %v711_v22 }
 0x180   : > { %v578_v45 = vpop.f32.mrf.mxu0  ;;  %v718_v14 = vand.u32 4294901760, %v717_v9  ;;  %v4308_v33 = vsub.f32 %v345_v53, %v4299_v36 }
 0x181   : > { %2717 = vmatpush.msra.mxu2 %v5420_v32  ;;  %v876_v21 = vadd.f32 %v875_v0, %v578_v45  ;;  %v1273_v28 = vpop.f32.mrf.mxu3  ;;  %2892 = vmatpush.msra.mxu3 %v3856_v5  ;;  %v5423_v0 = vand.u32 4294901760, %v4002_v50  ;;  %v5425_v50 = vand.u32 4294901760, %v4076_v10  ;;  %v1773_v10 = vsub.f32 %v4260_v54, %v5257_v47 }
 0x182   : > { %942 = vmatmul.f32.gmra.mxu1 %v4225_v31  ;;  %705 = vmatmul.f32.gmra.mxu0 %v704_v55 }
 0x183   : > { %2721 = vmatpush.msra.mxu2 %v5421_v41  ;;  %v1067_v1 = vadd.f32 %v1066_v51, %v876_v21  ;;  %2894 = vmatpush.msra.mxu3 %v3891_v61  ;;  %v4285_v51 = vsub.f32 %v343_v11, %v4273_v60  ;;  %v1774_v32 = vand.u32 4294901760, %v1773_v10  ;;  %v351_v10 = vsel %vm287_vm5, 11.313708, %v5379_v63 }
 0x184   : > { %1150 = vmatmul.f32.gmra.mxu2 %v709_v48  ;;  %v719_v48 = vsub.f32 %v717_v9, %v718_v14  ;;  %v4352_v8 = vand.u32 4294901760, %v351_v10 }
 0x185   : > { %2725 = vmatpush.msra.mxu2 %v5422_v46  ;;  %v4267_v3 = vadd.f32 %v1273_v28, %v1067_v1  ;;  %2896 = vmatpush.msra.mxu3 %v3928_v20  ;;  %v5256_v45 = vand.u32 4294901760, %v4285_v51  ;;  %v5254_v1 = vand.u32 4294901760, %v4308_v33 }
 0x186   : > { %1374 = vmatmul.f32.gmra.mxu3 %v710_v57  ;;  %v720_v41 = vand.u32 4294901760, %v719_v48 }
 0x187   : > { %v883_v27 = vpop.f32.mrf.mxu1  ;;  %v1071_v2 = vpop.f32.mrf.mxu2  ;;  %2729 = vmatpush.msra.mxu2 %v5423_v0  ;;  %2898 = vmatpush.msra.mxu3 %v3961_v19  ;;  %v5427_v19 = vand.u32 4294901760, %v4150_v30  ;;  %v1781_v55 = vsub.f32 %v4285_v51, %v5256_v45  ;;  %v1789_v0 = vsub.f32 %v4308_v33, %v5254_v1 }
 0x188   : > { %v586_v5 = vpop.f32.mrf.mxu0 }
 0x189   : > { %2733 = vmatpush.msra.mxu2 %v5424_v39  ;;  %v880_v61 = vadd.f32 %v879_v13, %v586_v5  ;;  %v1279_v42 = vpop.f32.mrf.mxu3  ;;  %2900 = vmatpush.msra.mxu3 %v3994_v35  ;;  %v1782_v46 = vand.u32 4294901760, %v1781_v55 }
 0x18a   : > { %946 = vmatmul.f32.gmra.mxu1 %v4254_v59  ;;  %713 = vmatmul.f32.gmra.mxu0 %v712_v34 }
 0x18b   : > { %2737 = vmatpush.msra.mxu2 %v5425_v50  ;;  %v1072_v20 = vadd.f32 %v1071_v2, %v880_v61  ;;  %2902 = vmatpush.msra.mxu3 %v4031_v25  ;;  %v1790_v50 = vand.u32 4294901760, %v1789_v0 }
 0x18c   : > { %1155 = vmatmul.f32.gmra.mxu2 %v717_v9  ;;  %v349_v9 = vsel %vm285_vm4, 11.313708, %v5379_v63 }
 0x18d   : > { %2741 = vmatpush.msra.mxu2 %v5426_v23  ;;  %v4294_v18 = vadd.f32 %v1279_v42, %v1072_v20  ;;  %2904 = vmatpush.msra.mxu3 %v4068_v44  ;;  %v347_v44 = vsel %vm283_vm3, 11.313708, %v5379_v63  ;;  %v4335_v52 = vand.u32 4294901760, %v349_v9 }
 0x18e   : > { %1380 = vmatmul.f32.gmra.mxu3 %v718_v14 }
 0x18f   : > { %v887_v13 = vpop.f32.mrf.mxu1  ;;  %v1076_v26 = vpop.f32.mrf.mxu2  ;;  %2745 = vmatpush.msra.mxu2 %v5427_v19  ;;  %2906 = vmatpush.msra.mxu3 %v4105_v58  ;;  %v4318_v58 = vand.u32 4294901760, %v347_v44  ;;  %v4343_v42 = vsub.f32 %v349_v9, %v4335_v52 }
 0x190   : > { %v594_v35 = vpop.f32.mrf.mxu0 }
 0x191   : > { %2749 = vmatpush.msra.mxu2 %v5428_v16  ;;  %v884_v30 = vadd.f32 %v883_v27, %v594_v35  ;;  %v1285_v25 = vpop.f32.mrf.mxu3  ;;  %2908 = vmatpush.msra.mxu3 %v4142_v6  ;;  %v4326_v2 = vsub.f32 %v347_v44, %v4318_v58  ;;  %v5252_v48 = vand.u32 4294901760, %v4343_v42  ;;  %v4360_v35 = vsub.f32 %v351_v10, %v4352_v8  ;;  %v5432_v10 = vld [vmem:[#allocation10_spill] sm:$0xff] }
 0x192   : > { %1610 = vmatmul.f32.vlgmr.msrb.gmra.mxu1 %v3688_v49  ;;  %721 = vmatmul.f32.gmra.mxu0 %v720_v41  ;;  %vm293_vm8 = vcmp.eq.s32.totalorder %v4207_v7, %v5432_v10 }
 0x193   : > { %v1077_v21 = vadd.f32 %v1076_v26, %v884_v30  ;;  %2910 = vmatpush.msra.mxu3 %v4179_v37  ;;  %v5253_v61 = vand.u32 4294901760, %v4326_v2  ;;  %v1805_v41 = vsub.f32 %v4343_v42, %v5252_v48 }
 0x194   : > { %1775 = vmatmul.f32.vlgmr.msrb.gmra.mxu2 %v1774_v32 }
 0x195   : > { %v4315_v17 = vadd.f32 %v1285_v25, %v1077_v21  ;;  %v1797_v20 = vsub.f32 %v4326_v2, %v5253_v61  ;;  %v353_v25 = vsel %vm289_vm6, 11.313708, %v5379_v63 }
 0x196   : > { %2124 = vmatmul.f32.vlgmr.msrb.gmra.mxu3 %v4246_v38  ;;  %v4369_v24 = vand.u32 4294901760, %v353_v25 }
 0x197   : > { %v891_v57 = vpop.f32.mrf.mxu1  ;;  %v1081_v28 = vpop.f32.mrf.mxu2  ;;  %v1798_v19 = vand.u32 4294901760, %v1797_v20 }
 0x198   : > { %v602_v11 = vpop.f32.mrf.mxu0 }
 0x199   : > { %v888_v27 = vadd.f32 %v887_v13, %v602_v11  ;;  %v1291_v6 = vpop.f32.mrf.mxu3  ;;  %v5430_v11 = vld [vmem:[#allocation7_spill] sm:$0xff] }
 0x19a   : > { %1614 = vmatmul.f32.gmra.mxu1 %v3710_v62  ;;  %1449 = vmatmul.f32.vlgmr.msrb.gmra.mxu0 %v3688_v49  ;;  %vm291_vm7 = vcmp.eq.s32.totalorder %v4207_v7, %v5430_v11  ;;  %v5434_v11 = vld [vmem:[#allocation11_spill] sm:$0xff] }
 0x19b   : > { %v1082_v37 = vadd.f32 %v1081_v28, %v888_v27  ;;  %v1806_v28 = vand.u32 4294901760, %v1805_v41  ;;  %vm295_vm9 = vcmp.eq.s32.totalorder %v4207_v7, %v5434_v11 }
 0x19c   : > { %1783 = vmatmul.f32.gmra.mxu2 %v1782_v46  ;;  %v5250_v46 = vand.u32 4294901760, %v4360_v35 }
 0x19d   : > { %v4333_v5 = vadd.f32 %v1291_v6, %v1082_v37  ;;  %v4377_v37 = vsub.f32 %v353_v25, %v4369_v24 }
 0x19e   : > { %2128 = vmatmul.f32.gmra.mxu3 %v4273_v60  ;;  %v1813_v9 = vsub.f32 %v4360_v35, %v5250_v46 }
 0x19f   : > { %v895_v22 = vpop.f32.mrf.mxu1  ;;  %v1086_v39 = vpop.f32.mrf.mxu2  ;;  %v5249_v20 = vand.u32 4294901760, %v4377_v37 }
 0x1a0   : > { %v610_v49 = vpop.f32.mrf.mxu0 }
 0x1a1   : > { %v892_v34 = vadd.f32 %v891_v57, %v610_v49  ;;  %v1297_v14 = vpop.f32.mrf.mxu3  ;;  %v5429_v57 = vld [vmem:[#allocation5_spill] sm:$0xff] }
 0x1a2   : > { %1618 = vmatmul.f32.gmra.mxu1 %v3716_v12  ;;  %1453 = vmatmul.f32.gmra.mxu0 %v3710_v62 }
 0x1a3   : > { %v1087_v23 = vadd.f32 %v1086_v39, %v892_v34 }
 0x1a4   : > { %1791 = vmatmul.f32.gmra.mxu2 %v1790_v50 }
 0x1a5   : > { %v4350_v26 = vadd.f32 %v1297_v14, %v1087_v23  ;;  %v5431_v14 = vld [vmem:[#allocation6_spill] sm:$0xff]  ;;  %v1814_v23 = vand.u32 4294901760, %v1813_v9 }
 0x1a6   : > { %2132 = vmatmul.f32.gmra.mxu3 %v4299_v36 }
 0x1a7   : > { %v899_v53 = vpop.f32.mrf.mxu1  ;;  %v1091_v13 = vpop.f32.mrf.mxu2 }
 0x1a8   : > { %v618_v62 = vpop.f32.mrf.mxu0 }
 0x1a9   : > { %v896_v16 = vadd.f32 %v895_v22, %v618_v62  ;;  %v1303_v32 = vpop.f32.mrf.mxu3  ;;  %v355_v22 = vsel %vm291_vm7, 11.313708, %v5379_v63 }
 0x1aa   : > { %1622 = vmatmul.f32.gmra.mxu1 %v3737_v56  ;;  %1457 = vmatmul.f32.gmra.mxu0 %v3716_v12  ;;  %v4386_v34 = vand.u32 4294901760, %v355_v22 }
 0x1ab   : > { %v1092_v30 = vadd.f32 %v1091_v13, %v896_v16  ;;  %v1821_v16 = vsub.f32 %v4377_v37, %v5249_v20 }
 0x1ac   : > { %1799 = vmatmul.f32.gmra.mxu2 %v1798_v19  ;;  %v4394_v19 = vsub.f32 %v355_v22, %v4386_v34 }
 0x1ad   : > { %v4367_v44 = vadd.f32 %v1303_v32, %v1092_v30  ;;  %v357_v32 = vsel %vm293_vm8, 11.313708, %v5379_v63 }
 0x1ae   : > { %2136 = vmatmul.f32.gmra.mxu3 %v4318_v58 }
 0x1af   : > { %v903_v21 = vpop.f32.mrf.mxu1  ;;  %v1096_v55 = vpop.f32.mrf.mxu2 }
 0x1b0   : > { %v626_v12 = vpop.f32.mrf.mxu0 }
 0x1b1   : > { %v900_v27 = vadd.f32 %v899_v53, %v626_v12  ;;  %v1309_v6 = vpop.f32.mrf.mxu3  ;;  %v5248_v12 = vand.u32 4294901760, %v4394_v19 }
 0x1b2   : > { %1626 = vmatmul.f32.gmra.mxu1 %v5429_v57  ;;  %1461 = vmatmul.f32.gmra.mxu0 %v3737_v56 }
 0x1b3   : > { %v1097_v0 = vadd.f32 %v1096_v55, %v900_v27  ;;  %v4403_v55 = vand.u32 4294901760, %v357_v32  ;;  %v1829_v22 = vsub.f32 %v4394_v19, %v5248_v12 }
 0x1b4   : > { %1807 = vmatmul.f32.gmra.mxu2 %v1806_v28  ;;  %v1822_v28 = vand.u32 4294901760, %v1821_v16  ;;  %v5437_v16 = vld [vmem:[#allocation13_spill] sm:$0xff] }
 0x1b5   : > { %v4384_v49 = vadd.f32 %v1309_v6, %v1097_v0  ;;  %v4411_v0 = vsub.f32 %v357_v32, %v4403_v55  ;;  %vm297_vm10 = vcmp.eq.s32.totalorder %v4207_v7, %v5437_v16 }
 0x1b6   : > { %2140 = vmatmul.f32.gmra.mxu3 %v4335_v52 }
 0x1b7   : > { %v907_v39 = vpop.f32.mrf.mxu1  ;;  %v1101_v50 = vpop.f32.mrf.mxu2 }
 0x1b8   : > { %v634_v56 = vpop.f32.mrf.mxu0 }
 0x1b9   : > { %v904_v53 = vadd.f32 %v903_v21, %v634_v56  ;;  %v1315_v13 = vpop.f32.mrf.mxu3  ;;  %v5433_v21 = vld [vmem:[#allocation8_spill] sm:$0xff] }
 0x1ba   : > { %1630 = vmatmul.f32.gmra.mxu1 %v5431_v14  ;;  %1465 = vmatmul.f32.gmra.mxu0 %v5429_v57 }
 0x1bb   : > { %v1102_v62 = vadd.f32 %v1101_v50, %v904_v53  ;;  %v359_v50 = vsel %vm295_vm9, 11.313708, %v5379_v63 }
 0x1bc   : > { %1815 = vmatmul.f32.gmra.mxu2 %v1814_v23  ;;  %v4420_v53 = vand.u32 4294901760, %v359_v50 }
 0x1bd   : > { %v4401_v25 = vadd.f32 %v1315_v13, %v1102_v62  ;;  %v1830_v13 = vand.u32 4294901760, %v1829_v22  ;;  %v5247_v62 = vand.u32 4294901760, %v4411_v0 }
 0x1be   : > { %2144 = vmatmul.f32.gmra.mxu3 %v4352_v8  ;;  %5435 = vst [vmem:[#allocation5_spill] sm:$0xff] %v4420_v53 }
 0x1bf   : > { %v911_v30 = vpop.f32.mrf.mxu1  ;;  %v1106_v41 = vpop.f32.mrf.mxu2  ;;  %v1837_v11 = vsub.f32 %v4411_v0, %v5247_v62 }
 0x1c0   : > { %v642_v57 = vpop.f32.mrf.mxu0 }
 0x1c1   : > { %v908_v27 = vadd.f32 %v907_v39, %v642_v57  ;;  %v1321_v6 = vpop.f32.mrf.mxu3  ;;  %v5436_v39 = vld [vmem:[#allocation9_spill] sm:$0xff] }
 0x1c2   : > { %1634 = vmatmul.f32.gmra.mxu1 %v5433_v21  ;;  %1469 = vmatmul.f32.gmra.mxu0 %v5431_v14 }
 0x1c3   : > { %v1107_v9 = vadd.f32 %v1106_v41, %v908_v27  ;;  %v361_v27 = vsel %vm297_vm10, 11.313708, %v5379_v63 }
 0x1c4   : > { %1823 = vmatmul.f32.gmra.mxu2 %v1822_v28  ;;  %v4428_v28 = vsub.f32 %v359_v50, %v4420_v53  ;;  %v4437_v16 = vand.u32 4294901760, %v361_v27  ;;  %v1838_v50 = vand.u32 4294901760, %v1837_v11 }
 0x1c5   : > { %v4418_v10 = vadd.f32 %v1321_v6, %v1107_v9 }
 0x1c6   : > { %2148 = vmatmul.f32.gmra.mxu3 %v4369_v24  ;;  %5438 = vst [vmem:[#allocation7_spill] sm:$0xff] %v4437_v16  ;;  %v4445_v62 = vsub.f32 %v361_v27, %v4437_v16 }
 0x1c7   : > { %v915_v23 = vpop.f32.mrf.mxu1  ;;  %v1111_v56 = vpop.f32.mrf.mxu2 }
 0x1c8   : > { %v650_v14 = vpop.f32.mrf.mxu0  ;;  %5441 = vst [vmem:[#allocation6_spill] sm:$0xff] %v4445_v62 }
 0x1c9   : > { %v912_v32 = vadd.f32 %v911_v30, %v650_v14  ;;  %v1327_v41 = vpop.f32.mrf.mxu3  ;;  %v5439_v30 = vld [vmem:[#allocation12_spill] sm:$0xff] }
 0x1ca   : > { %1638 = vmatmul.f32.gmra.mxu1 %v5436_v39  ;;  %1473 = vmatmul.f32.gmra.mxu0 %v5433_v21 }
 0x1cb   : > { %v1112_v57 = vadd.f32 %v1111_v56, %v912_v32  ;;  %v5251_v56 = vand.u32 4294901760, %v4428_v28 }
 0x1cc   : > { %1831 = vmatmul.f32.gmra.mxu2 %v1830_v13  ;;  %v5440_v13 = vld [vmem:[#allocation16_spill] sm:$0xff] }
 0x1cd   : > { %v4435_v22 = vadd.f32 %v1327_v41, %v1112_v57  ;;  %vm299_vm11 = vcmp.eq.s32.totalorder %v4207_v7, %v5440_v13  ;;  %v1845_v57 = vsub.f32 %v4428_v28, %v5251_v56 }
 0x1ce   : > { %2152 = vmatmul.f32.gmra.mxu3 %v4386_v34  ;;  %v363_v11 = vsel %vm299_vm11, 11.313708, %v5379_v63 }
 0x1cf   : > { %v919_v6 = vpop.f32.mrf.mxu1  ;;  %v1116_v9 = vpop.f32.mrf.mxu2  ;;  %v4454_v13 = vand.u32 4294901760, %v363_v11  ;;  %v1846_v27 = vand.u32 4294901760, %v1845_v57 }
 0x1d0   : > { %v658_v21 = vpop.f32.mrf.mxu0 }
 0x1d1   : > { %v916_v14 = vadd.f32 %v915_v23, %v658_v21  ;;  %v1333_v32 = vpop.f32.mrf.mxu3  ;;  %5442 = vst [vmem:[#allocation10_spill] sm:$0xff] %v4454_v13  ;;  %v5443_v23 = vld [vmem:[#allocation14_spill] sm:$0xff]  ;;  %v4462_v56 = vsub.f32 %v363_v11, %v4454_v13 }
 0x1d2   : > { %1642 = vmatmul.f32.gmra.mxu1 %v5439_v30  ;;  %1477 = vmatmul.f32.gmra.mxu0 %v5436_v39 }
 0x1d3   : > { %v1117_v41 = vadd.f32 %v1116_v9, %v916_v14  ;;  %v5255_v9 = vand.u32 4294901760, %v4445_v62  ;;  %5445 = vst [vmem:[#allocation8_spill] sm:$0xff] %v4462_v56 }
 0x1d4   : > { %1839 = vmatmul.f32.gmra.mxu2 %v1838_v50  ;;  %v5444_v50 = vld [vmem:[#allocation17_spill] sm:$0xff] }
 0x1d5   : > { %v4452_v46 = vadd.f32 %v1333_v32, %v1117_v41  ;;  %vm301_vm12 = vcmp.eq.s32.totalorder %v4207_v7, %v5444_v50  ;;  %v1853_v41 = vsub.f32 %v4445_v62, %v5255_v9 }
 0x1d6   : > { %2156 = vmatmul.f32.gmra.mxu3 %v4403_v55  ;;  %v365_v57 = vsel %vm301_vm12, 11.313708, %v5379_v63 }
 0x1d7   : > { %v923_v12 = vpop.f32.mrf.mxu1  ;;  %v1121_v20 = vpop.f32.mrf.mxu2  ;;  %v4471_v50 = vand.u32 4294901760, %v365_v57  ;;  %v1854_v11 = vand.u32 4294901760, %v1853_v41 }
 0x1d8   : > { %v666_v39 = vpop.f32.mrf.mxu0 }
 0x1d9   : > { %v920_v21 = vadd.f32 %v919_v6, %v666_v39  ;;  %v1339_v14 = vpop.f32.mrf.mxu3  ;;  %5446 = vst [vmem:[#allocation11_spill] sm:$0xff] %v4471_v50  ;;  %v5447_v6 = vld [vmem:[#allocation15_spill] sm:$0xff]  ;;  %v4479_v9 = vsub.f32 %v365_v57, %v4471_v50 }
 0x1da   : > { %1646 = vmatmul.f32.gmra.mxu1 %v5443_v23  ;;  %1481 = vmatmul.f32.gmra.mxu0 %v5439_v30 }
 0x1db   : > { %v1122_v32 = vadd.f32 %v1121_v20, %v920_v21  ;;  %v5260_v20 = vand.u32 4294901760, %v4462_v56  ;;  %5449 = vst [vmem:[#allocation9_spill] sm:$0xff] %v4479_v9 }
 0x1dc   : > { %1847 = vmatmul.f32.gmra.mxu2 %v1846_v27  ;;  %v5448_v27 = vld [vmem:[#allocation19_spill] sm:$0xff] }
 0x1dd   : > { %v4469_v1 = vadd.f32 %v1339_v14, %v1122_v32  ;;  %vm303_vm13 = vcmp.eq.s32.totalorder %v4207_v7, %v5448_v27  ;;  %v1861_v32 = vsub.f32 %v4462_v56, %v5260_v20 }
 0x1de   : > { %2160 = vmatmul.f32.gmra.mxu3 %v4420_v53  ;;  %v367_v41 = vsel %vm303_vm13, 11.313708, %v5379_v63 }
 0x1df   : > { %v927_v48 = vpop.f32.mrf.mxu1  ;;  %v1126_v61 = vpop.f32.mrf.mxu2  ;;  %v4488_v27 = vand.u32 4294901760, %v367_v41  ;;  %v1862_v57 = vand.u32 4294901760, %v1861_v32 }
 0x1e0   : > { %v674_v30 = vpop.f32.mrf.mxu0 }
 0x1e1   : > { %v924_v39 = vadd.f32 %v923_v12, %v674_v30  ;;  %v1345_v21 = vpop.f32.mrf.mxu3  ;;  %5451 = vst [vmem:[#allocation12_spill] sm:$0xff] %v4488_v27  ;;  %v5452_v12 = vld [vmem:[#allocation18_spill] sm:$0xff]  ;;  %v4496_v20 = vsub.f32 %v367_v41, %v4488_v27 }
 0x1e2   : > { %1650 = vmatmul.f32.gmra.mxu1 %v5447_v6  ;;  %1485 = vmatmul.f32.gmra.mxu0 %v5443_v23 }
 0x1e3   : > { %v1127_v14 = vadd.f32 %v1126_v61, %v924_v39  ;;  %v5265_v61 = vand.u32 4294901760, %v4479_v9  ;;  %5454 = vst [vmem:[#allocation16_spill] sm:$0xff] %v4496_v20 }
 0x1e4   : > { %1855 = vmatmul.f32.gmra.mxu2 %v1854_v11  ;;  %v5453_v11 = vld [vmem:[#allocation22_spill] sm:$0xff] }
 0x1e5   : > { %v4486_v62 = vadd.f32 %v1345_v21, %v1127_v14  ;;  %vm305_vm14 = vcmp.eq.s32.totalorder %v4207_v7, %v5453_v11  ;;  %v1869_v14 = vsub.f32 %v4479_v9, %v5265_v61 }
 0x1e6   : > { %2164 = vmatmul.f32.gmra.mxu3 %v4437_v16  ;;  %v369_v32 = vsel %vm305_vm14, 11.313708, %v5379_v63  ;;  %vm337_vm14 = vcmp.eq.s32.totalorder %v4207_v7, %v4191_v43 }
 0x1e7   : > { %v931_v45 = vpop.f32.mrf.mxu1  ;;  %v1131_v47 = vpop.f32.mrf.mxu2  ;;  %5450 = vst [vmem:[#allocation13_spill] sm:$0xff] %v4486_v62  ;;  %v4505_v11 = vand.u32 4294901760, %v369_v32  ;;  %v1870_v41 = vand.u32 4294901760, %v1869_v14 }
 0x1e8   : > { %v682_v23 = vpop.f32.mrf.mxu0 }
 0x1e9   : > { %v928_v30 = vadd.f32 %v927_v48, %v682_v23  ;;  %v1351_v39 = vpop.f32.mrf.mxu3  ;;  %5456 = vst [vmem:[#allocation17_spill] sm:$0xff] %v4505_v11  ;;  %v5457_v48 = vld [vmem:[#allocation20_spill] sm:$0xff]  ;;  %v4513_v61 = vsub.f32 %v369_v32, %v4505_v11 }
 0x1ea   : > { %1654 = vmatmul.f32.gmra.mxu1 %v5452_v12  ;;  %1489 = vmatmul.f32.gmra.mxu0 %v5447_v6 }
 0x1eb   : > { %v1132_v21 = vadd.f32 %v1131_v47, %v928_v30  ;;  %v5270_v47 = vand.u32 4294901760, %v4496_v20  ;;  %5459 = vst [vmem:[#allocation15_spill] sm:$0xff] %v4513_v61 }
 0x1ec   : > { %1863 = vmatmul.f32.gmra.mxu2 %v1862_v57  ;;  %v5458_v57 = vld [vmem:[#allocation23_spill] sm:$0xff] }
 0x1ed   : > { %v4503_v62 = vadd.f32 %v1351_v39, %v1132_v21  ;;  %vm307_vm15 = vcmp.eq.s32.totalorder %v4207_v7, %v5458_v57  ;;  %v1877_v21 = vsub.f32 %v4496_v20, %v5270_v47 }
 0x1ee   : > { %2168 = vmatmul.f32.gmra.mxu3 %v4454_v13  ;;  %v371_v14 = vsel %vm307_vm15, 11.313708, %v5379_v63  ;;  %vm339_vm15 = vcmp.eq.s32.totalorder %v4207_v7, %v4220_v4 }
 0x1ef   : > { %v935_v56 = vpop.f32.mrf.mxu1  ;;  %v1136_v16 = vpop.f32.mrf.mxu2  ;;  %5455 = vst [vmem:[#allocation14_spill] sm:$0xff] %v4503_v62  ;;  %v4522_v57 = vand.u32 4294901760, %v371_v14  ;;  %v1878_v32 = vand.u32 4294901760, %v1877_v21 }
 0x1f0   : > { %v690_v6 = vpop.f32.mrf.mxu0 }
 0x1f1   : > { %v932_v23 = vadd.f32 %v931_v45, %v690_v6  ;;  %v1357_v30 = vpop.f32.mrf.mxu3  ;;  %5461 = vst [vmem:[#allocation18_spill] sm:$0xff] %v4522_v57  ;;  %v5462_v45 = vld [vmem:[#allocation21_spill] sm:$0xff]  ;;  %v4530_v47 = vsub.f32 %v371_v14, %v4522_v57 }
 0x1f2   : > { %1658 = vmatmul.f32.gmra.mxu1 %v5457_v48  ;;  %1493 = vmatmul.f32.gmra.mxu0 %v5452_v12 }
 0x1f3   : > { %v1137_v39 = vadd.f32 %v1136_v16, %v932_v23  ;;  %v5275_v16 = vand.u32 4294901760, %v4513_v61  ;;  %5464 = vst [vmem:[#allocation22_spill] sm:$0xff] %v4530_v47 }
 0x1f4   : > { %1871 = vmatmul.f32.gmra.mxu2 %v1870_v41  ;;  %v5463_v41 = vld [vmem:[#allocation25_spill] sm:$0xff] }
 0x1f5   : > { %v4520_v62 = vadd.f32 %v1357_v30, %v1137_v39  ;;  %vm309_vm0 = vcmp.eq.s32.totalorder %v4207_v7, %v5463_v41  ;;  %v1885_v39 = vsub.f32 %v4513_v61, %v5275_v16 }
 0x1f6   : > { %2172 = vmatmul.f32.gmra.mxu3 %v4471_v50  ;;  %v373_v21 = vsel %vm309_vm0, 11.313708, %v5379_v63 }
 0x1f7   : > { %v939_v9 = vpop.f32.mrf.mxu1  ;;  %v1141_v13 = vpop.f32.mrf.mxu2  ;;  %5460 = vst [vmem:[#allocation19_spill] sm:$0xff] %v4520_v62  ;;  %v4539_v41 = vand.u32 4294901760, %v373_v21  ;;  %v1886_v14 = vand.u32 4294901760, %v1885_v39 }
 0x1f8   : > { %v698_v12 = vpop.f32.mrf.mxu0 }
 0x1f9   : > { %v936_v6 = vadd.f32 %v935_v56, %v698_v12  ;;  %v1363_v23 = vpop.f32.mrf.mxu3  ;;  %5466 = vst [vmem:[#allocation23_spill] sm:$0xff] %v4539_v41  ;;  %v5467_v56 = vld [vmem:[#allocation24_spill] sm:$0xff]  ;;  %v4547_v16 = vsub.f32 %v373_v21, %v4539_v41 }
 0x1fa   : > { %1662 = vmatmul.f32.gmra.mxu1 %v5462_v45  ;;  %1497 = vmatmul.f32.gmra.mxu0 %v5457_v48 }
 0x1fb   : > { %v1142_v30 = vadd.f32 %v1141_v13, %v936_v6  ;;  %v5280_v13 = vand.u32 4294901760, %v4530_v47  ;;  %5469 = vst [vmem:[#allocation21_spill] sm:$0xff] %v4547_v16 }
 0x1fc   : > { %1879 = vmatmul.f32.gmra.mxu2 %v1878_v32  ;;  %v5468_v32 = vld [vmem:[#allocation28_spill] sm:$0xff] }
 0x1fd   : > { %v4537_v62 = vadd.f32 %v1363_v23, %v1142_v30  ;;  %vm311_vm1 = vcmp.eq.s32.totalorder %v4207_v7, %v5468_v32  ;;  %v1893_v30 = vsub.f32 %v4530_v47, %v5280_v13 }
 0x1fe   : > { %2176 = vmatmul.f32.gmra.mxu3 %v4488_v27  ;;  %v375_v39 = vsel %vm311_vm1, 11.313708, %v5379_v63 }
 0x1ff   : > { %v943_v20 = vpop.f32.mrf.mxu1  ;;  %v1146_v50 = vpop.f32.mrf.mxu2  ;;  %5465 = vst [vmem:[#allocation20_spill] sm:$0xff] %v4537_v62  ;;  %v4556_v32 = vand.u32 4294901760, %v375_v39  ;;  %v1894_v21 = vand.u32 4294901760, %v1893_v30 }
 0x200   : > { %v706_v48 = vpop.f32.mrf.mxu0 }
 0x201   : > { %v940_v12 = vadd.f32 %v939_v9, %v706_v48  ;;  %v1369_v6 = vpop.f32.mrf.mxu3  ;;  %5471 = vst [vmem:[#allocation24_spill] sm:$0xff] %v4556_v32  ;;  %v5472_v9 = vld [vmem:[#allocation26_spill] sm:$0xff]  ;;  %v4564_v13 = vsub.f32 %v375_v39, %v4556_v32 }
 0x202   : > { %1666 = vmatmul.f32.gmra.mxu1 %v5467_v56  ;;  %1501 = vmatmul.f32.gmra.mxu0 %v5462_v45 }
 0x203   : > { %v1147_v23 = vadd.f32 %v1146_v50, %v940_v12  ;;  %v5285_v50 = vand.u32 4294901760, %v4547_v16  ;;  %5474 = vst [vmem:[#allocation28_spill] sm:$0xff] %v4564_v13 }
 0x204   : > { %1887 = vmatmul.f32.gmra.mxu2 %v1886_v14  ;;  %v5473_v14 = vld [vmem:[#allocation29_spill] sm:$0xff] }
 0x205   : > { %v4554_v62 = vadd.f32 %v1369_v6, %v1147_v23  ;;  %vm313_vm2 = vcmp.eq.s32.totalorder %v4207_v7, %v5473_v14  ;;  %v1901_v23 = vsub.f32 %v4547_v16, %v5285_v50 }
 0x206   : > { %2180 = vmatmul.f32.gmra.mxu3 %v4505_v11  ;;  %v377_v30 = vsel %vm313_vm2, 11.313708, %v5379_v63 }
 0x207   : > { %v947_v61 = vpop.f32.mrf.mxu1  ;;  %v1151_v27 = vpop.f32.mrf.mxu2  ;;  %5470 = vst [vmem:[#allocation25_spill] sm:$0xff] %v4554_v62  ;;  %v4573_v14 = vand.u32 4294901760, %v377_v30  ;;  %v1902_v39 = vand.u32 4294901760, %v1901_v23 }
 0x208   : > { %v714_v45 = vpop.f32.mrf.mxu0 }
 0x209   : > { %v944_v48 = vadd.f32 %v943_v20, %v714_v45  ;;  %v1375_v12 = vpop.f32.mrf.mxu3  ;;  %5476 = vst [vmem:[#allocation29_spill] sm:$0xff] %v4573_v14  ;;  %v5477_v20 = vld [vmem:[#allocation27_spill] sm:$0xff]  ;;  %v4581_v50 = vsub.f32 %v377_v30, %v4573_v14 }
 0x20a   : > { %1670 = vmatmul.f32.gmra.mxu1 %v5472_v9  ;;  %1505 = vmatmul.f32.gmra.mxu0 %v5467_v56 }
 0x20b   : > { %v1152_v6 = vadd.f32 %v1151_v27, %v944_v48  ;;  %v5290_v27 = vand.u32 4294901760, %v4564_v13  ;;  %5479 = vst [vmem:[#allocation27_spill] sm:$0xff] %v4581_v50 }
 0x20c   : > { %1895 = vmatmul.f32.gmra.mxu2 %v1894_v21  ;;  %v5478_v21 = vld [vmem:[#allocation31_spill] sm:$0xff] }
 0x20d   : > { %v4571_v62 = vadd.f32 %v1375_v12, %v1152_v6  ;;  %vm315_vm3 = vcmp.eq.s32.totalorder %v4207_v7, %v5478_v21  ;;  %v1909_v6 = vsub.f32 %v4564_v13, %v5290_v27 }
 0x20e   : > { %2184 = vmatmul.f32.gmra.mxu3 %v4522_v57  ;;  %v379_v23 = vsel %vm315_vm3, 11.313708, %v5379_v63 }
 0x20f   : > { %v1156_v47 = vpop.f32.mrf.mxu2  ;;  %v1611_v11 = vpop.f32.mrf.mxu1  ;;  %5475 = vst [vmem:[#allocation26_spill] sm:$0xff] %v4571_v62  ;;  %v4590_v21 = vand.u32 4294901760, %v379_v23  ;;  %v1910_v30 = vand.u32 4294901760, %v1909_v6 }
 0x210   : > { %v722_v56 = vpop.f32.mrf.mxu0 }
 0x211   : > { %v948_v45 = vadd.f32 %v947_v61, %v722_v56  ;;  %v1381_v48 = vpop.f32.mrf.mxu3  ;;  %5481 = vst [vmem:[#allocation64_spill] sm:$0xff] %v4590_v21  ;;  %v5482_v61 = vld [vmem:[#allocation30_spill] sm:$0xff]  ;;  %v5484_v56 = vld [vmem:[#allocation33_spill] sm:$0xff] }
 0x212   : > { %1674 = vmatmul.f32.gmra.mxu1 %v5477_v20  ;;  %1509 = vmatmul.f32.gmra.mxu0 %v5472_v9 }
 0x213   : > { %v1157_v12 = vadd.f32 %v1156_v47, %v948_v45  ;;  %v5297_v47 = vand.u32 4294901760, %v4581_v50 }
 0x214   : > { %1903 = vmatmul.f32.gmra.mxu2 %v1902_v39  ;;  %v5483_v39 = vld [vmem:[#allocation35_spill] sm:$0xff] }
 0x215   : > { %v4588_v62 = vadd.f32 %v1381_v48, %v1157_v12  ;;  %vm317_vm4 = vcmp.eq.s32.totalorder %v4207_v7, %v5483_v39  ;;  %v4599_v48 = vsub.f32 %v379_v23, %v4590_v21  ;;  %v1917_v6 = vsub.f32 %v4581_v50, %v5297_v47  ;;  %v5488_v23 = vld [vmem:[#allocation32_spill] sm:$0xff] }
 0x216   : > { %2188 = vmatmul.f32.gmra.mxu3 %v4539_v41  ;;  %v381_v13 = vsel %vm317_vm4, 11.313708, %v5379_v63 }
 0x217   : > { %v1615_v16 = vpop.f32.mrf.mxu1  ;;  %v1776_v57 = vpop.f32.mrf.mxu2  ;;  %5480 = vst [vmem:[#allocation31_spill] sm:$0xff] %v4588_v62  ;;  %v4606_v39 = vand.u32 4294901760, %v381_v13 }
 0x218   : > { %v1450_v9 = vpop.f32.mrf.mxu0  ;;  %5485 = vst [vmem:[#allocation30_spill] sm:$0xff] %v4599_v48 }
 0x219   : > { %v1451_v45 = vadd.f32 %v1450_v9, %v5484_v56  ;;  %v2125_v27 = vpop.f32.mrf.mxu3  ;;  %5486 = vst [vmem:[#allocation35_spill] sm:$0xff] %v4606_v39  ;;  %v5489_v56 = vld [vmem:[#allocation37_spill] sm:$0xff] }
 0x21a   : > { %1678 = vmatmul.f32.gmra.mxu1 %v5482_v61  ;;  %1513 = vmatmul.f32.gmra.mxu0 %v5477_v20  ;;  %v5302_v20 = vand.u32 4294901760, %v4599_v48  ;;  %vm319_vm5 = vcmp.eq.s32.totalorder %v4207_v7, %v5489_v56 }
 0x21b   : > { %v1612_v12 = vadd.f32 %v1611_v11, %v1451_v45  ;;  %v1918_v11 = vand.u32 4294901760, %v1917_v6  ;;  %v5490_v45 = vld [vmem:[#allocation36_spill] sm:$0xff] }
 0x21c   : > { %1911 = vmatmul.f32.gmra.mxu2 %v1910_v30 }
 0x21d   : > { %v1777_v53 = vadd.f32 %v1776_v57, %v1612_v12  ;;  %v4617_v57 = vsub.f32 %v381_v13, %v4606_v39  ;;  %v383_v12 = vsel %vm319_vm5, 11.313708, %v5379_v63  ;;  %v5494_v13 = vld [vmem:[#allocation34_spill] sm:$0xff] }
 0x21e   : > { %2192 = vmatmul.f32.gmra.mxu3 %v4556_v32  ;;  %v4624_v56 = vand.u32 4294901760, %v383_v12 }
 0x21f   : > { %v1619_v41 = vpop.f32.mrf.mxu1  ;;  %v1784_v62 = vpop.f32.mrf.mxu2  ;;  %v4608_v9 = vadd.f32 %v2125_v27, %v1777_v53  ;;  %5491 = vst [vmem:[#allocation32_spill] sm:$0xff] %v4617_v57  ;;  %v1925_v27 = vsub.f32 %v4599_v48, %v5302_v20 }
 0x220   : > { %v1454_v30 = vpop.f32.mrf.mxu0  ;;  %5492 = vst [vmem:[#allocation37_spill] sm:$0xff] %v4624_v56 }
 0x221   : > { %5487 = vst [vmem:[#allocation33_spill] sm:$0xff] %v4608_v9  ;;  %v1455_v47 = vadd.f32 %v1454_v30, %v5490_v45  ;;  %v2129_v50 = vpop.f32.mrf.mxu3  ;;  %v5496_v45 = vld [vmem:[#allocation39_spill] sm:$0xff] }
 0x222   : > { %1682 = vmatmul.f32.gmra.mxu1 %v5488_v23  ;;  %1517 = vmatmul.f32.gmra.mxu0 %v5482_v61  ;;  %v5307_v61 = vand.u32 4294901760, %v4617_v57 }
 0x223   : > { %v1616_v53 = vadd.f32 %v1615_v16, %v1455_v47  ;;  %v1926_v16 = vand.u32 4294901760, %v1925_v27 }
 0x224   : > { %1919 = vmatmul.f32.gmra.mxu2 %v1918_v11  ;;  %v5495_v11 = vld [vmem:[#allocation40_spill] sm:$0xff] }
 0x225   : > { %v1785_v9 = vadd.f32 %v1784_v62, %v1616_v53  ;;  %vm321_vm6 = vcmp.eq.s32.totalorder %v4207_v7, %v5495_v11  ;;  %v4635_v62 = vsub.f32 %v383_v12, %v4624_v56  ;;  %v5500_v12 = vld [vmem:[#allocation38_spill] sm:$0xff] }
 0x226   : > { %2196 = vmatmul.f32.gmra.mxu3 %v4573_v14  ;;  %v385_v53 = vsel %vm321_vm6, 11.313708, %v5379_v63 }
 0x227   : > { %v1623_v6 = vpop.f32.mrf.mxu1  ;;  %v1792_v32 = vpop.f32.mrf.mxu2  ;;  %v4626_v30 = vadd.f32 %v2129_v50, %v1785_v9  ;;  %5497 = vst [vmem:[#allocation34_spill] sm:$0xff] %v4635_v62  ;;  %v1933_v9 = vsub.f32 %v4617_v57, %v5307_v61  ;;  %v4642_v11 = vand.u32 4294901760, %v385_v53 }
 0x228   : > { %v1458_v47 = vpop.f32.mrf.mxu0 }
 0x229   : > { %5493 = vst [vmem:[#allocation36_spill] sm:$0xff] %v4626_v30  ;;  %v1459_v20 = vadd.f32 %v1458_v47, %v5496_v45  ;;  %v2133_v48 = vpop.f32.mrf.mxu3  ;;  %v5502_v45 = vld [vmem:[#allocation42_spill] sm:$0xff] }
 0x22a   : > { %1686 = vmatmul.f32.gmra.mxu1 %v5494_v13  ;;  %1521 = vmatmul.f32.gmra.mxu0 %v5488_v23  ;;  %5498 = vst [vmem:[#allocation40_spill] sm:$0xff] %v4642_v11  ;;  %v5312_v23 = vand.u32 4294901760, %v4635_v62 }
 0x22b   : > { %v1620_v50 = vadd.f32 %v1619_v41, %v1459_v20  ;;  %v1934_v41 = vand.u32 4294901760, %v1933_v9 }
 0x22c   : > { %1927 = vmatmul.f32.gmra.mxu2 %v1926_v16  ;;  %v5501_v16 = vld [vmem:[#allocation43_spill] sm:$0xff] }
 0x22d   : > { %v1793_v30 = vadd.f32 %v1792_v32, %v1620_v50  ;;  %vm323_vm7 = vcmp.eq.s32.totalorder %v4207_v7, %v5501_v16  ;;  %v4653_v32 = vsub.f32 %v385_v53, %v4642_v11  ;;  %v5506_v53 = vld [vmem:[#allocation41_spill] sm:$0xff] }
 0x22e   : > { %2200 = vmatmul.f32.gmra.mxu3 %v4590_v21  ;;  %v387_v50 = vsel %vm323_vm7, 11.313708, %v5379_v63 }
 0x22f   : > { %v1627_v27 = vpop.f32.mrf.mxu1  ;;  %v1800_v14 = vpop.f32.mrf.mxu2  ;;  %v4644_v47 = vadd.f32 %v2133_v48, %v1793_v30  ;;  %5503 = vst [vmem:[#allocation38_spill] sm:$0xff] %v4653_v32  ;;  %v1941_v30 = vsub.f32 %v4635_v62, %v5312_v23  ;;  %v4660_v16 = vand.u32 4294901760, %v387_v50 }
 0x230   : > { %v1462_v20 = vpop.f32.mrf.mxu0 }
 0x231   : > { %5499 = vst [vmem:[#allocation39_spill] sm:$0xff] %v4644_v47  ;;  %v1463_v61 = vadd.f32 %v1462_v20, %v5502_v45  ;;  %v2137_v57 = vpop.f32.mrf.mxu3  ;;  %v5508_v45 = vld [vmem:[#allocation45_spill] sm:$0xff] }
 0x232   : > { %1690 = vmatmul.f32.gmra.mxu1 %v5500_v12  ;;  %1525 = vmatmul.f32.gmra.mxu0 %v5494_v13  ;;  %5504 = vst [vmem:[#allocation43_spill] sm:$0xff] %v4660_v16  ;;  %v5317_v13 = vand.u32 4294901760, %v4653_v32 }
 0x233   : > { %v1624_v48 = vadd.f32 %v1623_v6, %v1463_v61  ;;  %v1942_v6 = vand.u32 4294901760, %v1941_v30 }
 0x234   : > { %1935 = vmatmul.f32.gmra.mxu2 %v1934_v41  ;;  %v5507_v41 = vld [vmem:[#allocation46_spill] sm:$0xff] }
 0x235   : > { %v1801_v47 = vadd.f32 %v1800_v14, %v1624_v48  ;;  %vm325_vm8 = vcmp.eq.s32.totalorder %v4207_v7, %v5507_v41  ;;  %v4671_v14 = vsub.f32 %v387_v50, %v4660_v16  ;;  %v5512_v50 = vld [vmem:[#allocation44_spill] sm:$0xff] }
 0x236   : > { %2204 = vmatmul.f32.gmra.mxu3 %v4606_v39  ;;  %v389_v48 = vsel %vm325_vm8, 11.313708, %v5379_v63 }
 0x237   : > { %v1631_v9 = vpop.f32.mrf.mxu1  ;;  %v1808_v21 = vpop.f32.mrf.mxu2  ;;  %v4662_v20 = vadd.f32 %v2137_v57, %v1801_v47  ;;  %5509 = vst [vmem:[#allocation41_spill] sm:$0xff] %v4671_v14  ;;  %v1949_v47 = vsub.f32 %v4653_v32, %v5317_v13  ;;  %v4678_v41 = vand.u32 4294901760, %v389_v48 }
 0x238   : > { %v1466_v61 = vpop.f32.mrf.mxu0 }
 0x239   : > { %5505 = vst [vmem:[#allocation42_spill] sm:$0xff] %v4662_v20  ;;  %v1467_v23 = vadd.f32 %v1466_v61, %v5508_v45  ;;  %v2141_v62 = vpop.f32.mrf.mxu3  ;;  %v5514_v45 = vld [vmem:[#allocation48_spill] sm:$0xff] }
 0x23a   : > { %1694 = vmatmul.f32.gmra.mxu1 %v5506_v53  ;;  %1529 = vmatmul.f32.gmra.mxu0 %v5500_v12  ;;  %5510 = vst [vmem:[#allocation46_spill] sm:$0xff] %v4678_v41  ;;  %v5322_v12 = vand.u32 4294901760, %v4671_v14 }
 0x23b   : > { %v1628_v57 = vadd.f32 %v1627_v27, %v1467_v23  ;;  %v1950_v27 = vand.u32 4294901760, %v1949_v47 }
 0x23c   : > { %1943 = vmatmul.f32.gmra.mxu2 %v1942_v6  ;;  %v5513_v6 = vld [vmem:[#allocation49_spill] sm:$0xff] }
 0x23d   : > { %v1809_v20 = vadd.f32 %v1808_v21, %v1628_v57  ;;  %vm327_vm9 = vcmp.eq.s32.totalorder %v4207_v7, %v5513_v6  ;;  %v4689_v21 = vsub.f32 %v389_v48, %v4678_v41  ;;  %v5518_v48 = vld [vmem:[#allocation47_spill] sm:$0xff] }
 0x23e   : > { %2208 = vmatmul.f32.gmra.mxu3 %v4624_v56  ;;  %v391_v57 = vsel %vm327_vm9, 11.313708, %v5379_v63 }
 0x23f   : > { %v1635_v30 = vpop.f32.mrf.mxu1  ;;  %v1816_v39 = vpop.f32.mrf.mxu2  ;;  %v4680_v61 = vadd.f32 %v2141_v62, %v1809_v20  ;;  %5515 = vst [vmem:[#allocation44_spill] sm:$0xff] %v4689_v21  ;;  %v1957_v20 = vsub.f32 %v4671_v14, %v5322_v12  ;;  %v4696_v6 = vand.u32 4294901760, %v391_v57 }
 0x240   : > { %v1470_v23 = vpop.f32.mrf.mxu0 }
 0x241   : > { %5511 = vst [vmem:[#allocation45_spill] sm:$0xff] %v4680_v61  ;;  %v1471_v13 = vadd.f32 %v1470_v23, %v5514_v45  ;;  %v2145_v32 = vpop.f32.mrf.mxu3  ;;  %v5520_v45 = vld [vmem:[#allocation51_spill] sm:$0xff] }
 0x242   : > { %1698 = vmatmul.f32.gmra.mxu1 %v5512_v50  ;;  %1533 = vmatmul.f32.gmra.mxu0 %v5506_v53  ;;  %5516 = vst [vmem:[#allocation49_spill] sm:$0xff] %v4696_v6  ;;  %v5327_v53 = vand.u32 4294901760, %v4689_v21 }
 0x243   : > { %v1632_v62 = vadd.f32 %v1631_v9, %v1471_v13  ;;  %v1958_v9 = vand.u32 4294901760, %v1957_v20 }
 0x244   : > { %1951 = vmatmul.f32.gmra.mxu2 %v1950_v27  ;;  %v5519_v27 = vld [vmem:[#allocation52_spill] sm:$0xff] }
 0x245   : > { %v1817_v61 = vadd.f32 %v1816_v39, %v1632_v62  ;;  %vm329_vm10 = vcmp.eq.s32.totalorder %v4207_v7, %v5519_v27  ;;  %v4707_v39 = vsub.f32 %v391_v57, %v4696_v6  ;;  %v5524_v57 = vld [vmem:[#allocation50_spill] sm:$0xff] }
 0x246   : > { %2212 = vmatmul.f32.gmra.mxu3 %v4642_v11  ;;  %v393_v62 = vsel %vm329_vm10, 11.313708, %v5379_v63 }
 0x247   : > { %v1639_v47 = vpop.f32.mrf.mxu1  ;;  %v1824_v56 = vpop.f32.mrf.mxu2  ;;  %v4698_v23 = vadd.f32 %v2145_v32, %v1817_v61  ;;  %5521 = vst [vmem:[#allocation47_spill] sm:$0xff] %v4707_v39  ;;  %v1965_v61 = vsub.f32 %v4689_v21, %v5327_v53  ;;  %v4714_v27 = vand.u32 4294901760, %v393_v62 }
 0x248   : > { %v1474_v13 = vpop.f32.mrf.mxu0 }
 0x249   : > { %5517 = vst [vmem:[#allocation48_spill] sm:$0xff] %v4698_v23  ;;  %v1475_v12 = vadd.f32 %v1474_v13, %v5520_v45  ;;  %v2149_v14 = vpop.f32.mrf.mxu3  ;;  %v5526_v45 = vld [vmem:[#allocation54_spill] sm:$0xff] }
 0x24a   : > { %1702 = vmatmul.f32.gmra.mxu1 %v5518_v48  ;;  %1537 = vmatmul.f32.gmra.mxu0 %v5512_v50  ;;  %5522 = vst [vmem:[#allocation52_spill] sm:$0xff] %v4714_v27  ;;  %v5332_v50 = vand.u32 4294901760, %v4707_v39 }
 0x24b   : > { %v1636_v32 = vadd.f32 %v1635_v30, %v1475_v12  ;;  %v1966_v30 = vand.u32 4294901760, %v1965_v61 }
 0x24c   : > { %1959 = vmatmul.f32.gmra.mxu2 %v1958_v9  ;;  %v5525_v9 = vld [vmem:[#allocation55_spill] sm:$0xff] }
 0x24d   : > { %v1825_v23 = vadd.f32 %v1824_v56, %v1636_v32  ;;  %vm331_vm11 = vcmp.eq.s32.totalorder %v4207_v7, %v5525_v9  ;;  %v4725_v56 = vsub.f32 %v393_v62, %v4714_v27  ;;  %v5529_v62 = vld [vmem:[#allocation53_spill] sm:$0xff] }
 0x24e   : > { %2216 = vmatmul.f32.gmra.mxu3 %v4660_v16  ;;  %v395_v32 = vsel %vm331_vm11, 11.313708, %v5379_v63 }
 0x24f   : > { %v1643_v20 = vpop.f32.mrf.mxu1  ;;  %v1832_v11 = vpop.f32.mrf.mxu2  ;;  %v4716_v13 = vadd.f32 %v2149_v14, %v1825_v23  ;;  %5527 = vst [vmem:[#allocation50_spill] sm:$0xff] %v4725_v56  ;;  %v1973_v23 = vsub.f32 %v4707_v39, %v5332_v50  ;;  %v4732_v9 = vand.u32 4294901760, %v395_v32 }
 0x250   : > { %v1478_v12 = vpop.f32.mrf.mxu0 }
 0x251   : > { %5523 = vst [vmem:[#allocation51_spill] sm:$0xff] %v4716_v13  ;;  %v1479_v53 = vadd.f32 %v1478_v12, %v5526_v45  ;;  %v2153_v21 = vpop.f32.mrf.mxu3  ;;  %v5531_v45 = vld [vmem:[#allocation57_spill] sm:$0xff] }
 0x252   : > { %1706 = vmatmul.f32.gmra.mxu1 %v5524_v57  ;;  %1541 = vmatmul.f32.gmra.mxu0 %v5518_v48  ;;  %v5337_v48 = vand.u32 4294901760, %v4725_v56 }
 0x253   : > { %v1640_v14 = vadd.f32 %v1639_v47, %v1479_v53  ;;  %v1974_v47 = vand.u32 4294901760, %v1973_v23 }
 0x254   : > { %1967 = vmatmul.f32.gmra.mxu2 %v1966_v30  ;;  %v5530_v30 = vld [vmem:[#allocation58_spill] sm:$0xff] }
 0x255   : > { %v1833_v13 = vadd.f32 %v1832_v11, %v1640_v14  ;;  %vm333_vm12 = vcmp.eq.s32.totalorder %v4207_v7, %v5530_v30  ;;  %v4743_v11 = vsub.f32 %v395_v32, %v4732_v9  ;;  %v5534_v32 = vld [vmem:[#allocation56_spill] sm:$0xff] }
 0x256   : > { %2220 = vmatmul.f32.gmra.mxu3 %v4678_v41  ;;  %v397_v14 = vsel %vm333_vm12, 11.313708, %v5379_v63 }
 0x257   : > { %v1647_v61 = vpop.f32.mrf.mxu1  ;;  %v1840_v16 = vpop.f32.mrf.mxu2  ;;  %v4734_v12 = vadd.f32 %v2153_v21, %v1833_v13  ;;  %5532 = vst [vmem:[#allocation54_spill] sm:$0xff] %v4743_v11  ;;  %v1981_v13 = vsub.f32 %v4725_v56, %v5337_v48  ;;  %v4750_v30 = vand.u32 4294901760, %v397_v14 }
 0x258   : > { %v1482_v53 = vpop.f32.mrf.mxu0 }
 0x259   : > { %5528 = vst [vmem:[#allocation55_spill] sm:$0xff] %v4734_v12  ;;  %v1483_v50 = vadd.f32 %v1482_v53, %v5531_v45  ;;  %v2157_v39 = vpop.f32.mrf.mxu3  ;;  %v5536_v45 = vld [vmem:[#allocation60_spill] sm:$0xff] }
 0x25a   : > { %1710 = vmatmul.f32.gmra.mxu1 %v5529_v62  ;;  %1545 = vmatmul.f32.gmra.mxu0 %v5524_v57  ;;  %v5342_v57 = vand.u32 4294901760, %v4743_v11 }
 0x25b   : > { %v1644_v21 = vadd.f32 %v1643_v20, %v1483_v50  ;;  %v1982_v20 = vand.u32 4294901760, %v1981_v13 }
 0x25c   : > { %1975 = vmatmul.f32.gmra.mxu2 %v1974_v47  ;;  %v5535_v47 = vld [vmem:[#allocation61_spill] sm:$0xff] }
 0x25d   : > { %v1841_v12 = vadd.f32 %v1840_v16, %v1644_v21  ;;  %vm335_vm13 = vcmp.eq.s32.totalorder %v4207_v7, %v5535_v47  ;;  %v4761_v16 = vsub.f32 %v397_v14, %v4750_v30  ;;  %v5538_v14 = vld [vmem:[#allocation59_spill] sm:$0xff] }
 0x25e   : > { %2224 = vmatmul.f32.gmra.mxu3 %v4696_v6  ;;  %v399_v21 = vsel %vm335_vm13, 11.313708, %v5379_v63 }
 0x25f   : > { %v1651_v23 = vpop.f32.mrf.mxu1  ;;  %v1848_v41 = vpop.f32.mrf.mxu2  ;;  %v4752_v53 = vadd.f32 %v2157_v39, %v1841_v12  ;;  %5537 = vst [vmem:[#allocation58_spill] sm:$0xff] %v4761_v16  ;;  %v1989_v12 = vsub.f32 %v4743_v11, %v5342_v57  ;;  %v4768_v47 = vand.u32 4294901760, %v399_v21 }
 0x260   : > { %v1486_v50 = vpop.f32.mrf.mxu0 }
 0x261   : > { %5533 = vst [vmem:[#allocation53_spill] sm:$0xff] %v4752_v53  ;;  %v1487_v48 = vadd.f32 %v1486_v50, %v5536_v45  ;;  %v2161_v56 = vpop.f32.mrf.mxu3 }
 0x262   : > { %1714 = vmatmul.f32.gmra.mxu1 %v5534_v32  ;;  %1549 = vmatmul.f32.gmra.mxu0 %v5529_v62  ;;  %v5347_v62 = vand.u32 4294901760, %v4761_v16 }
 0x263   : > { %v1648_v39 = vadd.f32 %v1647_v61, %v1487_v48  ;;  %v1990_v61 = vand.u32 4294901760, %v1989_v12 }
 0x264   : > { %1983 = vmatmul.f32.gmra.mxu2 %v1982_v20  ;;  %v5539_v20 = vld [vmem:[#allocation63_spill] sm:$0xff] }
 0x265   : > { %v1849_v53 = vadd.f32 %v1848_v41, %v1648_v39  ;;  %v4779_v41 = vsub.f32 %v399_v21, %v4768_v47  ;;  %v401_v39 = vsel %vm337_vm14, 11.313708, %v5379_v63  ;;  %v5540_v21 = vld [vmem:[#allocation62_spill] sm:$0xff] }
 0x266   : > { %2228 = vmatmul.f32.gmra.mxu3 %v4714_v27  ;;  %v4786_v43 = vand.u32 4294901760, %v401_v39 }
 0x267   : > { %v1655_v13 = vpop.f32.mrf.mxu1  ;;  %v1856_v6 = vpop.f32.mrf.mxu2  ;;  %v4770_v50 = vadd.f32 %v2161_v56, %v1849_v53  ;;  %v1997_v53 = vsub.f32 %v4761_v16, %v5347_v62 }
 0x268   : > { %v1490_v48 = vpop.f32.mrf.mxu0 }
 0x269   : > { %v1491_v45 = vadd.f32 %v1490_v48, %v5539_v20  ;;  %v2165_v57 = vpop.f32.mrf.mxu3 }
 0x26a   : > { %1718 = vmatmul.f32.gmra.mxu1 %v5538_v14  ;;  %1553 = vmatmul.f32.gmra.mxu0 %v5534_v32  ;;  %v2004_v32 = vand.u32 4294901760, %v4779_v41 }
 0x26b   : > { %v1652_v56 = vadd.f32 %v1651_v23, %v1491_v45  ;;  %v1998_v23 = vand.u32 4294901760, %v1997_v53 }
 0x26c   : > { %1991 = vmatmul.f32.gmra.mxu2 %v1990_v61 }
 0x26d   : > { %v1857_v27 = vadd.f32 %v1856_v6, %v1652_v56  ;;  %v4797_v6 = vsub.f32 %v401_v39, %v4786_v43  ;;  %v403_v56 = vsel %vm339_vm15, 11.313708, %v5379_v63 }
 0x26e   : > { %2232 = vmatmul.f32.gmra.mxu3 %v4732_v9  ;;  %v4804_v7 = vand.u32 4294901760, %v403_v56 }
 0x26f   : > { %v1659_v12 = vpop.f32.mrf.mxu1  ;;  %v1864_v11 = vpop.f32.mrf.mxu2  ;;  %v4788_v48 = vadd.f32 %v2165_v57, %v1857_v27  ;;  %v2005_v57 = vsub.f32 %v4779_v41, %v2004_v32 }
 0x270   : > { %v1494_v61 = vpop.f32.mrf.mxu0  ;;  %v4813_v63 = vsub.f32 %v403_v56, %v4804_v7 }
 0x271   : > { %v1495_v20 = vadd.f32 %v1494_v61, %v4212_v40  ;;  %v2169_v45 = vpop.f32.mrf.mxu3  ;;  %v2006_v4 = vand.u32 4294901760, %v2005_v57 }
 0x272   : > { %1722 = vmatmul.f32.gmra.mxu1 %v5540_v21  ;;  %1557 = vmatmul.f32.gmra.mxu0 %v5538_v14  ;;  %v5350_v57 = vand.u32 4294901760, %v4813_v63 }
 0x273   : > { %v1656_v27 = vadd.f32 %v1655_v13, %v1495_v20  ;;  %v2012_v13 = vand.u32 4294901760, %v4797_v6 }
 0x274   : > { %1999 = vmatmul.f32.gmra.mxu2 %v1998_v23 }
 0x275   : > { %v1865_v16 = vadd.f32 %v1864_v11, %v1656_v27 }
 0x276   : > { %2236 = vmatmul.f32.gmra.mxu3 %v4750_v30 }
 0x277   : > { %v1663_v53 = vpop.f32.mrf.mxu1  ;;  %v1872_v62 = vpop.f32.mrf.mxu2  ;;  %v4806_v40 = vadd.f32 %v2169_v45, %v1865_v16  ;;  %v2013_v16 = vsub.f32 %v4797_v6, %v2012_v13 }
 0x278   : > { %v1498_v14 = vpop.f32.mrf.mxu0 }
 0x279   : > { %v1499_v39 = vadd.f32 %v1498_v14, %v4240_v15  ;;  %v2173_v23 = vpop.f32.mrf.mxu3  ;;  %v2014_v15 = vand.u32 4294901760, %v2013_v16 }
 0x27a   : > { %1726 = vmatmul.f32.gmra.mxu1 %v4197_v29  ;;  %1561 = vmatmul.f32.gmra.mxu0 %v5540_v21 }
 0x27b   : > { %v1660_v11 = vadd.f32 %v1659_v12, %v1499_v39 }
 0x27c   : > { %2007 = vmatmul.f32.gmra.mxu2 %v2006_v4 }
 0x27d   : > { %v1873_v45 = vadd.f32 %v1872_v62, %v1660_v11  ;;  %v2021_v62 = vsub.f32 %v4813_v63, %v5350_v57 }
 0x27e   : > { %2240 = vmatmul.f32.gmra.mxu3 %v4768_v47 }
 0x27f   : > { %v1667_v61 = vpop.f32.mrf.mxu1  ;;  %v1880_v20 = vpop.f32.mrf.mxu2  ;;  %v4819_v27 = vadd.f32 %v2173_v23, %v1873_v45  ;;  %v2022_v16 = vand.u32 4294901760, %v2021_v62 }
 0x280   : > { %v1502_v56 = vpop.f32.mrf.mxu0 }
 0x281   : > { %v1503_v12 = vadd.f32 %v1502_v56, %v4267_v3  ;;  %v2177_v21 = vpop.f32.mrf.mxu3 }
 0x282   : > { %1730 = vmatmul.f32.gmra.mxu1 %v4225_v31  ;;  %1565 = vmatmul.f32.gmra.mxu0 %v4197_v29 }
 0x283   : > { %v1664_v4 = vadd.f32 %v1663_v53, %v1503_v12 }
 0x284   : > { %2015 = vmatmul.f32.gmra.mxu2 %v2014_v15 }
 0x285   : > { %v1881_v23 = vadd.f32 %v1880_v20, %v1664_v4  ;;  %v5541_v20 = vand.u32 4294901760, %v4260_v54 }
 0x286   : > { %2244 = vmatmul.f32.gmra.mxu3 %v4786_v43 }
 0x287   : > { %v1671_v14 = vpop.f32.mrf.mxu1  ;;  %v1888_v39 = vpop.f32.mrf.mxu2  ;;  %v4829_v11 = vadd.f32 %v2177_v21, %v1881_v23 }
 0x288   : > { %v1506_v3 = vpop.f32.mrf.mxu0 }
 0x289   : > { %v1507_v45 = vadd.f32 %v1506_v3, %v4294_v18  ;;  %v2181_v53 = vpop.f32.mrf.mxu3 }
 0x28a   : > { %1734 = vmatmul.f32.gmra.mxu1 %v4254_v59  ;;  %1569 = vmatmul.f32.gmra.mxu0 %v4225_v31 }
 0x28b   : > { %v1668_v29 = vadd.f32 %v1667_v61, %v1507_v45 }
 0x28c   : > { %2023 = vmatmul.f32.gmra.mxu2 %v2022_v16  ;;  %v5542_v16 = vand.u32 4294901760, %v4285_v51 }
 0x28d   : > { %v1889_v12 = vadd.f32 %v1888_v39, %v1668_v29 }
 0x28e   : > { %2248 = vmatmul.f32.gmra.mxu3 %v4804_v7 }
 0x28f   : > { %v1675_v15 = vpop.f32.mrf.mxu1  ;;  %v1896_v56 = vpop.f32.mrf.mxu2  ;;  %v4835_v57 = vadd.f32 %v2181_v53, %v1889_v12 }
 0x290   : > { %v1510_v21 = vpop.f32.mrf.mxu0 }
 0x291   : > { %v1511_v4 = vadd.f32 %v1510_v21, %v4315_v17  ;;  %v2185_v18 = vpop.f32.mrf.mxu3 }
 0x292   : > { %2496 = vmatmul.f32.vlgmr.msra.gmra.mxu1 %v5541_v20  ;;  %1573 = vmatmul.f32.gmra.mxu0 %v4254_v59 }
 0x293   : > { %v1672_v62 = vadd.f32 %v1671_v14, %v1511_v4 }
 0x294   : > { %2751 = vmatmul.f32.vlgmr.msra.gmra.mxu2 %v4246_v38 }
 0x295   : > { %v1897_v23 = vadd.f32 %v1896_v56, %v1672_v62 }
 0x296   : > { %2912 = vmatmul.f32.vlgmr.msra.gmra.mxu3 %v4246_v38  ;;  %v5543_v38 = vand.u32 4294901760, %v4308_v33 }
 0x297   : > { %v1679_v31 = vpop.f32.mrf.mxu1  ;;  %v1904_v61 = vpop.f32.mrf.mxu2  ;;  %v4843_v39 = vadd.f32 %v2185_v18, %v1897_v23 }
 0x298   : > { %v1514_v3 = vpop.f32.mrf.mxu0 }
 0x299   : > { %v1515_v45 = vadd.f32 %v1514_v3, %v4333_v5  ;;  %v2189_v17 = vpop.f32.mrf.mxu3 }
 0x29a   : > { %2502 = vmatmul.f32.gmra.mxu1 %v5542_v16  ;;  %2302 = vmatmul.f32.vlgmr.msra.gmra.mxu0 %v4260_v54 }
 0x29b   : > { %v1676_v53 = vadd.f32 %v1675_v15, %v1515_v45 }
 0x29c   : > { %2755 = vmatmul.f32.gmra.mxu2 %v4273_v60 }
 0x29d   : > { %v1905_v29 = vadd.f32 %v1904_v61, %v1676_v53 }
 0x29e   : > { %2916 = vmatmul.f32.gmra.mxu3 %v4273_v60  ;;  %v5544_v60 = vand.u32 4294901760, %v4326_v2 }
 0x29f   : > { %v1683_v59 = vpop.f32.mrf.mxu1  ;;  %v1912_v14 = vpop.f32.mrf.mxu2  ;;  %v4851_v56 = vadd.f32 %v2189_v17, %v1905_v29 }
 0x2a0   : > { %v1518_v12 = vpop.f32.mrf.mxu0 }
 0x2a1   : > { %v1519_v20 = vadd.f32 %v1518_v12, %v4350_v26  ;;  %v2193_v5 = vpop.f32.mrf.mxu3 }
 0x2a2   : > { %2508 = vmatmul.f32.gmra.mxu1 %v5543_v38  ;;  %2307 = vmatmul.f32.gmra.mxu0 %v4285_v51 }
 0x2a3   : > { %v1680_v21 = vadd.f32 %v1679_v31, %v1519_v20 }
 0x2a4   : > { %2759 = vmatmul.f32.gmra.mxu2 %v4299_v36 }
 0x2a5   : > { %v1913_v4 = vadd.f32 %v1912_v14, %v1680_v21 }
 0x2a6   : > { %2920 = vmatmul.f32.gmra.mxu3 %v4299_v36  ;;  %v5545_v36 = vand.u32 4294901760, %v4343_v42 }
 0x2a7   : > { %v1687_v54 = vpop.f32.mrf.mxu1  ;;  %v1920_v15 = vpop.f32.mrf.mxu2  ;;  %v4859_v18 = vadd.f32 %v2193_v5, %v1913_v4 }
 0x2a8   : > { %v1522_v62 = vpop.f32.mrf.mxu0 }
 0x2a9   : > { %v1523_v61 = vadd.f32 %v1522_v62, %v4367_v44  ;;  %v2197_v26 = vpop.f32.mrf.mxu3 }
 0x2aa   : > { %2514 = vmatmul.f32.gmra.mxu1 %v5544_v60  ;;  %2312 = vmatmul.f32.gmra.mxu0 %v4308_v33 }
 0x2ab   : > { %v1684_v23 = vadd.f32 %v1683_v59, %v1523_v61 }
 0x2ac   : > { %2763 = vmatmul.f32.gmra.mxu2 %v4318_v58 }
 0x2ad   : > { %v1921_v16 = vadd.f32 %v1920_v15, %v1684_v23 }
 0x2ae   : > { %2924 = vmatmul.f32.gmra.mxu3 %v4318_v58  ;;  %v5546_v58 = vand.u32 4294901760, %v4360_v35 }
 0x2af   : > { %v1691_v51 = vpop.f32.mrf.mxu1  ;;  %v1928_v31 = vpop.f32.mrf.mxu2  ;;  %v4867_v3 = vadd.f32 %v2197_v26, %v1921_v16 }
 0x2b0   : > { %v1526_v45 = vpop.f32.mrf.mxu0 }
 0x2b1   : > { %v1527_v17 = vadd.f32 %v1526_v45, %v4384_v49  ;;  %v2201_v44 = vpop.f32.mrf.mxu3 }
 0x2b2   : > { %2520 = vmatmul.f32.gmra.mxu1 %v5545_v36  ;;  %2317 = vmatmul.f32.gmra.mxu0 %v4326_v2 }
 0x2b3   : > { %v1688_v53 = vadd.f32 %v1687_v54, %v1527_v17 }
 0x2b4   : > { %2767 = vmatmul.f32.gmra.mxu2 %v4335_v52 }
 0x2b5   : > { %v1929_v14 = vadd.f32 %v1928_v31, %v1688_v53 }
 0x2b6   : > { %2928 = vmatmul.f32.gmra.mxu3 %v4335_v52  ;;  %v5547_v52 = vand.u32 4294901760, %v4377_v37 }
 0x2b7   : > { %v1695_v33 = vpop.f32.mrf.mxu1  ;;  %v1936_v59 = vpop.f32.mrf.mxu2  ;;  %v4875_v29 = vadd.f32 %v2201_v44, %v1929_v14 }
 0x2b8   : > { %v1530_v38 = vpop.f32.mrf.mxu0 }
 0x2b9   : > { %v1531_v12 = vadd.f32 %v1530_v38, %v4401_v25  ;;  %v2205_v49 = vpop.f32.mrf.mxu3 }
 0x2ba   : > { %2526 = vmatmul.f32.gmra.mxu1 %v5546_v58  ;;  %2322 = vmatmul.f32.gmra.mxu0 %v4343_v42 }
 0x2bb   : > { %v1692_v20 = vadd.f32 %v1691_v51, %v1531_v12 }
 0x2bc   : > { %2771 = vmatmul.f32.gmra.mxu2 %v4352_v8 }
 0x2bd   : > { %v1937_v21 = vadd.f32 %v1936_v59, %v1692_v20 }
 0x2be   : > { %2932 = vmatmul.f32.gmra.mxu3 %v4352_v8  ;;  %v5548_v8 = vand.u32 4294901760, %v4394_v19 }
 0x2bf   : > { %v1699_v2 = vpop.f32.mrf.mxu1  ;;  %v1944_v5 = vpop.f32.mrf.mxu2  ;;  %v4883_v54 = vadd.f32 %v2205_v49, %v1937_v21 }
 0x2c0   : > { %v1534_v15 = vpop.f32.mrf.mxu0 }
 0x2c1   : > { %v1535_v4 = vadd.f32 %v1534_v15, %v4418_v10  ;;  %v2209_v25 = vpop.f32.mrf.mxu3  ;;  %v5554_v15 = vld [vmem:[#allocation13_spill] sm:$0xff] }
 0x2c2   : > { %2532 = vmatmul.f32.gmra.mxu1 %v5547_v52  ;;  %2327 = vmatmul.f32.gmra.mxu0 %v4360_v35 }
 0x2c3   : > { %v1696_v60 = vadd.f32 %v1695_v33, %v1535_v4 }
 0x2c4   : > { %2775 = vmatmul.f32.gmra.mxu2 %v4369_v24 }
 0x2c5   : > { %v1945_v61 = vadd.f32 %v1944_v5, %v1696_v60 }
 0x2c6   : > { %2936 = vmatmul.f32.gmra.mxu3 %v4369_v24  ;;  %v5549_v24 = vand.u32 4294901760, %v4411_v0 }
 0x2c7   : > { %v1703_v42 = vpop.f32.mrf.mxu1  ;;  %v1952_v62 = vpop.f32.mrf.mxu2  ;;  %v4891_v26 = vadd.f32 %v2209_v25, %v1945_v61 }
 0x2c8   : > { %v1538_v23 = vpop.f32.mrf.mxu0 }
 0x2c9   : > { %v1539_v51 = vadd.f32 %v1538_v23, %v4435_v22  ;;  %v2213_v10 = vpop.f32.mrf.mxu3 }
 0x2ca   : > { %2538 = vmatmul.f32.gmra.mxu1 %v5548_v8  ;;  %2332 = vmatmul.f32.gmra.mxu0 %v4377_v37  ;;  %v5556_v8 = vld [vmem:[#allocation8_spill] sm:$0xff] }
 0x2cb   : > { %v1700_v31 = vadd.f32 %v1699_v2, %v1539_v51  ;;  %v5557_v23 = vand.u32 4294901760, %v5556_v8 }
 0x2cc   : > { %2779 = vmatmul.f32.gmra.mxu2 %v4386_v34 }
 0x2cd   : > { %v1953_v36 = vadd.f32 %v1952_v62, %v1700_v31 }
 0x2ce   : > { %2940 = vmatmul.f32.gmra.mxu3 %v4386_v34  ;;  %v5550_v34 = vand.u32 4294901760, %v4428_v28 }
 0x2cf   : > { %v1707_v35 = vpop.f32.mrf.mxu1  ;;  %v1960_v16 = vpop.f32.mrf.mxu2  ;;  %v4899_v45 = vadd.f32 %v2213_v10, %v1953_v36  ;;  %v5558_v10 = vld [vmem:[#allocation14_spill] sm:$0xff] }
 0x2d0   : > { %v1542_v17 = vpop.f32.mrf.mxu0 }
 0x2d1   : > { %v1543_v44 = vadd.f32 %v1542_v17, %v4452_v46  ;;  %v2217_v22 = vpop.f32.mrf.mxu3  ;;  %v5551_v46 = vld [vmem:[#allocation5_spill] sm:$0xff] }
 0x2d2   : > { %2544 = vmatmul.f32.gmra.mxu1 %v5549_v24  ;;  %2337 = vmatmul.f32.gmra.mxu0 %v4394_v19 }
 0x2d3   : > { %v1704_v53 = vadd.f32 %v1703_v42, %v1543_v44 }
 0x2d4   : > { %2783 = vmatmul.f32.gmra.mxu2 %v4403_v55 }
 0x2d5   : > { %v1961_v59 = vadd.f32 %v1960_v16, %v1704_v53 }
 0x2d6   : > { %2944 = vmatmul.f32.gmra.mxu3 %v4403_v55  ;;  %v5552_v55 = vld [vmem:[#allocation6_spill] sm:$0xff] }
 0x2d7   : > { %v1711_v37 = vpop.f32.mrf.mxu1  ;;  %v1968_v33 = vpop.f32.mrf.mxu2  ;;  %v4907_v14 = vadd.f32 %v2217_v22, %v1961_v59  ;;  %v5553_v21 = vand.u32 4294901760, %v5552_v55  ;;  %v5560_v22 = vld [vmem:[#allocation9_spill] sm:$0xff] }
 0x2d8   : > { %v1546_v58 = vpop.f32.mrf.mxu0  ;;  %v5561_v53 = vand.u32 4294901760, %v5560_v22 }
 0x2d9   : > { %v1547_v38 = vadd.f32 %v1546_v58, %v4469_v1  ;;  %v2221_v12 = vpop.f32.mrf.mxu3  ;;  %v5555_v1 = vld [vmem:[#allocation7_spill] sm:$0xff] }
 0x2da   : > { %2550 = vmatmul.f32.gmra.mxu1 %v5550_v34  ;;  %2342 = vmatmul.f32.gmra.mxu0 %v4411_v0  ;;  %v5563_v34 = vld [vmem:[#allocation11_spill] sm:$0xff] }
 0x2db   : > { %v1708_v49 = vadd.f32 %v1707_v35, %v1547_v38  ;;  %v5559_v35 = vld [vmem:[#allocation10_spill] sm:$0xff] }
 0x2dc   : > { %2787 = vmatmul.f32.gmra.mxu2 %v5551_v46 }
 0x2dd   : > { %v1969_v2 = vadd.f32 %v1968_v33, %v1708_v49  ;;  %v5562_v33 = vld [vmem:[#allocation19_spill] sm:$0xff] }
 0x2de   : > { %2948 = vmatmul.f32.gmra.mxu3 %v5551_v46 }
 0x2df   : > { %v1715_v19 = vpop.f32.mrf.mxu1  ;;  %v1976_v20 = vpop.f32.mrf.mxu2  ;;  %v4915_v5 = vadd.f32 %v2221_v12, %v1969_v2 }
 0x2e0   : > { %v1550_v52 = vpop.f32.mrf.mxu0 }
 0x2e1   : > { %v1551_v4 = vadd.f32 %v1550_v52, %v5554_v15  ;;  %v2225_v25 = vpop.f32.mrf.mxu3  ;;  %v5567_v15 = vld [vmem:[#allocation12_spill] sm:$0xff] }
 0x2e2   : > { %2556 = vmatmul.f32.gmra.mxu1 %v5553_v21  ;;  %2347 = vmatmul.f32.gmra.mxu0 %v4428_v28  ;;  %v5566_v21 = vld [vmem:[#allocation20_spill] sm:$0xff] }
 0x2e3   : > { %v1712_v60 = vadd.f32 %v1711_v37, %v1551_v4 }
 0x2e4   : > { %2791 = vmatmul.f32.gmra.mxu2 %v5555_v1 }
 0x2e5   : > { %v1977_v62 = vadd.f32 %v1976_v20, %v1712_v60  ;;  %v5564_v20 = vld [vmem:[#allocation16_spill] sm:$0xff] }
 0x2e6   : > { %2952 = vmatmul.f32.gmra.mxu3 %v5555_v1  ;;  %v5565_v2 = vand.u32 4294901760, %v5564_v20 }
 0x2e7   : > { %v1719_v0 = vpop.f32.mrf.mxu1  ;;  %v1984_v42 = vpop.f32.mrf.mxu2  ;;  %v4923_v61 = vadd.f32 %v2225_v25, %v1977_v62  ;;  %v5568_v62 = vld [vmem:[#allocation15_spill] sm:$0xff] }
 0x2e8   : > { %v1554_v51 = vpop.f32.mrf.mxu0 }
 0x2e9   : > { %v1555_v31 = vadd.f32 %v1554_v51, %v5558_v10  ;;  %v2229_v16 = vpop.f32.mrf.mxu3  ;;  %v5570_v51 = vld [vmem:[#allocation25_spill] sm:$0xff] }
 0x2ea   : > { %2562 = vmatmul.f32.gmra.mxu1 %v5557_v23  ;;  %2352 = vmatmul.f32.gmra.mxu0 %v5552_v55 }
 0x2eb   : > { %v1716_v36 = vadd.f32 %v1715_v19, %v1555_v31  ;;  %v5571_v31 = vld [vmem:[#allocation17_spill] sm:$0xff] }
 0x2ec   : > { %2795 = vmatmul.f32.gmra.mxu2 %v5559_v35 }
 0x2ed   : > { %v1985_v17 = vadd.f32 %v1984_v42, %v1716_v36 }
 0x2ee   : > { %2956 = vmatmul.f32.gmra.mxu3 %v5559_v35 }
 0x2ef   : > { %v1723_v28 = vpop.f32.mrf.mxu1  ;;  %v1992_v24 = vpop.f32.mrf.mxu2  ;;  %v4931_v44 = vadd.f32 %v2229_v16, %v1985_v17 }
 0x2f0   : > { %v1558_v37 = vpop.f32.mrf.mxu0 }
 0x2f1   : > { %v1559_v59 = vadd.f32 %v1558_v37, %v5562_v33  ;;  %v2233_v58 = vpop.f32.mrf.mxu3  ;;  %v5574_v33 = vld [vmem:[#allocation26_spill] sm:$0xff] }
 0x2f2   : > { %2568 = vmatmul.f32.gmra.mxu1 %v5561_v53  ;;  %2357 = vmatmul.f32.gmra.mxu0 %v5556_v8  ;;  %v5569_v8 = vand.u32 4294901760, %v5568_v62 }
 0x2f3   : > { %v1720_v38 = vadd.f32 %v1719_v0, %v1559_v59 }
 0x2f4   : > { %2799 = vmatmul.f32.gmra.mxu2 %v5563_v34 }
 0x2f5   : > { %v1993_v49 = vadd.f32 %v1992_v24, %v1720_v38 }
 0x2f6   : > { %2960 = vmatmul.f32.gmra.mxu3 %v5563_v34  ;;  %v5575_v34 = vld [vmem:[#allocation18_spill] sm:$0xff] }
 0x2f7   : > { %v1727_v46 = vpop.f32.mrf.mxu1  ;;  %v2000_v12 = vpop.f32.mrf.mxu2  ;;  %v4939_v19 = vadd.f32 %v2233_v58, %v1993_v49 }
 0x2f8   : > { %v1562_v55 = vpop.f32.mrf.mxu0 }
 0x2f9   : > { %v1563_v52 = vadd.f32 %v1562_v55, %v5566_v21  ;;  %v2237_v4 = vpop.f32.mrf.mxu3 }
 0x2fa   : > { %2574 = vmatmul.f32.gmra.mxu1 %v5565_v2  ;;  %2362 = vmatmul.f32.gmra.mxu0 %v5560_v22  ;;  %v5572_v22 = vld [vmem:[#allocation22_spill] sm:$0xff]  ;;  %v5576_v2 = vld [vmem:[#allocation21_spill] sm:$0xff] }
 0x2fb   : > { %v1724_v1 = vadd.f32 %v1723_v28, %v1563_v52  ;;  %v5573_v53 = vand.u32 4294901760, %v5572_v22  ;;  %v5577_v55 = vand.u32 4294901760, %v5576_v2  ;;  %v5578_v52 = vld [vmem:[#allocation31_spill] sm:$0xff] }
 0x2fc   : > { %2803 = vmatmul.f32.gmra.mxu2 %v5567_v15 }
 0x2fd   : > { %v2001_v0 = vadd.f32 %v2000_v12, %v1724_v1 }
 0x2fe   : > { %2964 = vmatmul.f32.gmra.mxu3 %v5567_v15 }
 0x2ff   : > { %v1731_v25 = vpop.f32.mrf.mxu1  ;;  %v2008_v60 = vpop.f32.mrf.mxu2  ;;  %v4947_v42 = vadd.f32 %v2237_v4, %v2001_v0  ;;  %v5579_v4 = vld [vmem:[#allocation23_spill] sm:$0xff] }
 0x300   : > { %v1566_v23 = vpop.f32.mrf.mxu0 }
 0x301   : > { %v1567_v10 = vadd.f32 %v1566_v23, %v5570_v51  ;;  %v2241_v35 = vpop.f32.mrf.mxu3  ;;  %v5580_v23 = vld [vmem:[#allocation28_spill] sm:$0xff] }
 0x302   : > { %2580 = vmatmul.f32.gmra.mxu1 %v5569_v8  ;;  %2367 = vmatmul.f32.gmra.mxu0 %v5564_v20  ;;  %v5581_v51 = vand.u32 4294901760, %v5580_v23 }
 0x303   : > { %v1728_v16 = vadd.f32 %v1727_v46, %v1567_v10 }
 0x304   : > { %2807 = vmatmul.f32.gmra.mxu2 %v5571_v31 }
 0x305   : > { %v2009_v24 = vadd.f32 %v2008_v60, %v1728_v16  ;;  %v5583_v16 = vld [vmem:[#allocation24_spill] sm:$0xff] }
 0x306   : > { %2968 = vmatmul.f32.gmra.mxu3 %v5571_v31  ;;  %v5582_v31 = vld [vmem:[#allocation33_spill] sm:$0xff] }
 0x307   : > { %v1735_v36 = vpop.f32.mrf.mxu1  ;;  %v2016_v28 = vpop.f32.mrf.mxu2  ;;  %v4955_v17 = vadd.f32 %v2241_v35, %v2009_v24 }
 0x308   : > { %v1570_v37 = vpop.f32.mrf.mxu0 }
 0x309   : > { %v1571_v59 = vadd.f32 %v1570_v37, %v5574_v33  ;;  %v2245_v58 = vpop.f32.mrf.mxu3  ;;  %v5584_v33 = vld [vmem:[#allocation27_spill] sm:$0xff] }
 0x30a   : > { %2586 = vmatmul.f32.gmra.mxu1 %v5573_v53  ;;  %2372 = vmatmul.f32.gmra.mxu0 %v5568_v62 }
 0x30b   : > { %v1732_v38 = vadd.f32 %v1731_v25, %v1571_v59  ;;  %v5585_v59 = vand.u32 4294901760, %v5584_v33 }
 0x30c   : > { %2811 = vmatmul.f32.gmra.mxu2 %v5575_v34 }
 0x30d   : > { %v2017_v49 = vadd.f32 %v2016_v28, %v1732_v38 }
 0x30e   : > { %2972 = vmatmul.f32.gmra.mxu3 %v5575_v34 }
 0x30f   : > { %v2024_v46 = vpop.f32.mrf.mxu2  ;;  %v2497_v12 = vpop.f32.mrf.mxu1  ;;  %v4963_v20 = vadd.f32 %v2245_v58, %v2017_v49  ;;  %v5586_v58 = vld [vmem:[#allocation36_spill] sm:$0xff] }
 0x310   : > { %v1574_v21 = vpop.f32.mrf.mxu0 }
 0x311   : > { %v1575_v15 = vadd.f32 %v1574_v21, %v5578_v52  ;;  %v2249_v1 = vpop.f32.mrf.mxu3 }
 0x312   : > { %2592 = vmatmul.f32.gmra.mxu1 %v5577_v55  ;;  %2377 = vmatmul.f32.gmra.mxu0 %v5572_v22 }
 0x313   : > { %v1736_v25 = vadd.f32 %v1735_v36, %v1575_v15  ;;  %v5588_v15 = vld [vmem:[#allocation30_spill] sm:$0xff] }
 0x314   : > { %2815 = vmatmul.f32.gmra.mxu2 %v5579_v4 }
 0x315   : > { %v2025_v62 = vadd.f32 %v2024_v46, %v1736_v25  ;;  %v5587_v46 = vld [vmem:[#allocation29_spill] sm:$0xff]  ;;  %v5590_v25 = vld [vmem:[#allocation39_spill] sm:$0xff] }
 0x316   : > { %2976 = vmatmul.f32.gmra.mxu3 %v5579_v4  ;;  %v5589_v4 = vand.u32 4294901760, %v5588_v15 }
 0x317   : > { %v2503_v60 = vpop.f32.mrf.mxu1  ;;  %v2752_v0 = vpop.f32.mrf.mxu2  ;;  %v4971_v8 = vadd.f32 %v2249_v1, %v2025_v62  ;;  %v5591_v62 = vld [vmem:[#allocation64_spill] sm:$0xff] }
 0x318   : > { %v2303_v10 = vpop.f32.mrf.mxu0 }
 0x319   : > { %v2304_v35 = vadd.f32 %v2303_v10, %v5582_v31  ;;  %v2913_v28 = vpop.f32.mrf.mxu3 }
 0x31a   : > { %2598 = vmatmul.f32.gmra.mxu1 %v5581_v51  ;;  %2382 = vmatmul.f32.gmra.mxu0 %v5576_v2 }
 0x31b   : > { %v2498_v36 = vadd.f32 %v2497_v12, %v2304_v35 }
 0x31c   : > { %2819 = vmatmul.f32.gmra.mxu2 %v5583_v16 }
 0x31d   : > { %v2753_v53 = vadd.f32 %v2752_v0, %v2498_v36 }
 0x31e   : > { %2980 = vmatmul.f32.gmra.mxu3 %v5583_v16  ;;  %v5592_v16 = vld [vmem:[#allocation32_spill] sm:$0xff] }
 0x31f   : > { %v2509_v24 = vpop.f32.mrf.mxu1  ;;  %v2756_v22 = vpop.f32.mrf.mxu2  ;;  %v2914_v37 = vadd.f32 %v2913_v28, %v2753_v53  ;;  %v5593_v28 = vand.u32 4294901760, %v5592_v16 }
 0x320   : > { %v2308_v34 = vpop.f32.mrf.mxu0 }
 0x321   : > { %3040 = vst [vmem:[%s4985_s8] sm:$0xff] %v2914_v37  ;;  %v2309_v38 = vadd.f32 %v2308_v34, %v5586_v58  ;;  %v2917_v12 = vpop.f32.mrf.mxu3  ;;  %v5595_v37 = vld [vmem:[#allocation35_spill] sm:$0xff] }
 0x322   : > { %2604 = vmatmul.f32.gmra.mxu1 %v5585_v59  ;;  %2387 = vmatmul.f32.gmra.mxu0 %v5580_v23 }
 0x323   : > { %v2504_v49 = vadd.f32 %v2503_v60, %v2309_v38 }
 0x324   : > { %2823 = vmatmul.f32.gmra.mxu2 %v5587_v46 }
 0x325   : > { %v2757_v21 = vadd.f32 %v2756_v22, %v2504_v49  ;;  %v5594_v22 = vld [vmem:[#allocation42_spill] sm:$0xff] }
 0x326   : > { %2984 = vmatmul.f32.gmra.mxu3 %v5587_v46  ;;  %v5596_v46 = vld [vmem:[#allocation34_spill] sm:$0xff] }
 0x327   : > { %v2515_v2 = vpop.f32.mrf.mxu1  ;;  %v2760_v55 = vpop.f32.mrf.mxu2  ;;  %v2918_v52 = vadd.f32 %v2917_v12, %v2757_v21  ;;  %v5597_v12 = vand.u32 4294901760, %v5596_v46 }
 0x328   : > { %v2313_v1 = vpop.f32.mrf.mxu0 }
 0x329   : > { %3041 = vst [vmem:[%s4985_s8 + $0x8] sm:$0xff] %v2918_v52  ;;  %v2314_v0 = vadd.f32 %v2313_v1, %v5590_v25  ;;  %v2921_v51 = vpop.f32.mrf.mxu3  ;;  %v5599_v52 = vld [vmem:[#allocation37_spill] sm:$0xff] }
 0x32a   : > { %2610 = vmatmul.f32.gmra.mxu1 %v5589_v4  ;;  %2392 = vmatmul.f32.gmra.mxu0 %v5584_v33 }
 0x32b   : > { %v2510_v60 = vadd.f32 %v2509_v24, %v2314_v0 }
 0x32c   : > { %2827 = vmatmul.f32.gmra.mxu2 %v5591_v62 }
 0x32d   : > { %v2761_v31 = vadd.f32 %v2760_v55, %v2510_v60  ;;  %v5598_v55 = vld [vmem:[#allocation45_spill] sm:$0xff] }
 0x32e   : > { %2988 = vmatmul.f32.gmra.mxu3 %v5591_v62  ;;  %v5600_v62 = vld [vmem:[#allocation38_spill] sm:$0xff] }
 0x32f   : > { %v2521_v23 = vpop.f32.mrf.mxu1  ;;  %v2764_v10 = vpop.f32.mrf.mxu2  ;;  %v2922_v35 = vadd.f32 %v2921_v51, %v2761_v31  ;;  %v5601_v51 = vand.u32 4294901760, %v5600_v62 }
 0x330   : > { %v2318_v36 = vpop.f32.mrf.mxu0 }
 0x331   : > { %3042 = vst [vmem:[%s4985_s8 + $0x10] sm:$0xff] %v2922_v35  ;;  %v2319_v53 = vadd.f32 %v2318_v36, %v5594_v22  ;;  %v2925_v59 = vpop.f32.mrf.mxu3  ;;  %v5603_v35 = vld [vmem:[#allocation40_spill] sm:$0xff] }
 0x332   : > { %2616 = vmatmul.f32.gmra.mxu1 %v5593_v28  ;;  %2397 = vmatmul.f32.gmra.mxu0 %v5588_v15 }
 0x333   : > { %v2516_v24 = vadd.f32 %v2515_v2, %v2319_v53 }
 0x334   : > { %2831 = vmatmul.f32.gmra.mxu2 %v5595_v37 }
 0x335   : > { %v2765_v58 = vadd.f32 %v2764_v10, %v2516_v24  ;;  %v5602_v10 = vld [vmem:[#allocation48_spill] sm:$0xff] }
 0x336   : > { %2992 = vmatmul.f32.gmra.mxu3 %v5595_v37  ;;  %v5604_v37 = vld [vmem:[#allocation41_spill] sm:$0xff] }
 0x337   : > { %v2527_v33 = vpop.f32.mrf.mxu1  ;;  %v2768_v34 = vpop.f32.mrf.mxu2  ;;  %v2926_v38 = vadd.f32 %v2925_v59, %v2765_v58  ;;  %v5605_v59 = vand.u32 4294901760, %v5604_v37 }
 0x338   : > { %v2323_v49 = vpop.f32.mrf.mxu0 }
 0x339   : > { %3043 = vst [vmem:[%s4985_s8 + $0x18] sm:$0xff] %v2926_v38  ;;  %v2324_v21 = vadd.f32 %v2323_v49, %v5598_v55  ;;  %v2929_v4 = vpop.f32.mrf.mxu3  ;;  %v5607_v38 = vld [vmem:[#allocation43_spill] sm:$0xff] }
 0x33a   : > { %2622 = vmatmul.f32.gmra.mxu1 %v5597_v12  ;;  %2402 = vmatmul.f32.gmra.mxu0 %v5592_v16 }
 0x33b   : > { %v2522_v2 = vadd.f32 %v2521_v23, %v2324_v21 }
 0x33c   : > { %2835 = vmatmul.f32.gmra.mxu2 %v5599_v52 }
 0x33d   : > { %v2769_v25 = vadd.f32 %v2768_v34, %v2522_v2  ;;  %v5606_v34 = vld [vmem:[#allocation51_spill] sm:$0xff] }
 0x33e   : > { %2996 = vmatmul.f32.gmra.mxu3 %v5599_v52  ;;  %v5608_v52 = vld [vmem:[#allocation44_spill] sm:$0xff] }
 0x33f   : > { %v2533_v15 = vpop.f32.mrf.mxu1  ;;  %v2772_v1 = vpop.f32.mrf.mxu2  ;;  %v2930_v0 = vadd.f32 %v2929_v4, %v2769_v25  ;;  %v5609_v4 = vand.u32 4294901760, %v5608_v52 }
 0x340   : > { %v2328_v60 = vpop.f32.mrf.mxu0 }
 0x341   : > { %3044 = vst [vmem:[%s4985_s8 + $0x20] sm:$0xff] %v2930_v0  ;;  %v2329_v31 = vadd.f32 %v2328_v60, %v5602_v10  ;;  %v2933_v28 = vpop.f32.mrf.mxu3  ;;  %v5611_v0 = vld [vmem:[#allocation46_spill] sm:$0xff] }
 0x342   : > { %2628 = vmatmul.f32.gmra.mxu1 %v5601_v51  ;;  %2407 = vmatmul.f32.gmra.mxu0 %v5596_v46 }
 0x343   : > { %v2528_v23 = vadd.f32 %v2527_v33, %v2329_v31 }
 0x344   : > { %2839 = vmatmul.f32.gmra.mxu2 %v5603_v35 }
 0x345   : > { %v2773_v22 = vadd.f32 %v2772_v1, %v2528_v23  ;;  %v5610_v1 = vld [vmem:[#allocation55_spill] sm:$0xff] }
 0x346   : > { %3000 = vmatmul.f32.gmra.mxu3 %v5603_v35  ;;  %v5612_v35 = vld [vmem:[#allocation47_spill] sm:$0xff] }
 0x347   : > { %v2539_v16 = vpop.f32.mrf.mxu1  ;;  %v2776_v36 = vpop.f32.mrf.mxu2  ;;  %v2934_v53 = vadd.f32 %v2933_v28, %v2773_v22  ;;  %v5613_v28 = vand.u32 4294901760, %v5612_v35 }
 0x348   : > { %v2333_v24 = vpop.f32.mrf.mxu0 }
 0x349   : > { %3045 = vst [vmem:[%s4985_s8 + $0x28] sm:$0xff] %v2934_v53  ;;  %v2334_v58 = vadd.f32 %v2333_v24, %v5606_v34  ;;  %v2937_v12 = vpop.f32.mrf.mxu3  ;;  %v5615_v53 = vld [vmem:[#allocation49_spill] sm:$0xff] }
 0x34a   : > { %2634 = vmatmul.f32.gmra.mxu1 %v5605_v59  ;;  %2412 = vmatmul.f32.gmra.mxu0 %v5600_v62 }
 0x34b   : > { %v2534_v33 = vadd.f32 %v2533_v15, %v2334_v58 }
 0x34c   : > { %2843 = vmatmul.f32.gmra.mxu2 %v5607_v38 }
 0x34d   : > { %v2777_v55 = vadd.f32 %v2776_v36, %v2534_v33  ;;  %v5614_v36 = vld [vmem:[#allocation53_spill] sm:$0xff] }
 0x34e   : > { %3004 = vmatmul.f32.gmra.mxu3 %v5607_v38  ;;  %v5616_v38 = vld [vmem:[#allocation50_spill] sm:$0xff] }
 0x34f   : > { %v2545_v46 = vpop.f32.mrf.mxu1  ;;  %v2780_v49 = vpop.f32.mrf.mxu2  ;;  %v2938_v21 = vadd.f32 %v2937_v12, %v2777_v55  ;;  %v5617_v12 = vand.u32 4294901760, %v5616_v38  ;;  %v5618_v55 = vld [vmem:[#allocation52_spill] sm:$0xff] }
 0x350   : > { %v2338_v2 = vpop.f32.mrf.mxu0 }
 0x351   : > { %3046 = vst [vmem:[%s4985_s8 + $0x30] sm:$0xff] %v2938_v21  ;;  %v2339_v25 = vadd.f32 %v2338_v2, %v5610_v1  ;;  %v2941_v51 = vpop.f32.mrf.mxu3 }
 0x352   : > { %2640 = vmatmul.f32.gmra.mxu1 %v5609_v4  ;;  %2417 = vmatmul.f32.gmra.mxu0 %v5604_v37 }
 0x353   : > { %v2540_v15 = vadd.f32 %v2539_v16, %v2339_v25  ;;  %v5619_v25 = vld [vmem:[#allocation54_spill] sm:$0xff] }
 0x354   : > { %2847 = vmatmul.f32.gmra.mxu2 %v5611_v0 }
 0x355   : > { %v2781_v10 = vadd.f32 %v2780_v49, %v2540_v15 }
 0x356   : > { %3008 = vmatmul.f32.gmra.mxu3 %v5611_v0  ;;  %v5620_v0 = vand.u32 4294901760, %v5619_v25 }
 0x357   : > { %v2551_v62 = vpop.f32.mrf.mxu1  ;;  %v2784_v60 = vpop.f32.mrf.mxu2  ;;  %v2942_v31 = vadd.f32 %v2941_v51, %v2781_v10 }
 0x358   : > { %v2343_v23 = vpop.f32.mrf.mxu0 }
 0x359   : > { %3047 = vst [vmem:[%s4985_s8 + $0x38] sm:$0xff] %v2942_v31  ;;  %v2344_v22 = vadd.f32 %v2343_v23, %v5614_v36  ;;  %v2945_v59 = vpop.f32.mrf.mxu3 }
 0x35a   : > { %2646 = vmatmul.f32.gmra.mxu1 %v5613_v28  ;;  %2422 = vmatmul.f32.gmra.mxu0 %v5608_v52  ;;  %v5621_v28 = vld [vmem:[#allocation58_spill] sm:$0xff] }
 0x35b   : > { %v2546_v16 = vadd.f32 %v2545_v46, %v2344_v22  ;;  %v5622_v23 = vand.u32 4294901760, %v5621_v28 }
 0x35c   : > { %2851 = vmatmul.f32.gmra.mxu2 %v5615_v53 }
 0x35d   : > { %v2785_v34 = vadd.f32 %v2784_v60, %v2546_v16 }
 0x35e   : > { %3012 = vmatmul.f32.gmra.mxu3 %v5615_v53 }
 0x35f   : > { %v2557_v37 = vpop.f32.mrf.mxu1  ;;  %v2788_v24 = vpop.f32.mrf.mxu2  ;;  %v2946_v58 = vadd.f32 %v2945_v59, %v2785_v34 }
 0x360   : > { %v2348_v33 = vpop.f32.mrf.mxu0 }
 0x361   : > { %3048 = vst [vmem:[%s4985_s8 + $0x40] sm:$0xff] %v2946_v58  ;;  %v2349_v49 = vadd.f32 %v2348_v33, %v4770_v50  ;;  %v2949_v21 = vpop.f32.mrf.mxu3 }
 0x362   : > { %2652 = vmatmul.f32.gmra.mxu1 %v5617_v12  ;;  %2427 = vmatmul.f32.gmra.mxu0 %v5612_v35 }
 0x363   : > { %v2552_v46 = vadd.f32 %v2551_v62, %v2349_v49 }
 0x364   : > { %2855 = vmatmul.f32.gmra.mxu2 %v5618_v55 }
 0x365   : > { %v2789_v2 = vadd.f32 %v2788_v24, %v2552_v46 }
 0x366   : > { %3016 = vmatmul.f32.gmra.mxu3 %v5618_v55 }
 0x367   : > { %v2563_v52 = vpop.f32.mrf.mxu1  ;;  %v2792_v4 = vpop.f32.mrf.mxu2  ;;  %v2950_v1 = vadd.f32 %v2949_v21, %v2789_v2 }
 0x368   : > { %v2353_v51 = vpop.f32.mrf.mxu0 }
 0x369   : > { %3049 = vst [vmem:[%s4985_s8 + $0x48] sm:$0xff] %v2950_v1  ;;  %v2354_v50 = vadd.f32 %v2353_v51, %v4788_v48  ;;  %v2953_v15 = vpop.f32.mrf.mxu3 }
 0x36a   : > { %2658 = vmatmul.f32.gmra.mxu1 %v5620_v0  ;;  %2432 = vmatmul.f32.gmra.mxu0 %v5616_v38 }
 0x36b   : > { %v2558_v62 = vadd.f32 %v2557_v37, %v2354_v50 }
 0x36c   : > { %2859 = vmatmul.f32.gmra.mxu2 %v4732_v9 }
 0x36d   : > { %v2793_v31 = vadd.f32 %v2792_v4, %v2558_v62 }
 0x36e   : > { %3020 = vmatmul.f32.gmra.mxu3 %v4732_v9 }
 0x36f   : > { %v2569_v60 = vpop.f32.mrf.mxu1  ;;  %v2796_v10 = vpop.f32.mrf.mxu2  ;;  %v2954_v35 = vadd.f32 %v2953_v15, %v2793_v31 }
 0x370   : > { %v2358_v36 = vpop.f32.mrf.mxu0 }
 0x371   : > { %3050 = vst [vmem:[%s4985_s8 + $0x50] sm:$0xff] %v2954_v35  ;;  %v2359_v48 = vadd.f32 %v2358_v36, %v4806_v40  ;;  %v2957_v22 = vpop.f32.mrf.mxu3 }
 0x372   : > { %2664 = vmatmul.f32.gmra.mxu1 %v5622_v23  ;;  %2437 = vmatmul.f32.gmra.mxu0 %v5619_v25 }
 0x373   : > { %v2564_v53 = vadd.f32 %v2563_v52, %v2359_v48 }
 0x374   : > { %2863 = vmatmul.f32.gmra.mxu2 %v4750_v30 }
 0x375   : > { %v2797_v37 = vadd.f32 %v2796_v10, %v2564_v53 }
 0x376   : > { %3024 = vmatmul.f32.gmra.mxu3 %v4750_v30 }
 0x377   : > { %v2575_v59 = vpop.f32.mrf.mxu1  ;;  %v2800_v16 = vpop.f32.mrf.mxu2  ;;  %v2958_v24 = vadd.f32 %v2957_v22, %v2797_v37 }
 0x378   : > { %v2363_v9 = vpop.f32.mrf.mxu0 }
 0x379   : > { %3051 = vst [vmem:[%s4985_s8 + $0x58] sm:$0xff] %v2958_v24  ;;  %v2364_v40 = vadd.f32 %v2363_v9, %v4819_v27  ;;  %v2961_v34 = vpop.f32.mrf.mxu3 }
 0x37a   : > { %2670 = vmatmul.f32.gmra.mxu1 %v2004_v32  ;;  %2442 = vmatmul.f32.gmra.mxu0 %v5621_v28 }
 0x37b   : > { %v2570_v58 = vadd.f32 %v2569_v60, %v2364_v40 }
 0x37c   : > { %2867 = vmatmul.f32.gmra.mxu2 %v4768_v47 }
 0x37d   : > { %v2801_v33 = vadd.f32 %v2800_v16, %v2570_v58 }
 0x37e   : > { %3028 = vmatmul.f32.gmra.mxu3 %v4768_v47  ;;  %v5623_v47 = vand.u32 4294901760, %v4813_v63 }
 0x37f   : > { %v2581_v38 = vpop.f32.mrf.mxu1  ;;  %v2804_v12 = vpop.f32.mrf.mxu2  ;;  %v2962_v49 = vadd.f32 %v2961_v34, %v2801_v33 }
 0x380   : > { %v2368_v30 = vpop.f32.mrf.mxu0 }
 0x381   : > { %3052 = vst [vmem:[%s4985_s8 + $0x60] sm:$0xff] %v2962_v49  ;;  %v2369_v32 = vadd.f32 %v2368_v30, %v4829_v11  ;;  %v2965_v27 = vpop.f32.mrf.mxu3 }
 0x382   : > { %2676 = vmatmul.f32.gmra.mxu1 %v2012_v13  ;;  %2447 = vmatmul.f32.gmra.mxu0 %v4779_v41 }
 0x383   : > { %v2576_v55 = vadd.f32 %v2575_v59, %v2369_v32 }
 0x384   : > { %2871 = vmatmul.f32.gmra.mxu2 %v4786_v43 }
 0x385   : > { %v2805_v52 = vadd.f32 %v2804_v12, %v2576_v55 }
 0x386   : > { %3032 = vmatmul.f32.gmra.mxu3 %v4786_v43 }
 0x387   : > { %v2587_v21 = vpop.f32.mrf.mxu1  ;;  %v2808_v46 = vpop.f32.mrf.mxu2  ;;  %v2966_v4 = vadd.f32 %v2965_v27, %v2805_v52 }
 0x388   : > { %v2373_v13 = vpop.f32.mrf.mxu0 }
 0x389   : > { %3053 = vst [vmem:[%s4985_s8 + $0x68] sm:$0xff] %v2966_v4  ;;  %v2374_v11 = vadd.f32 %v2373_v13, %v4835_v57  ;;  %v2969_v2 = vpop.f32.mrf.mxu3 }
 0x38a   : > { %2682 = vmatmul.f32.gmra.mxu1 %v5623_v47  ;;  %2452 = vmatmul.f32.gmra.mxu0 %v4797_v6 }
 0x38b   : > { %v2582_v1 = vadd.f32 %v2581_v38, %v2374_v11 }
 0x38c   : > { %2875 = vmatmul.f32.gmra.mxu2 %v4804_v7 }
 0x38d   : > { %v2809_v0 = vadd.f32 %v2808_v46, %v2582_v1 }
 0x38e   : > { %3036 = vmatmul.f32.gmra.mxu3 %v4804_v7 }
 0x38f   : > { %v2593_v41 = vpop.f32.mrf.mxu1  ;;  %v2812_v25 = vpop.f32.mrf.mxu2  ;;  %v2970_v51 = vadd.f32 %v2969_v2, %v2809_v0 }
 0x390   : > { %v2378_v43 = vpop.f32.mrf.mxu0 }
 0x391   : > { %3054 = vst [vmem:[%s4985_s8 + $0x70] sm:$0xff] %v2970_v51  ;;  %v2379_v50 = vadd.f32 %v2378_v43, %v4843_v39  ;;  %v2973_v15 = vpop.f32.mrf.mxu3 }
 0x392   : > { %2457 = vmatmul.f32.gmra.mxu0 %v4813_v63 }
 0x393   : > { %v2588_v62 = vadd.f32 %v2587_v21, %v2379_v50 }
 0x395   : > { %v2813_v10 = vadd.f32 %v2812_v25, %v2588_v62 }
 0x397   : > { %v2599_v57 = vpop.f32.mrf.mxu1  ;;  %v2816_v60 = vpop.f32.mrf.mxu2  ;;  %v2974_v6 = vadd.f32 %v2973_v15, %v2813_v10 }
 0x398   : > { %v2383_v31 = vpop.f32.mrf.mxu0 }
 0x399   : > { %3055 = vst [vmem:[%s4985_s8 + $0x78] sm:$0xff] %v2974_v6  ;;  %v2384_v35 = vadd.f32 %v2383_v31, %v4851_v56  ;;  %v2977_v28 = vpop.f32.mrf.mxu3 }
 0x39b   : > { %v2594_v7 = vadd.f32 %v2593_v41, %v2384_v35 }
 0x39d   : > { %v2817_v48 = vadd.f32 %v2816_v60, %v2594_v7 }
 0x39f   : > { %v2605_v23 = vpop.f32.mrf.mxu1  ;;  %v2820_v36 = vpop.f32.mrf.mxu2  ;;  %v2978_v39 = vadd.f32 %v2977_v28, %v2817_v48 }
 0x3a0   : > { %v2388_v22 = vpop.f32.mrf.mxu0 }
 0x3a1   : > { %3056 = vst [vmem:[%s4985_s8 + $0x80] sm:$0xff] %v2978_v39  ;;  %v2389_v53 = vadd.f32 %v2388_v22, %v4859_v18  ;;  %v2981_v63 = vpop.f32.mrf.mxu3 }
 0x3a3   : > { %v2600_v59 = vadd.f32 %v2599_v57, %v2389_v53 }
 0x3a5   : > { %v2821_v24 = vadd.f32 %v2820_v36, %v2600_v59 }
 0x3a7   : > { %v2611_v16 = vpop.f32.mrf.mxu1  ;;  %v2824_v37 = vpop.f32.mrf.mxu2  ;;  %v2982_v9 = vadd.f32 %v2981_v63, %v2821_v24 }
 0x3a8   : > { %v2393_v40 = vpop.f32.mrf.mxu0 }
 0x3a9   : > { %3057 = vst [vmem:[%s4985_s8 + $0x88] sm:$0xff] %v2982_v9  ;;  %v2394_v56 = vadd.f32 %v2393_v40, %v4867_v3  ;;  %v2985_v34 = vpop.f32.mrf.mxu3 }
 0x3ab   : > { %v2606_v58 = vadd.f32 %v2605_v23, %v2394_v56 }
 0x3ad   : > { %v2825_v33 = vadd.f32 %v2824_v37, %v2606_v58 }
 0x3af   : > { %v2617_v38 = vpop.f32.mrf.mxu1  ;;  %v2828_v12 = vpop.f32.mrf.mxu2  ;;  %v2986_v49 = vadd.f32 %v2985_v34, %v2825_v33 }
 0x3b0   : > { %v2398_v30 = vpop.f32.mrf.mxu0 }
 0x3b1   : > { %3058 = vst [vmem:[%s4985_s8 + $0x90] sm:$0xff] %v2986_v49  ;;  %v2399_v18 = vadd.f32 %v2398_v30, %v4875_v29  ;;  %v2989_v32 = vpop.f32.mrf.mxu3 }
 0x3b3   : > { %v2612_v27 = vadd.f32 %v2611_v16, %v2399_v18 }
 0x3b5   : > { %v2829_v46 = vadd.f32 %v2828_v12, %v2612_v27 }
 0x3b7   : > { %v2623_v55 = vpop.f32.mrf.mxu1  ;;  %v2832_v21 = vpop.f32.mrf.mxu2  ;;  %v2990_v52 = vadd.f32 %v2989_v32, %v2829_v46 }
 0x3b8   : > { %v2403_v4 = vpop.f32.mrf.mxu0 }
 0x3b9   : > { %3059 = vst [vmem:[%s4985_s8 + $0x98] sm:$0xff] %v2990_v52  ;;  %v2404_v3 = vadd.f32 %v2403_v4, %v4883_v54  ;;  %v2993_v47 = vpop.f32.mrf.mxu3 }
 0x3bb   : > { %v2618_v13 = vadd.f32 %v2617_v38, %v2404_v3 }
 0x3bd   : > { %v2833_v1 = vadd.f32 %v2832_v21, %v2618_v13 }
 0x3bf   : > { %v2629_v11 = vpop.f32.mrf.mxu1  ;;  %v2836_v2 = vpop.f32.mrf.mxu2  ;;  %v2994_v41 = vadd.f32 %v2993_v47, %v2833_v1 }
 0x3c0   : > { %v2408_v25 = vpop.f32.mrf.mxu0 }
 0x3c1   : > { %3060 = vst [vmem:[%s4985_s8 + $0xa0] sm:$0xff] %v2994_v41  ;;  %v2409_v29 = vadd.f32 %v2408_v25, %v4891_v26  ;;  %v2997_v0 = vpop.f32.mrf.mxu3 }
 0x3c3   : > { %v2624_v51 = vadd.f32 %v2623_v55, %v2409_v29 }
 0x3c5   : > { %v2837_v15 = vadd.f32 %v2836_v2, %v2624_v51 }
 0x3c7   : > { %v2635_v43 = vpop.f32.mrf.mxu1  ;;  %v2840_v50 = vpop.f32.mrf.mxu2  ;;  %v2998_v62 = vadd.f32 %v2997_v0, %v2837_v15 }
 0x3c8   : > { %v2413_v57 = vpop.f32.mrf.mxu0 }
 0x3c9   : > { %3061 = vst [vmem:[%s4985_s8 + $0xa8] sm:$0xff] %v2998_v62  ;;  %v2414_v54 = vadd.f32 %v2413_v57, %v4899_v45  ;;  %v3001_v60 = vpop.f32.mrf.mxu3 }
 0x3cb   : > { %v2630_v10 = vadd.f32 %v2629_v11, %v2414_v54 }
 0x3cd   : > { %v2841_v35 = vadd.f32 %v2840_v50, %v2630_v10 }
 0x3cf   : > { %v2641_v6 = vpop.f32.mrf.mxu1  ;;  %v2844_v31 = vpop.f32.mrf.mxu2  ;;  %v3002_v28 = vadd.f32 %v3001_v60, %v2841_v35 }
 0x3d0   : > { %v2418_v7 = vpop.f32.mrf.mxu0 }
 0x3d1   : > { %3062 = vst [vmem:[%s4985_s8 + $0xb0] sm:$0xff] %v3002_v28  ;;  %v2419_v26 = vadd.f32 %v2418_v7, %v4907_v14  ;;  %v3005_v23 = vpop.f32.mrf.mxu3 }
 0x3d3   : > { %v2636_v36 = vadd.f32 %v2635_v43, %v2419_v26 }
 0x3d5   : > { %v2845_v39 = vadd.f32 %v2844_v31, %v2636_v36 }
 0x3d7   : > { %v2848_v48 = vpop.f32.mrf.mxu2  ;;  %v2647_v22 = vpop.f32.mrf.mxu1  ;;  %v3006_v53 = vadd.f32 %v3005_v23, %v2845_v39 }
 0x3d8   : > { %v2423_v63 = vpop.f32.mrf.mxu0 }
 0x3d9   : > { %3063 = vst [vmem:[%s4985_s8 + $0xb8] sm:$0xff] %v3006_v53  ;;  %v2424_v45 = vadd.f32 %v2423_v63, %v4915_v5  ;;  %v3009_v59 = vpop.f32.mrf.mxu3 }
 0x3db   : > { %v2642_v16 = vadd.f32 %v2641_v6, %v2424_v45 }
 0x3dd   : > { %v2849_v24 = vadd.f32 %v2848_v48, %v2642_v16 }
 0x3df   : > { %v2852_v37 = vpop.f32.mrf.mxu2  ;;  %v3010_v9 = vadd.f32 %v3009_v59, %v2849_v24  ;;  %v2653_v56 = vpop.f32.mrf.mxu1 }
 0x3e0   : > { %v2428_v40 = vpop.f32.mrf.mxu0 }
 0x3e1   : > { %3064 = vst [vmem:[%s4985_s8 + $0xc0] sm:$0xff] %v3010_v9  ;;  %v2429_v14 = vadd.f32 %v2428_v40, %v4923_v61  ;;  %v3013_v34 = vpop.f32.mrf.mxu3 }
 0x3e3   : > { %v2648_v58 = vadd.f32 %v2647_v22, %v2429_v14 }
 0x3e5   : > { %v2853_v12 = vadd.f32 %v2852_v37, %v2648_v58 }
 0x3e7   : > { %v2856_v38 = vpop.f32.mrf.mxu2  ;;  %v3014_v33 = vadd.f32 %v3013_v34, %v2853_v12  ;;  %v2659_v30 = vpop.f32.mrf.mxu1 }
 0x3e8   : > { %v2433_v49 = vpop.f32.mrf.mxu0 }
 0x3e9   : > { %3065 = vst [vmem:[%s4985_s8 + $0xc8] sm:$0xff] %v3014_v33  ;;  %v2434_v5 = vadd.f32 %v2433_v49, %v4931_v44  ;;  %v3017_v18 = vpop.f32.mrf.mxu3 }
 0x3eb   : > { %v2654_v32 = vadd.f32 %v2653_v56, %v2434_v5 }
 0x3ed   : > { %v2857_v55 = vadd.f32 %v2856_v38, %v2654_v32 }
 0x3ef   : > { %v2860_v27 = vpop.f32.mrf.mxu2  ;;  %v3018_v21 = vadd.f32 %v3017_v18, %v2857_v55  ;;  %v2665_v3 = vpop.f32.mrf.mxu1 }
 0x3f0   : > { %v2438_v46 = vpop.f32.mrf.mxu0 }
 0x3f1   : > { %3066 = vst [vmem:[%s4985_s8 + $0xd0] sm:$0xff] %v3018_v21  ;;  %v2439_v61 = vadd.f32 %v2438_v46, %v4939_v19  ;;  %v3021_v52 = vpop.f32.mrf.mxu3 }
 0x3f3   : > { %v2660_v4 = vadd.f32 %v2659_v30, %v2439_v61 }
 0x3f5   : > { %v2861_v47 = vadd.f32 %v2860_v27, %v2660_v4 }
 0x3f7   : > { %v2864_v13 = vpop.f32.mrf.mxu2  ;;  %v3022_v11 = vadd.f32 %v3021_v52, %v2861_v47  ;;  %v2671_v29 = vpop.f32.mrf.mxu1 }
 0x3f8   : > { %v2443_v2 = vpop.f32.mrf.mxu0 }
 0x3f9   : > { %3067 = vst [vmem:[%s4985_s8 + $0xd8] sm:$0xff] %v3022_v11  ;;  %v2444_v44 = vadd.f32 %v2443_v2, %v4947_v42  ;;  %v3025_v1 = vpop.f32.mrf.mxu3 }
 0x3fb   : > { %v2666_v41 = vadd.f32 %v2665_v3, %v2444_v44 }
 0x3fd   : > { %v2865_v25 = vadd.f32 %v2864_v13, %v2666_v41 }
 0x3ff   : > { %v3026_v0 = vadd.f32 %v3025_v1, %v2865_v25  ;;  %v2868_v19 = vpop.f32.mrf.mxu2  ;;  %v2677_v54 = vpop.f32.mrf.mxu1 }
 0x400   : > { %v2448_v51 = vpop.f32.mrf.mxu0 }
 0x401   : > { %3068 = vst [vmem:[%s4985_s8 + $0xe0] sm:$0xff] %v3026_v0  ;;  %v2449_v43 = vadd.f32 %v2448_v51, %v4955_v17  ;;  %v3029_v50 = vpop.f32.mrf.mxu3 }
 0x403   : > { %v2672_v15 = vadd.f32 %v2671_v29, %v2449_v43 }
 0x405   : > { %v2869_v62 = vadd.f32 %v2868_v19, %v2672_v15 }
 0x407   : > { %v3030_v57 = vadd.f32 %v3029_v50, %v2869_v62  ;;  %v2872_v10 = vpop.f32.mrf.mxu2  ;;  %v2683_v26 = vpop.f32.mrf.mxu1 }
 0x408   : > { %v2453_v42 = vpop.f32.mrf.mxu0 }
 0x409   : > { %3069 = vst [vmem:[%s4985_s8 + $0xe8] sm:$0xff] %v3030_v57  ;;  %v2454_v60 = vadd.f32 %v2453_v42, %v4963_v20  ;;  %v3033_v31 = vpop.f32.mrf.mxu3 }
 0x40b   : > { %v2678_v6 = vadd.f32 %v2677_v54, %v2454_v60 }
 0x40d   : > { %v2873_v35 = vadd.f32 %v2872_v10, %v2678_v6 }
 0x40f   : > { %v3034_v28 = vadd.f32 %v3033_v31, %v2873_v35  ;;  %v2876_v20 = vpop.f32.mrf.mxu2 }
 0x410   : > { %v2458_v17 = vpop.f32.mrf.mxu0 }
 0x411   : > { %3070 = vst [vmem:[%s4985_s8 + $0xf0] sm:$0xff] %v3034_v28  ;;  %v2459_v7 = vadd.f32 %v2458_v17, %v4971_v8  ;;  %v3037_v48 = vpop.f32.mrf.mxu3 }
 0x413   : > { %v2684_v23 = vadd.f32 %v2683_v26, %v2459_v7 }
 0x415   : > { %v2877_v36 = vadd.f32 %v2876_v20, %v2684_v23 }
 0x417   : > { %v3038_v39 = vadd.f32 %v3037_v48, %v2877_v36 }
 0x419   : > { %3071 = vst [vmem:[%s4985_s8 + $0xf8] sm:$0xff] %v3038_v39 }
 0x41a   : > { %3236 = shalt.err (!%p3233_p3)
}
 0x41b   : > { %s3275_s3 = smov 128   ;;  %s3276_s4 = smov 8  }
 0x41c   : > { %3163 = dma.vmem_to_hbm [thread:$0]  (%p3330_p5), %s3086_s21, 4096, %s3088_s22, %s3073_s13, %s3275_s3, %s3275_s3, %s3276_s4  }
 0x41d PF: > { %p3169_p4 = scmp.ge.s32.totalorder %s3271_s12, 2  ;;  %s3102_s5 = sand.u32 1, %s3259_s9  }
 0x41e   : > { %s3103_s6 = scalar_lea.sflag [#allocation3], %s3102_s5 }
 0x41f   : > { %p3166_p7 = pnand %p3169_p4, %p3334_p6 }
 0x421   : > { %p3167_p8 = pneg %p3166_p7 }
 0x423   : > { %3254 = dma.done.wait (%p3167_p8), %s3103_s6, 4096  }
 0x424   : > { %3256 = vsyncadd (%p3167_p8), %s3103_s6, 4294963200  ;;  %p12_p9 = scmp.ge.s32.totalorder %s3317_s15, 4   ;;  %s5624_s9 = smov %s3263_s10 }
 0x425   : > { %s5625_s10 = smov %s3267_s11  ;;  %s5626_s11 = smov %s3328_s18 }
 0x426   : > { %s5627_s12 = smov %s3317_s15  ;;  %14 = sbr.rel (!%p12_p9) target bundleno = 3 (0x3), region = 63 }
 0x42b   :  { %3109 = vsyncpa [#allocation3], 1 }
 0x42c   :  { %3111 = vsyncpa [#allocation3 + $0x1], 1 }

</bundles_post_ra>
